<compile_context>
chip_gen: v7x
topology: tpu7x:2x2x1
jax: 0.10.0
libtpu: 0.0.40
codegen_flags: <defaults>
</compile_context>

<pallas_src>
import functools

import numpy as np
import jax
import jax.numpy as jnp
from jax.experimental import pallas as pl
from jax.experimental.pallas import tpu as pltpu


# ----------------------------------------------------------------------------
# In-kernel sin/cos (Cephes-style).  Uses only mul/add/convert/select so it is
# guaranteed to lower in Mosaic, and the shared quadrant reduction makes the
# combined sincos cheaper than two EUP transcendentals.
# ----------------------------------------------------------------------------
_TWO_OVER_PI = 0.6366197723675814
_OFF = 65536.0                       # makes float->int truncation act as floor
_DP1 = 1.5703125                     # pi/2 split: few mantissa bits so j*DP1
_DP2 = 4.837512969970703125e-4       # is exact, giving accurate reduction
_DP3 = 7.54978995489188e-8


def _sincos(x):
    """Return (sin(x), cos(x)) for a float32 array x."""
    t = x * _TWO_OVER_PI
    ji = (t + (_OFF + 0.5)).astype(jnp.int32)         # round(t) + 65536 (>0)
    jf = ji.astype(jnp.float32) - _OFF                 # nearest quadrant index
    q = ji & 3                                         # j mod 4 (65536 % 4 == 0)

    # extended-precision reduction: y = x - j * pi/2 in [-pi/4, pi/4]
    y = x - jf * _DP1
    y = y - jf * _DP2
    y = y - jf * _DP3
    z = y * y

    # sin polynomial on [-pi/4, pi/4]
    s = -1.9515295891e-4
    s = s * z + 8.3321608736e-3
    s = s * z + -1.6666654611e-1
    s = s * z * y + y
    # cos polynomial on [-pi/4, pi/4]
    c = 2.443315711809948e-5
    c = c * z + -1.388731625493765e-3
    c = c * z + 4.166664568298827e-2
    c = c * (z * z) - 0.5 * z + 1.0

    swap = (q == 1) | (q == 3)
    sin_v = jnp.where(swap, c, s)
    cos_v = jnp.where(swap, s, c)
    sin_v = jnp.where((q == 2) | (q == 3), -sin_v, sin_v)
    cos_v = jnp.where((q == 1) | (q == 2), -cos_v, cos_v)
    return sin_v, cos_v


# ----------------------------------------------------------------------------
# Shared NUDFT accumulation:  acc[c, j] = sum_r A[c, r] * exp(i * rowf[r]·colf[j])
# The basis tile exp(i*phase) is built in-kernel from an outer product of the
# (resident) row factors and the (per-tile) column factors.
# ----------------------------------------------------------------------------
def _nudft_accumulate(a_r_ref, a_i_ref, rowf_ref, colf_ref, n_chunks):
    C = a_r_ref.shape[2]
    tn = colf_ref.shape[2]
    c0 = colf_ref[0, 0:1, :]                           # (1, tn)
    c1 = colf_ref[0, 1:2, :]                           # (1, tn)

    def chunk(c, carry):
        acc_r, acc_i = carry
        rows = rowf_ref[0, c]                          # (tk, 2), resident in VMEM
        ph = rows[:, 0:1] * c0 + rows[:, 1:2] * c1     # (tk, tn) phase tile
        e_i, e_r = _sincos(ph)                         # exp(i*ph) = e_r + i*e_i
        a_r = a_r_ref[0, c]                            # (C, tk), resident in VMEM
        a_i = a_i_ref[0, c]
        acc_r = acc_r + (jnp.dot(a_r, e_r, preferred_element_type=jnp.float32)
                         - jnp.dot(a_i, e_i, preferred_element_type=jnp.float32))
        acc_i = acc_i + (jnp.dot(a_r, e_i, preferred_element_type=jnp.float32)
                         + jnp.dot(a_i, e_r, preferred_element_type=jnp.float32))
        return acc_r, acc_i

    init = (jnp.zeros((C, tn), jnp.float32), jnp.zeros((C, tn), jnp.float32))
    if n_chunks == 1:
        return chunk(0, init)
    return jax.lax.fori_loop(0, n_chunks, chunk, init, unroll=n_chunks <= 8)


def _nudft_fwd_kernel(a_r_ref, a_i_ref, rowf_ref, colf_ref, s_ref,
                      o_r_ref, o_i_ref, *, n_chunks):
    acc_r, acc_i = _nudft_accumulate(a_r_ref, a_i_ref, rowf_ref, colf_ref, n_chunks)
    s = s_ref[0]                                       # (1, tn): sqrt(dcomp)/sqrt(N)
    o_r_ref[0] = acc_r * s
    o_i_ref[0] = acc_i * s


def _nudft_adj_kernel(a_r_ref, a_i_ref, rowf_ref, colf_ref, sm_r_ref, sm_i_ref,
                      o_r_ref, o_i_ref, *, n_chunks):
    acc_r, acc_i = _nudft_accumulate(a_r_ref, a_i_ref, rowf_ref, colf_ref, n_chunks)
    s_r = sm_r_ref[0]                                  # (C, tn)
    s_i = sm_i_ref[0]
    # fused coil combine: sum_c conj(smaps) * coil_image  -> lane-dense (1, tn)
    o_r_ref[0] = jnp.sum(s_r * acc_r + s_i * acc_i, axis=0, keepdims=True)
    o_i_ref[0] = jnp.sum(s_r * acc_i - s_i * acc_r, axis=0, keepdims=True)


# ----------------------------------------------------------------------------
# Host-side glue: padding, layout, pallas_call wiring.
# ----------------------------------------------------------------------------
def _round_up(n, m):
    return ((n + m - 1) // m) * m


def _pick_tile(n):
    """Largest tile from {256, 128} dividing n (n is a multiple of 128)."""
    for t in (256, 128):
        if n % t == 0:
            return t
    return n


def _pad_last(x, size):
    pad = size - x.shape[-1]
    if pad == 0:
        return x
    widths = [(0, 0)] * (x.ndim - 1) + [(0, pad)]
    return jnp.pad(x, widths)


def _grid_coords(H, W):
    x = jnp.arange(H, dtype=jnp.float32) - H // 2
    y = jnp.arange(W, dtype=jnp.float32) - W // 2
    xx, yy = jnp.meshgrid(x, y, indexing="ij")
    return jnp.stack([xx.reshape(-1), yy.reshape(-1)], axis=0)     # (2, H*W)


def nufft_forward(image, smaps, ktraj, dcomp):
    """image (B,H,W) c64, smaps (B,C,H,W) c64, ktraj (B,2,K), dcomp (B,K) -> (B,C,K)."""
    B, C, H, W = smaps.shape
    N = H * W
    K = ktraj.shape[-1]

    # coil images (the torch module's input.unsqueeze(1) * smaps)
    coil = (smaps * image[:, None, :, :]).reshape(B, C, N)

    # reduction (image) axis: pad to a multiple of 128, chunk, keep resident
    Np = _round_up(N, 128)
    tk = _pick_tile(Np)
    n_chunks = Np // tk
    a_r = _pad_last(jnp.real(coil), Np).reshape(B, C, n_chunks, tk).transpose(0, 2, 1, 3)
    a_i = _pad_last(jnp.imag(coil), Np).reshape(B, C, n_chunks, tk).transpose(0, 2, 1, 3)
    rowf = _pad_last(_grid_coords(H, W), Np)                        # (2, Np)
    rowf = rowf.reshape(2, n_chunks, tk).transpose(1, 2, 0)[None]   # (1, nch, tk, 2)

    # output (k-space) axis: pad to a multiple of 128
    Kp = _round_up(K, 128)
    tn = _pick_tile(Kp)
    kt = jnp.roll(ktraj, shift=1, axis=1).astype(jnp.float32)       # torch.roll(ktraj,1,1)
    colf = _pad_last(-2.0 * np.pi * kt, Kp)                         # exp(-i*2pi*<x,k>)
    scale = _pad_last((jnp.sqrt(dcomp) / np.sqrt(N)).astype(jnp.float32), Kp)[:, None, :]

    out_r, out_i = pl.pallas_call(
        functools.partial(_nudft_fwd_kernel, n_chunks=n_chunks),
        out_shape=(jax.ShapeDtypeStruct((B, C, Kp), jnp.float32),
                   jax.ShapeDtypeStruct((B, C, Kp), jnp.float32)),
        grid_spec=pltpu.PrefetchScalarGridSpec(
            num_scalar_prefetch=0,
            grid=(B, Kp // tn),
            in_specs=[
                pl.BlockSpec((1, n_chunks, C, tk), lambda b, j: (b, 0, 0, 0)),  # coil re
                pl.BlockSpec((1, n_chunks, C, tk), lambda b, j: (b, 0, 0, 0)),  # coil im
                pl.BlockSpec((1, n_chunks, tk, 2), lambda b, j: (0, 0, 0, 0)),  # grid coords
                pl.BlockSpec((1, 2, tn), lambda b, j: (b, 0, j)),               # -2pi*ktraj
                pl.BlockSpec((1, 1, tn), lambda b, j: (b, 0, j)),               # scale
            ],
            out_specs=(pl.BlockSpec((1, C, tn), lambda b, j: (b, 0, j)),
                       pl.BlockSpec((1, C, tn), lambda b, j: (b, 0, j))),
        ),
        compiler_params=pltpu.CompilerParams(
            dimension_semantics=("parallel", "parallel"),
            vmem_limit_bytes=48 * 1024 * 1024),
    )(a_r, a_i, rowf, colf, scale)

    return (out_r + 1j * out_i)[:, :, :K].astype(jnp.complex64)


def nufft_adjoint(ksp, smaps, ktraj, dcomp):
    """ksp (B,C,K) c64 -> image (B,H,W) c64 (includes the module's squeeze(1))."""
    B, C, H, W = smaps.shape
    N = H * W
    K = ktraj.shape[-1]

    # input * sqrt(dcomp), ortho norm folded in
    y = ksp * (jnp.sqrt(dcomp) / np.sqrt(N)).astype(jnp.float32)[:, None, :]

    # reduction (k-space) axis: pad, chunk, keep resident
    Kp = _round_up(K, 128)
    tk = _pick_tile(Kp)
    n_chunks = Kp // tk
    a_r = _pad_last(jnp.real(y), Kp).reshape(B, C, n_chunks, tk).transpose(0, 2, 1, 3)
    a_i = _pad_last(jnp.imag(y), Kp).reshape(B, C, n_chunks, tk).transpose(0, 2, 1, 3)
    kt = jnp.roll(ktraj, shift=1, axis=1).astype(jnp.float32)
    rowf = _pad_last(2.0 * np.pi * kt, Kp)                          # (B, 2, Kp)
    rowf = rowf.reshape(B, 2, n_chunks, tk).transpose(0, 2, 3, 1)   # (B, nch, tk, 2)

    # output (image) axis: pad to a multiple of 128
    Np = _round_up(N, 128)
    tn = _pick_tile(Np)
    colf = _pad_last(_grid_coords(H, W), Np)[None]                  # (1, 2, Np)
    sm_r = _pad_last(jnp.real(smaps).reshape(B, C, N), Np)
    sm_i = _pad_last(jnp.imag(smaps).reshape(B, C, N), Np)

    out_r, out_i = pl.pallas_call(
        functools.partial(_nudft_adj_kernel, n_chunks=n_chunks),
        out_shape=(jax.ShapeDtypeStruct((B, 1, Np), jnp.float32),
                   jax.ShapeDtypeStruct((B, 1, Np), jnp.float32)),
        grid_spec=pltpu.PrefetchScalarGridSpec(
            num_scalar_prefetch=0,
            grid=(B, Np // tn),
            in_specs=[
                pl.BlockSpec((1, n_chunks, C, tk), lambda b, j: (b, 0, 0, 0)),  # y re
                pl.BlockSpec((1, n_chunks, C, tk), lambda b, j: (b, 0, 0, 0)),  # y im
                pl.BlockSpec((1, n_chunks, tk, 2), lambda b, j: (b, 0, 0, 0)),  # 2pi*ktraj
                pl.BlockSpec((1, 2, tn), lambda b, j: (0, 0, j)),               # grid coords
                pl.BlockSpec((1, C, tn), lambda b, j: (b, 0, j)),               # smaps re
                pl.BlockSpec((1, C, tn), lambda b, j: (b, 0, j)),               # smaps im
            ],
            out_specs=(pl.BlockSpec((1, 1, tn), lambda b, j: (b, 0, j)),
                       pl.BlockSpec((1, 1, tn), lambda b, j: (b, 0, j))),
        ),
        compiler_params=pltpu.CompilerParams(
            dimension_semantics=("parallel", "parallel"),
            vmem_limit_bytes=48 * 1024 * 1024),
    )(a_r, a_i, rowf, colf, sm_r, sm_i)

    out = (out_r + 1j * out_i)[:, 0, :N].astype(jnp.complex64)
    return out.reshape(B, H, W)


class NUFFT:
    """Mirrors the PyTorch module's forward(input, smaps, ktraj, dcomp, inv)."""
    # The torch module has no learnable parameters (only KB interp tables).
    def __init__(self, nuffttype="torchkbnufft", configs=None):
        self.nuffttype = nuffttype
        self.configs = configs or {}
        self._fwd = jax.jit(nufft_forward)
        self._adj = jax.jit(nufft_adjoint)

    def __call__(self, input, smaps, ktraj, dcomp, inv=False):
        if not inv:
            return self._fwd(input, smaps, ktraj, dcomp)
        return self._adj(input, smaps, ktraj, dcomp)


# ----------------------------------------------------------------------------
# Pure numpy (float64) references for correctness checking.
# ----------------------------------------------------------------------------
def _np_basis(smaps, ktraj):
    B, C, H, W = smaps.shape
    kt = np.roll(np.asarray(ktraj, np.float64), 1, axis=1)
    x = np.arange(H) - H // 2
    y = np.arange(W) - W // 2
    xx, yy = np.meshgrid(x, y, indexing="ij")
    xx = xx.reshape(-1).astype(np.float64)
    yy = yy.reshape(-1).astype(np.float64)
    phase = 2.0 * np.pi * (xx[None, :, None] * kt[:, 0][:, None, :]
                           + yy[None, :, None] * kt[:, 1][:, None, :])    # (B, N, K)
    return phase


def _reference_forward(image, smaps, ktraj, dcomp):
    image = np.asarray(image, np.complex128)
    smaps = np.asarray(smaps, np.complex128)
    dcomp = np.asarray(dcomp, np.float64)
    B, C, H, W = smaps.shape
    N = H * W
    E = np.exp(-1j * _np_basis(smaps, ktraj))
    coil = (smaps * image[:, None]).reshape(B, C, N)
    return np.einsum("bcn,bnk->bck", coil, E) / np.sqrt(N) * np.sqrt(dcomp)[:, None, :]


def _reference_adjoint(ksp, smaps, ktraj, dcomp):
    ksp = np.asarray(ksp, np.complex128)
    smaps = np.asarray(smaps, np.complex128)
    dcomp = np.asarray(dcomp, np.float64)
    B, C, H, W = smaps.shape
    N = H * W
    E = np.exp(1j * _np_basis(smaps, ktraj))
    y = ksp * np.sqrt(dcomp)[:, None, :]
    coil = np.einsum("bck,bnk->bcn", y, E) / np.sqrt(N)
    out = np.sum(np.conj(smaps.reshape(B, C, N)) * coil, axis=1)
    return out.reshape(B, H, W)


def _check(name, got, want, tol=2e-2):
    got = np.asarray(got)
    want = np.asarray(want)
    err = np.max(np.abs(got - want)) / (np.max(np.abs(want)) + 1e-30)
    assert err < tol, f"{name}: max relative error {err:.3e} exceeds {tol}"


if __name__ == "__main__":
    B, C, H, W = 2, 4, 16, 16
    nspokes, nfe = 8, 16
    K = nspokes * nfe                                                  # 128

    key = jax.random.PRNGKey(0)
    k1, k2, k3, k4 = jax.random.split(key, 4)
    image = (jax.random.normal(k1, (B, H, W))
             + 1j * jax.random.normal(k2, (B, H, W))).astype(jnp.complex64)
    smaps = (jax.random.normal(k3, (B, C, H, W))
             + 1j * jax.random.normal(k4, (B, C, H, W))).astype(jnp.complex64)

    # radial trajectory in cycles/pixel, in [-0.5, 0.5)
    r = (jnp.arange(nfe, dtype=jnp.float32) - nfe / 2) / nfe
    ang = jnp.arange(nspokes, dtype=jnp.float32) * (np.pi / nspokes)
    kx = (r[None, :] * jnp.cos(ang)[:, None]).reshape(-1)
    ky = (r[None, :] * jnp.sin(ang)[:, None]).reshape(-1)
    ktraj = jnp.broadcast_to(jnp.stack([kx, ky], axis=0), (B, 2, K)).astype(jnp.float32)
    dcomp = jnp.broadcast_to(jnp.tile(jnp.abs(r), nspokes) + 1.0 / K, (B, K)).astype(jnp.float32)

    nufft = NUFFT("torchkbnufft", {"img_dim": H, "osf": 2.0})
    ksp = nufft(image, smaps, ktraj, dcomp, inv=False)       # (B, C, K) complex64
    img_adj = nufft(ksp, smaps, ktraj, dcomp, inv=True)      # (B, H, W) complex64
    jax.block_until_ready((ksp, img_adj))

    assert ksp.shape == (B, C, K) and ksp.dtype == jnp.complex64
    assert img_adj.shape == (B, H, W) and img_adj.dtype == jnp.complex64

    _check("forward", ksp, _reference_forward(image, smaps, ktraj, dcomp))
    _check("adjoint", img_adj, _reference_adjoint(ksp, smaps, ktraj, dcomp))
    print("KERNEL_OK")
</pallas_src>

<mosaic_0001>
module attributes {stable_mosaic.version = 11 : i64} {
  func.func @_nudft_fwd_kernel(%arg0: i32, %arg1: i32, %arg2: memref<1x1x4x256xf32, #tpu.memory_space<vmem>>, %arg3: memref<1x1x4x256xf32, #tpu.memory_space<vmem>>, %arg4: memref<1x1x256x2xf32, #tpu.memory_space<vmem>>, %arg5: memref<1x2x128xf32, #tpu.memory_space<vmem>>, %arg6: memref<1x1x128xf32, #tpu.memory_space<vmem>>, %arg7: memref<1x4x128xf32, #tpu.memory_space<vmem>>, %arg8: memref<1x4x128xf32, #tpu.memory_space<vmem>>) attributes {dimension_semantics = [#tpu.dimension_semantics<parallel>, #tpu.dimension_semantics<parallel>], iteration_bounds = array<i64: 2, 1>, scalar_prefetch = 0 : i64, scratch_operands = 0 : i64, tpu.core_type = #tpu.core_type<tc>, window_params = [{transform_indices = @transform_0, window_bounds = array<i64: 1, 1, 4, 256>}, {transform_indices = @transform_1, window_bounds = array<i64: 1, 1, 4, 256>}, {pipeline_mode = #tpu.pipeline_mode<synchronous>, transform_indices = @transform_2, window_bounds = array<i64: 1, 1, 256, 2>}, {transform_indices = @transform_3, window_bounds = array<i64: 1, 2, 128>}, {transform_indices = @transform_4, window_bounds = array<i64: 1, 1, 128>}, {transform_indices = @transform_5, window_bounds = array<i64: 1, 4, 128>}, {transform_indices = @transform_6, window_bounds = array<i64: 1, 4, 128>}]} {
    %c0 = arith.constant 0 : index
    %c0_0 = arith.constant 0 : index
    %c0_1 = arith.constant 0 : index
    %0 = vector.load %arg5[%c0, %c0_0, %c0_1] : memref<1x2x128xf32, #tpu.memory_space<vmem>>, vector<1x1x128xf32>
    %1 = vector.shape_cast %0 : vector<1x1x128xf32> to vector<1x128xf32>
    %c0_2 = arith.constant 0 : index
    %c1 = arith.constant 1 : index
    %c0_3 = arith.constant 0 : index
    %2 = vector.load %arg5[%c0_2, %c1, %c0_3] : memref<1x2x128xf32, #tpu.memory_space<vmem>>, vector<1x1x128xf32>
    %3 = vector.shape_cast %2 : vector<1x1x128xf32> to vector<1x128xf32>
    %cst = arith.constant 0.000000e+00 : f32
    %4 = vector.broadcast %cst : f32 to vector<4x128xf32>
    %cst_4 = arith.constant 0.000000e+00 : f32
    %5 = vector.broadcast %cst_4 : f32 to vector<4x128xf32>
    %c0_5 = arith.constant 0 : index
    %c0_6 = arith.constant 0 : index
    %c0_7 = arith.constant 0 : index
    %c0_8 = arith.constant 0 : index
    %6 = vector.load %arg4[%c0_5, %c0_6, %c0_7, %c0_8] : memref<1x1x256x2xf32, #tpu.memory_space<vmem>>, vector<1x1x256x2xf32>
    %7 = vector.shape_cast %6 : vector<1x1x256x2xf32> to vector<256x2xf32>
    %8 = vector.extract_strided_slice %7 {offsets = [0, 0], sizes = [256, 1], strides = [1, 1]} : vector<256x2xf32> to vector<256x1xf32>
    %9 = vector.broadcast %8 : vector<256x1xf32> to vector<256x128xf32>
    %10 = vector.broadcast %1 : vector<1x128xf32> to vector<256x128xf32>
    %11 = arith.mulf %9, %10 : vector<256x128xf32>
    %12 = vector.extract_strided_slice %7 {offsets = [0, 1], sizes = [256, 1], strides = [1, 1]} : vector<256x2xf32> to vector<256x1xf32>
    %13 = vector.broadcast %12 : vector<256x1xf32> to vector<256x128xf32>
    %14 = vector.broadcast %3 : vector<1x128xf32> to vector<256x128xf32>
    %15 = arith.mulf %13, %14 : vector<256x128xf32>
    %16 = arith.addf %11, %15 : vector<256x128xf32>
    %cst_9 = arith.constant 0.636619746 : f32
    %17 = vector.broadcast %cst_9 : f32 to vector<256x128xf32>
    %18 = arith.mulf %16, %17 : vector<256x128xf32>
    %cst_10 = arith.constant 6.553650e+04 : f32
    %19 = vector.broadcast %cst_10 : f32 to vector<256x128xf32>
    %20 = arith.addf %18, %19 : vector<256x128xf32>
    %21 = arith.fptosi %20 : vector<256x128xf32> to vector<256x128xi32>
    %22 = arith.sitofp %21 : vector<256x128xi32> to vector<256x128xf32>
    %cst_11 = arith.constant 6.553600e+04 : f32
    %23 = vector.broadcast %cst_11 : f32 to vector<256x128xf32>
    %24 = arith.subf %22, %23 : vector<256x128xf32>
    %c3_i32 = arith.constant 3 : i32
    %25 = vector.broadcast %c3_i32 : i32 to vector<256x128xi32>
    %26 = arith.andi %21, %25 : vector<256x128xi32>
    %cst_12 = arith.constant 1.5703125 : f32
    %27 = vector.broadcast %cst_12 : f32 to vector<256x128xf32>
    %28 = arith.mulf %24, %27 : vector<256x128xf32>
    %29 = arith.subf %16, %28 : vector<256x128xf32>
    %cst_13 = arith.constant 4.83751297E-4 : f32
    %30 = vector.broadcast %cst_13 : f32 to vector<256x128xf32>
    %31 = arith.mulf %24, %30 : vector<256x128xf32>
    %32 = arith.subf %29, %31 : vector<256x128xf32>
    %cst_14 = arith.constant 7.549790e-08 : f32
    %33 = vector.broadcast %cst_14 : f32 to vector<256x128xf32>
    %34 = arith.mulf %24, %33 : vector<256x128xf32>
    %35 = arith.subf %32, %34 : vector<256x128xf32>
    %36 = arith.mulf %35, %35 : vector<256x128xf32>
    %cst_15 = arith.constant -1.95152956E-4 : f32
    %37 = vector.broadcast %cst_15 : f32 to vector<256x128xf32>
    %38 = arith.mulf %37, %36 : vector<256x128xf32>
    %cst_16 = arith.constant 0.00833216123 : f32
    %39 = vector.broadcast %cst_16 : f32 to vector<256x128xf32>
    %40 = arith.addf %38, %39 : vector<256x128xf32>
    %41 = arith.mulf %40, %36 : vector<256x128xf32>
    %cst_17 = arith.constant -0.166666552 : f32
    %42 = vector.broadcast %cst_17 : f32 to vector<256x128xf32>
    %43 = arith.addf %41, %42 : vector<256x128xf32>
    %44 = arith.mulf %43, %36 : vector<256x128xf32>
    %45 = arith.mulf %44, %35 : vector<256x128xf32>
    %46 = arith.addf %45, %35 : vector<256x128xf32>
    %cst_18 = arith.constant 2.44331568E-5 : f32
    %47 = vector.broadcast %cst_18 : f32 to vector<256x128xf32>
    %48 = arith.mulf %47, %36 : vector<256x128xf32>
    %cst_19 = arith.constant -0.00138873165 : f32
    %49 = vector.broadcast %cst_19 : f32 to vector<256x128xf32>
    %50 = arith.addf %48, %49 : vector<256x128xf32>
    %51 = arith.mulf %50, %36 : vector<256x128xf32>
    %cst_20 = arith.constant 0.0416666456 : f32
    %52 = vector.broadcast %cst_20 : f32 to vector<256x128xf32>
    %53 = arith.addf %51, %52 : vector<256x128xf32>
    %54 = arith.mulf %36, %36 : vector<256x128xf32>
    %55 = arith.mulf %53, %54 : vector<256x128xf32>
    %cst_21 = arith.constant 5.000000e-01 : f32
    %56 = vector.broadcast %cst_21 : f32 to vector<256x128xf32>
    %57 = arith.mulf %56, %36 : vector<256x128xf32>
    %58 = arith.subf %55, %57 : vector<256x128xf32>
    %cst_22 = arith.constant 1.000000e+00 : f32
    %59 = vector.broadcast %cst_22 : f32 to vector<256x128xf32>
    %60 = arith.addf %58, %59 : vector<256x128xf32>
    %c1_i32 = arith.constant 1 : i32
    %61 = vector.broadcast %c1_i32 : i32 to vector<256x128xi32>
    %62 = arith.cmpi eq, %26, %61 : vector<256x128xi32>
    %c3_i32_23 = arith.constant 3 : i32
    %63 = vector.broadcast %c3_i32_23 : i32 to vector<256x128xi32>
    %64 = arith.cmpi eq, %26, %63 : vector<256x128xi32>
    %65 = arith.ori %62, %64 : vector<256x128xi1>
    %66 = arith.select %65, %60, %46 : vector<256x128xi1>, vector<256x128xf32>
    %67 = arith.select %65, %46, %60 : vector<256x128xi1>, vector<256x128xf32>
    %c2_i32 = arith.constant 2 : i32
    %68 = vector.broadcast %c2_i32 : i32 to vector<256x128xi32>
    %69 = arith.cmpi eq, %26, %68 : vector<256x128xi32>
    %c3_i32_24 = arith.constant 3 : i32
    %70 = vector.broadcast %c3_i32_24 : i32 to vector<256x128xi32>
    %71 = arith.cmpi eq, %26, %70 : vector<256x128xi32>
    %72 = arith.ori %69, %71 : vector<256x128xi1>
    %cst_25 = arith.constant 0.000000e+00 : f32
    %73 = vector.broadcast %cst_25 : f32 to vector<256x128xf32>
    %74 = arith.subf %73, %66 : vector<256x128xf32>
    %75 = arith.select %72, %74, %66 : vector<256x128xi1>, vector<256x128xf32>
    %c1_i32_26 = arith.constant 1 : i32
    %76 = vector.broadcast %c1_i32_26 : i32 to vector<256x128xi32>
    %77 = arith.cmpi eq, %26, %76 : vector<256x128xi32>
    %c2_i32_27 = arith.constant 2 : i32
    %78 = vector.broadcast %c2_i32_27 : i32 to vector<256x128xi32>
    %79 = arith.cmpi eq, %26, %78 : vector<256x128xi32>
    %80 = arith.ori %77, %79 : vector<256x128xi1>
    %cst_28 = arith.constant 0.000000e+00 : f32
    %81 = vector.broadcast %cst_28 : f32 to vector<256x128xf32>
    %82 = arith.subf %81, %67 : vector<256x128xf32>
    %83 = arith.select %80, %82, %67 : vector<256x128xi1>, vector<256x128xf32>
    %c0_29 = arith.constant 0 : index
    %c0_30 = arith.constant 0 : index
    %c0_31 = arith.constant 0 : index
    %c0_32 = arith.constant 0 : index
    %84 = vector.load %arg2[%c0_29, %c0_30, %c0_31, %c0_32] : memref<1x1x4x256xf32, #tpu.memory_space<vmem>>, vector<1x1x4x256xf32>
    %85 = vector.shape_cast %84 : vector<1x1x4x256xf32> to vector<4x256xf32>
    %c0_33 = arith.constant 0 : index
    %c0_34 = arith.constant 0 : index
    %c0_35 = arith.constant 0 : index
    %c0_36 = arith.constant 0 : index
    %86 = vector.load %arg3[%c0_33, %c0_34, %c0_35, %c0_36] : memref<1x1x4x256xf32, #tpu.memory_space<vmem>>, vector<1x1x4x256xf32>
    %87 = vector.shape_cast %86 : vector<1x1x4x256xf32> to vector<4x256xf32>
    %cst_37 = arith.constant dense<0.000000e+00> : vector<4x128xf32>
    %88 = tpu.matmul %85, %83, %cst_37 {dimension_numbers = #tpu.dot_dimension_numbers<[1], [0], [0], [1], [0, 0, 1, 1], [], []>} : vector<4x256xf32>, vector<256x128xf32>, vector<4x128xf32> -> vector<4x128xf32>
    %cst_38 = arith.constant dense<0.000000e+00> : vector<4x128xf32>
    %89 = tpu.matmul %87, %75, %cst_38 {dimension_numbers = #tpu.dot_dimension_numbers<[1], [0], [0], [1], [0, 0, 1, 1], [], []>} : vector<4x256xf32>, vector<256x128xf32>, vector<4x128xf32> -> vector<4x128xf32>
    %90 = arith.subf %88, %89 : vector<4x128xf32>
    %91 = arith.addf %4, %90 : vector<4x128xf32>
    %cst_39 = arith.constant dense<0.000000e+00> : vector<4x128xf32>
    %92 = tpu.matmul %85, %75, %cst_39 {dimension_numbers = #tpu.dot_dimension_numbers<[1], [0], [0], [1], [0, 0, 1, 1], [], []>} : vector<4x256xf32>, vector<256x128xf32>, vector<4x128xf32> -> vector<4x128xf32>
    %cst_40 = arith.constant dense<0.000000e+00> : vector<4x128xf32>
    %93 = tpu.matmul %87, %83, %cst_40 {dimension_numbers = #tpu.dot_dimension_numbers<[1], [0], [0], [1], [0, 0, 1, 1], [], []>} : vector<4x256xf32>, vector<256x128xf32>, vector<4x128xf32> -> vector<4x128xf32>
    %94 = arith.addf %92, %93 : vector<4x128xf32>
    %95 = arith.addf %5, %94 : vector<4x128xf32>
    %c0_41 = arith.constant 0 : index
    %c0_42 = arith.constant 0 : index
    %c0_43 = arith.constant 0 : index
    %96 = vector.load %arg6[%c0_41, %c0_42, %c0_43] : memref<1x1x128xf32, #tpu.memory_space<vmem>>, vector<1x1x128xf32>
    %97 = vector.shape_cast %96 : vector<1x1x128xf32> to vector<1x128xf32>
    %98 = vector.broadcast %97 : vector<1x128xf32> to vector<4x128xf32>
    %99 = arith.mulf %91, %98 : vector<4x128xf32>
    %c0_44 = arith.constant 0 : index
    %c0_45 = arith.constant 0 : index
    %c0_46 = arith.constant 0 : index
    %100 = vector.load %arg7[%c0_44, %c0_45, %c0_46] : memref<1x4x128xf32, #tpu.memory_space<vmem>>, vector<1x4x128xf32>
    %101 = vector.shape_cast %100 : vector<1x4x128xf32> to vector<4x128xf32>
    %102 = vector.shape_cast %99 : vector<4x128xf32> to vector<1x4x128xf32>
    tpu.vector_store %arg7[%c0_44, %c0_45, %c0_46], %102 {strides = array<i32>} : memref<1x4x128xf32, #tpu.memory_space<vmem>>, vector<1x4x128xf32>,
    %103 = vector.broadcast %97 : vector<1x128xf32> to vector<4x128xf32>
    %104 = arith.mulf %95, %103 : vector<4x128xf32>
    %c0_47 = arith.constant 0 : index
    %c0_48 = arith.constant 0 : index
    %c0_49 = arith.constant 0 : index
    %105 = vector.load %arg8[%c0_47, %c0_48, %c0_49] : memref<1x4x128xf32, #tpu.memory_space<vmem>>, vector<1x4x128xf32>
    %106 = vector.shape_cast %105 : vector<1x4x128xf32> to vector<4x128xf32>
    %107 = vector.shape_cast %104 : vector<4x128xf32> to vector<1x4x128xf32>
    tpu.vector_store %arg8[%c0_47, %c0_48, %c0_49], %107 {strides = array<i32>} : memref<1x4x128xf32, #tpu.memory_space<vmem>>, vector<1x4x128xf32>,
    return
  }
  func.func @transform_0(%arg0: i32, %arg1: i32) -> (i32, i32, i32, i32) {
    %c0_i32 = arith.constant 0 : i32
    %c0_i32_0 = arith.constant 0 : i32
    %c0_i32_1 = arith.constant 0 : i32
    %c0_i32_2 = arith.constant 0 : i32
    return %arg0, %c0_i32, %c0_i32_0, %c0_i32_1 : i32, i32, i32, i32
  }
  func.func @transform_1(%arg0: i32, %arg1: i32) -> (i32, i32, i32, i32) {
    %c0_i32 = arith.constant 0 : i32
    %c0_i32_0 = arith.constant 0 : i32
    %c0_i32_1 = arith.constant 0 : i32
    %c0_i32_2 = arith.constant 0 : i32
    return %arg0, %c0_i32, %c0_i32_0, %c0_i32_1 : i32, i32, i32, i32
  }
  func.func @transform_2(%arg0: i32, %arg1: i32) -> (i32, i32, i32, i32) {
    %c0_i32 = arith.constant 0 : i32
    %c0_i32_0 = arith.constant 0 : i32
    %c0_i32_1 = arith.constant 0 : i32
    %c0_i32_2 = arith.constant 0 : i32
    %c0_i32_3 = arith.constant 0 : i32
    return %c0_i32, %c0_i32_0, %c0_i32_1, %c0_i32_2 : i32, i32, i32, i32
  }
  func.func @transform_3(%arg0: i32, %arg1: i32) -> (i32, i32, i32) {
    %c0_i32 = arith.constant 0 : i32
    %c0_i32_0 = arith.constant 0 : i32
    return %arg0, %c0_i32, %arg1 : i32, i32, i32
  }
  func.func @transform_4(%arg0: i32, %arg1: i32) -> (i32, i32, i32) {
    %c0_i32 = arith.constant 0 : i32
    %c0_i32_0 = arith.constant 0 : i32
    return %arg0, %c0_i32, %arg1 : i32, i32, i32
  }
  func.func @transform_5(%arg0: i32, %arg1: i32) -> (i32, i32, i32) {
    %c0_i32 = arith.constant 0 : i32
    %c0_i32_0 = arith.constant 0 : i32
    return %arg0, %c0_i32, %arg1 : i32, i32, i32
  }
  func.func @transform_6(%arg0: i32, %arg1: i32) -> (i32, i32, i32) {
    %c0_i32 = arith.constant 0 : i32
    %c0_i32_0 = arith.constant 0 : i32
    return %arg0, %c0_i32, %arg1 : i32, i32, i32
  }
}

</mosaic_0001>

<bundles_post_ra>
// kernel: custom-call.1
= control target key start
LH: loop header
LB: loop body
LE: loop exit
PB: predicated region body
PF: predicated region fallthrough
CT: control target
= control target key end

     0   :  { %s59_s0 = inlined_call_operand.hbm [shape: c64[2,4,16,16], index: 0, kind: input, shape index: {}]   ;;  %s60_s1 = inlined_call_operand.vmem [shape: f32[2,4,16,16], index: 1, kind: output, shape index: {}]  }
   0x1   :  { %s2_s8 = scalar_lea.hbm %s59_s0, 2048 }
   0x2   :  { %3 = vsyncpa [#allocation0], 0  ;;  %s4_s11 = sshll.u32 %s60_s1, 4  ;;  %s34_s14 = scalar_lea.hbm %s59_s0, 4096  ;;  %s5_s11 = int_to_ptr.vmem [resolvable:$true] %s4_s11 }
   0x3   :  { %p11_p0 = scmp.ne.s32.totalorder %s2_s8, %s34_s14  ;;  %p13_p1 = scmp.lt.u32.totalorder %s2_s8, %s59_s0 }
   0x4   :  { %p14_p2 = scmp.lt.u32.totalorder %s34_s14, %s34_s14  ;;  %p16_p4 = scmp.lt.u32.totalorder %s34_s14, %s2_s8 }
   0x6   :  { %p15_p3 = por %p14_p2, %p13_p1 }
   0x8   :  { %p17_p5 = por %p16_p4, %p15_p3 }
   0xa   :  { %p18_p6 = pnand %p17_p5, %p11_p0 }
   0xc   :  { %21 = shalt.err (!%p18_p6)  }
   0xd   :  { %s22_s17 = scalar_lea.vmem %s5_s11, 2048  ;;  %p27_p8 = scmp.lt.s32.totalorder %s5_s11, %s5_s11 }
   0xe   :  { %p23_p7 = scmp.ne.s32.totalorder %s5_s11, %s22_s17  ;;  %p28_p9 = scmp.lt.s32.totalorder %s22_s17, %s22_s17 }
  0x10   :  { %p29_p10 = por %p28_p9, %p27_p8 }
  0x12   :  { %p30_p11 = pnand %p29_p10, %p23_p7 }
  0x14   :  { %33 = shalt.err (!%p30_p11)  }
  0x15   :  { %7 = dma.hbm_to_vmem [thread:$0]  %s2_s8, 2048, %s5_s11, [#allocation0] }
  0x16   :  { %35 = dma.done.wait [#allocation0], 2048  }
  0x17   :  { %36 = vsyncadd [#allocation0], 4294965248 }
  0x18   :  { %9 = vsyncpa [#allocation0], 1 }

// kernel: custom-call
= control target key start
LH: loop header
LB: loop body
LE: loop exit
PB: predicated region body
PF: predicated region fallthrough
CT: control target
= control target key end

     0   :  { %2 = vsyncpa [#allocation0], 0  ;;  %s61_s0 = inlined_call_operand.hbm [shape: c64[2,4,16,16], index: 0, kind: input, shape index: {}]   ;;  %s62_s1 = inlined_call_operand.vmem [shape: f32[2,4,16,16], index: 1, kind: output, shape index: {}]  }
   0x1   :  { %s3_s8 = sshll.u32 %s62_s1, 4  ;;  %s9_s11 = scalar_lea.hbm %s61_s0, 2048  ;;  %s4_s8 = int_to_ptr.vmem [resolvable:$true] %s3_s8 }
   0x2   :  { %p10_p0 = scmp.ne.s32.totalorder %s61_s0, %s9_s11  ;;  %s11_s16 = scalar_lea.hbm %s61_s0, 4096 }
   0x3   :  { %p12_p1 = scmp.lt.u32.totalorder %s11_s16, %s9_s11  ;;  %p13_p2 = scmp.lt.u32.totalorder %s9_s11, %s61_s0 }
   0x5   :  { %p14_p3 = por %p13_p2, %p12_p1 }
   0x7   :  { %p15_p4 = pnand %p14_p3, %p10_p0 }
   0x9   :  { %18 = shalt.err (!%p15_p4)  }
   0xa   :  { %s19_s1 = scalar_lea.vmem %s4_s8, 2048  ;;  %p24_p6 = scmp.lt.s32.totalorder %s4_s8, %s4_s8 }
   0xb   :  { %p20_p5 = scmp.ne.s32.totalorder %s4_s8, %s19_s1  ;;  %p25_p7 = scmp.lt.s32.totalorder %s19_s1, %s19_s1 }
   0xd   :  { %p26_p8 = por %p25_p7, %p24_p6 }
   0xf   :  { %p27_p9 = pnand %p26_p8, %p20_p5 }
  0x11   :  { %30 = shalt.err (!%p27_p9)  }
  0x12   :  { %6 = dma.hbm_to_vmem [thread:$0]  %s61_s0, 2048, %s4_s8, [#allocation0] }
  0x13   :  { %31 = dma.done.wait [#allocation0], 2048  }
  0x14   :  { %32 = vsyncadd [#allocation0], 4294965248 }
  0x15   :  { %8 = vsyncpa [#allocation0], 1 }

// kernel: custom-call.3
= control target key start
LH: loop header
LB: loop body
LE: loop exit
PB: predicated region body
PF: predicated region fallthrough
CT: control target
= control target key end

     0   :  { %s59_s0 = inlined_call_operand.hbm [shape: c64[2,16,16], index: 0, kind: input, shape index: {}]   ;;  %s60_s1 = inlined_call_operand.vmem [shape: f32[2,16,16], index: 1, kind: output, shape index: {}]  }
   0x1   :  { %s2_s8 = scalar_lea.hbm %s59_s0, 512 }
   0x2   :  { %3 = vsyncpa [#allocation0], 0  ;;  %s4_s11 = sshll.u32 %s60_s1, 4  ;;  %s34_s14 = scalar_lea.hbm %s59_s0, 1024  ;;  %s5_s11 = int_to_ptr.vmem [resolvable:$true] %s4_s11 }
   0x3   :  { %p11_p0 = scmp.ne.s32.totalorder %s2_s8, %s34_s14  ;;  %p13_p1 = scmp.lt.u32.totalorder %s2_s8, %s59_s0 }
   0x4   :  { %p14_p2 = scmp.lt.u32.totalorder %s34_s14, %s34_s14  ;;  %p16_p4 = scmp.lt.u32.totalorder %s34_s14, %s2_s8 }
   0x6   :  { %p15_p3 = por %p14_p2, %p13_p1 }
   0x8   :  { %p17_p5 = por %p16_p4, %p15_p3 }
   0xa   :  { %p18_p6 = pnand %p17_p5, %p11_p0 }
   0xc   :  { %21 = shalt.err (!%p18_p6)  }
   0xd   :  { %s22_s17 = scalar_lea.vmem %s5_s11, 512  ;;  %p27_p8 = scmp.lt.s32.totalorder %s5_s11, %s5_s11 }
   0xe   :  { %p23_p7 = scmp.ne.s32.totalorder %s5_s11, %s22_s17  ;;  %p28_p9 = scmp.lt.s32.totalorder %s22_s17, %s22_s17 }
  0x10   :  { %p29_p10 = por %p28_p9, %p27_p8 }
  0x12   :  { %p30_p11 = pnand %p29_p10, %p23_p7 }
  0x14   :  { %33 = shalt.err (!%p30_p11)  }
  0x15   :  { %7 = dma.hbm_to_vmem [thread:$0]  %s2_s8, 512, %s5_s11, [#allocation0] }
  0x16   :  { %35 = dma.done.wait [#allocation0], 512  }
  0x17   :  { %36 = vsyncadd [#allocation0], 4294966784 }
  0x18   :  { %9 = vsyncpa [#allocation0], 1 }

// kernel: custom-call.2
= control target key start
LH: loop header
LB: loop body
LE: loop exit
PB: predicated region body
PF: predicated region fallthrough
CT: control target
= control target key end

     0   :  { %2 = vsyncpa [#allocation0], 0  ;;  %s61_s0 = inlined_call_operand.hbm [shape: c64[2,16,16], index: 0, kind: input, shape index: {}]   ;;  %s62_s1 = inlined_call_operand.vmem [shape: f32[2,16,16], index: 1, kind: output, shape index: {}]  }
   0x1   :  { %s3_s8 = sshll.u32 %s62_s1, 4  ;;  %s9_s11 = scalar_lea.hbm %s61_s0, 512  ;;  %s4_s8 = int_to_ptr.vmem [resolvable:$true] %s3_s8 }
   0x2   :  { %p10_p0 = scmp.ne.s32.totalorder %s61_s0, %s9_s11  ;;  %s11_s16 = scalar_lea.hbm %s61_s0, 1024 }
   0x3   :  { %p12_p1 = scmp.lt.u32.totalorder %s11_s16, %s9_s11  ;;  %p13_p2 = scmp.lt.u32.totalorder %s9_s11, %s61_s0 }
   0x5   :  { %p14_p3 = por %p13_p2, %p12_p1 }
   0x7   :  { %p15_p4 = pnand %p14_p3, %p10_p0 }
   0x9   :  { %18 = shalt.err (!%p15_p4)  }
   0xa   :  { %s19_s1 = scalar_lea.vmem %s4_s8, 512  ;;  %p24_p6 = scmp.lt.s32.totalorder %s4_s8, %s4_s8 }
   0xb   :  { %p20_p5 = scmp.ne.s32.totalorder %s4_s8, %s19_s1  ;;  %p25_p7 = scmp.lt.s32.totalorder %s19_s1, %s19_s1 }
   0xd   :  { %p26_p8 = por %p25_p7, %p24_p6 }
   0xf   :  { %p27_p9 = pnand %p26_p8, %p20_p5 }
  0x11   :  { %30 = shalt.err (!%p27_p9)  }
  0x12   :  { %6 = dma.hbm_to_vmem [thread:$0]  %s61_s0, 512, %s4_s8, [#allocation0] }
  0x13   :  { %31 = dma.done.wait [#allocation0], 512  }
  0x14   :  { %32 = vsyncadd [#allocation0], 4294966784 }
  0x15   :  { %8 = vsyncpa [#allocation0], 1 }

// kernel: custom-call.4
= control target key start
LH: loop header
LB: loop body
LE: loop exit
PB: predicated region body
PF: predicated region fallthrough
CT: control target
= control target key end

     0   :  { %s126_s0 = inlined_call_operand.vmem [shape: f32[2,4,128], index: 0, kind: input, shape index: {}]   ;;  %s127_s1 = inlined_call_operand.vmem [shape: f32[2,4,128], index: 1, kind: input, shape index: {}]   ;;  %s128_s2 = inlined_call_operand.hbm [shape: c64[2,4,128], index: 2, kind: output, shape index: {}]  }
   0x1   :  { %s87_s11 = scalar_lea.hbm %s128_s2, 128 }
   0x2   :  { %4 = vsyncpa [#allocation0], 0  ;;  %s5_s14 = sshll.u32 %s126_s0, 4  ;;  %s6_s14 = int_to_ptr.vmem [resolvable:$true] %s5_s14 }
   0x3   :  { %s18_s15 = scalar_lea.vmem %s6_s14, 128  ;;  %p23_p1 = scmp.lt.s32.totalorder %s6_s14, %s6_s14 }
   0x4   :  { %p19_p0 = scmp.ne.s32.totalorder %s6_s14, %s18_s15  ;;  %p24_p2 = scmp.lt.s32.totalorder %s18_s15, %s18_s15 }
   0x6   :  { %p25_p3 = por %p24_p2, %p23_p1 }
   0x8   :  { %p26_p4 = pnand %p25_p3, %p19_p0 }
   0xa   :  { %29 = shalt.err (!%p26_p4)  }
   0xb   :  { %p31_p5 = scmp.ne.s32.totalorder %s128_s2, %s87_s11  ;;  %s32_s0 = scalar_lea.hbm %s128_s2, 256 }
   0xc   :  { %p33_p6 = scmp.lt.u32.totalorder %s32_s0, %s87_s11  ;;  %p34_p7 = scmp.lt.u32.totalorder %s87_s11, %s128_s2 }
   0xe   :  { %p35_p8 = por %p34_p7, %p33_p6 }
  0x10   :  { %p36_p9 = pnand %p35_p8, %p31_p5 }
  0x12   :  { %39 = shalt.err (!%p36_p9)  }
  0x13   :  { %8 = dma.vmem_to_hbm [thread:$0]  %s6_s14, 128, %s128_s2, [#allocation0] }
  0x14   :  { %65 = dma.done.wait [#allocation0], 128  }
  0x15   :  { %66 = vsyncadd [#allocation0], 4294967168 }
  0x16   :  { %10 = vsyncpa [#allocation0], 1 }
  0x17   :  { %11 = vsyncpa [#allocation1], 0  ;;  %s12_s28 = sshll.u32 %s127_s1, 4  ;;  %s13_s28 = int_to_ptr.vmem [resolvable:$true] %s12_s28 }
  0x18   :  { %s40_s29 = scalar_lea.vmem %s13_s28, 128  ;;  %p45_p11 = scmp.lt.s32.totalorder %s13_s28, %s13_s28 }
  0x19   :  { %p41_p10 = scmp.ne.s32.totalorder %s13_s28, %s40_s29  ;;  %p46_p12 = scmp.lt.s32.totalorder %s40_s29, %s40_s29 }
  0x1b   :  { %p47_p13 = por %p46_p12, %p45_p11 }
  0x1d   :  { %p48_p0 = pnand %p47_p13, %p41_p10 }
  0x1f   :  { %51 = shalt.err (!%p48_p0)  }
  0x20   :  { %p53_p1 = scmp.ne.s32.totalorder %s87_s11, %s32_s0  ;;  %p56_p2 = scmp.lt.u32.totalorder %s32_s0, %s32_s0 }
  0x22   :  { %p57_p3 = por %p56_p2, %p34_p7 }
  0x24   :  { %p59_p4 = por %p57_p3, %p33_p6 }
  0x26   :  { %p60_p5 = pnand %p59_p4, %p53_p1 }
  0x28   :  { %63 = shalt.err (!%p60_p5)  }
  0x29   :  { %15 = dma.vmem_to_hbm [thread:$0]  %s13_s28, 128, %s87_s11, [#allocation1] }
  0x2a   :  { %67 = dma.done.wait [#allocation1], 128  }
  0x2b   :  { %68 = vsyncadd [#allocation1], 4294967168 }
  0x2c   :  { %17 = vsyncpa [#allocation1], 1 }

// kernel: nufft_forward.1
= control target key start
LH: loop header
LB: loop body
LE: loop exit
PB: predicated region body
PF: predicated region fallthrough
CT: control target
= control target key end

     0   :  { %s3062_s21 = smov 0   ;;  %s3064_s22 = smov 0   ;;  %s4871_s0 = inlined_call_operand.vmem [shape: f32[2,1,4,256], index: 0, kind: input, shape index: {}]   ;;  %s4872_s1 = inlined_call_operand.vmem [shape: f32[2,1,4,256], index: 1, kind: input, shape index: {}]   ;;  %s4873_s2 = inlined_call_operand.vmem [shape: f32[1,1,256,2], index: 2, kind: input, shape index: {}]   ;;  %s4874_s3 = inlined_call_operand.vmem [shape: f32[2,2,128], index: 3, kind: input, shape index: {}]   ;;  %s4875_s4 = inlined_call_operand.vmem [shape: f32[2,1,128], index: 4, kind: input, shape index: {}]   ;;  %s4876_s5 = inlined_call_operand.vmem [shape: f32[2,4,128], index: 5, kind: output, shape index: {0}]   ;;  %s4877_s6 = inlined_call_operand.vmem [shape: f32[2,4,128], index: 6, kind: output, shape index: {1}]  }
   0x1   :  { %s3066_s23 = smov 0  }
   0x2 LB: > { %s29_s24 = sadd.s32 1, %s3019_s22  ;;  %p2557_p0 = scmp.ge.s32.totalorder %s3023_s23, 1  ;;  %s3023_s23 = sphi %s3066_s23, %s17_s23   ;;  %s3019_s22 = sphi %s3064_s22, %s5040_s22   ;;  %s3015_s21 = sphi %s3062_s21, %s5039_s21  }
   0x3   : > { %p31_p1 = scmp.ge.s32.totalorder %s29_s24, 2  ;;  %p268_p2 = scmp.lt.s32.totalorder %s3023_s23, 3 }
   0x5   : > { %s5042_s24 = smov (%p31_p1, %s29_s24), 0  ;;  %p269_p3 = pnand %p2557_p0, %p268_p2 }
   0x7   : > { %272 = sbr.rel (%p269_p3) target bundleno = 762 (0x2fa), region = 40 }
   0xe   : > { %v380_v0 = vld [vmem:[%s4873_s2 + $0x80] sm:$0xff]  ;;  %v3025_v1 = vmov 1   ;;  %v3026_v2 = vmov 0   ;;  %v381_v3 = vld [vmem:[%s4873_s2 + $0x88] sm:$0xff]  ;;  %v383_v6 = vld [vmem:[%s4873_s2 + $0x98] sm:$0xff]  ;;  %p325_p4 = scmp.lt.s32.totalorder %s3015_s21, 1 }
   0xf   : > { %2963 = vset.pattern.permute.xlu1 %v3025_v1  ;;  %2962 = vset.pattern.permute.xlu0 %v3026_v2  ;;  %v364_v4 = vld [vmem:[%s4873_s2] sm:$0xff]  ;;  %v365_v5 = vld [vmem:[%s4873_s2 + $0x8] sm:$0xff]  ;;  %v366_v7 = vld [vmem:[%s4873_s2 + $0x10] sm:$0xff] }
  0x10   : > { %657 = vperm.xlu1 %2963, %v380_v0   ;;  %478 = vperm.xlu0 %2962, %v380_v0   ;;  %v382_v8 = vld [vmem:[%s4873_s2 + $0x90] sm:$0xff]  ;;  %v385_v9 = vld [vmem:[%s4873_s2 + $0xa8] sm:$0xff]  ;;  %v368_v10 = vld [vmem:[%s4873_s2 + $0x20] sm:$0xff]  ;;  %s5044_s21 = smov (!%p325_p4, %s3015_s21), 1 }
  0x11   : > { %v387_v11 = vld [vmem:[%s4873_s2 + $0xb8] sm:$0xff]  ;;  %v370_v12 = vld [vmem:[%s4873_s2 + $0x30] sm:$0xff]  ;;  %v389_v14 = vld [vmem:[%s4873_s2 + $0xc8] sm:$0xff]  ;;  %s2562_s15 = sshll.u32 %s5044_s21, 1  ;;  %s2602_s9 = sshll.u32 %s5044_s21, 3 }
  0x12   : > { %v367_v13 = vld [vmem:[%s4873_s2 + $0x18] sm:$0xff]  ;;  %v372_v15 = vld [vmem:[%s4873_s2 + $0x40] sm:$0xff]  ;;  %v374_v18 = vld [vmem:[%s4873_s2 + $0x50] sm:$0xff]  ;;  %s3200_s18 = scalar_lea.vmem %s4874_s3, %s2562_s15  ;;  %s329_s12 = scalar_lea.vmem %s4871_s0, %s2602_s9 }
  0x13   : > { %v384_v16 = vld [vmem:[%s4873_s2 + $0xa0] sm:$0xff]  ;;  %v391_v17 = vld [vmem:[%s4873_s2 + $0xd8] sm:$0xff]  ;;  %v3146_v19 = vld [vmem:[%s4873_s2 + $0xe8] sm:$0xff]  ;;  %s334_s15 = scalar_lea.vmem %s4872_s1, %s2602_s9  ;;  %s2563_s19 = sshll.u32 %s5044_s21, 2 }
  0x14   : > { %661 = vperm.xlu1 %2963, %v381_v3   ;;  %483 = vperm.xlu0 %2962, %v381_v3   ;;  %v376_v20 = vld [vmem:[%s4873_s2 + $0x60] sm:$0xff]  ;;  %v369_v21 = vld [vmem:[%s4873_s2 + $0x28] sm:$0xff]  ;;  %v3159_v22 = vld [vmem:[%s4873_s2 + $0xf8] sm:$0xff]  ;;  %s354_s26 = scalar_lea.vmem %s4876_s5, %s2563_s19 }
  0x15   : > { %v378_v23 = vld [vmem:[%s4873_s2 + $0x70] sm:$0xff]  ;;  %v371_v25 = vld [vmem:[%s4873_s2 + $0x38] sm:$0xff]  ;;  %v388_v26 = vld [vmem:[%s4873_s2 + $0xc0] sm:$0xff] }
  0x16   : > { %v386_v24 = vld [vmem:[%s4873_s2 + $0xb0] sm:$0xff]  ;;  %v373_v27 = vld [vmem:[%s4873_s2 + $0x48] sm:$0xff]  ;;  %v3203_v29 = vld [vmem:[%s3200_s18 + $0x1] ss:$0 sm:$0xff] }
  0x17   : > { %v390_v28 = vld [vmem:[%s4873_s2 + $0xd0] sm:$0xff]  ;;  %v3206_v30 = vld [vmem:[%s3200_s18] ss:$0 sm:$0xff]  ;;  %v375_v31 = vld [vmem:[%s4873_s2 + $0x58] sm:$0xff] }
  0x18   : > { %2964 = vset.pattern.permute.xlu1 %v3026_v2  ;;  %398 = vperm.xlu0 %2962, %v364_v4   ;;  %v392_v48 = vld [vmem:[%s4873_s2 + $0xe0] sm:$0xff] }
  0x19   : > { %403 = vperm.xlu1 %2964, %v365_v5  }
  0x1c   : > { %493 = vperm.xlu0 %2962, %v383_v6  }
  0x1d   : > { %2965 = vset.pattern.permute.xlu1 %v3025_v1 }
  0x1e   : > { %597 = vperm.xlu1 %2965, %v365_v5  }
  0x20   : > { %408 = vperm.xlu0 %2962, %v366_v7  }
  0x22   : > { %2966 = vset.pattern.permute.xlu1 %v3026_v2 }
  0x23   : > { %488 = vperm.xlu1 %2966, %v382_v8  }
  0x24   : > { %503 = vperm.xlu0 %2962, %v385_v9  }
  0x27   : > { %2967 = vset.pattern.permute.xlu1 %v3025_v1 }
  0x28   : > { %665 = vperm.xlu1 %2967, %v382_v8   ;;  %418 = vperm.xlu0 %2962, %v368_v10  }
  0x2c   : > { %669 = vperm.xlu1 %2967, %v383_v6   ;;  %513 = vperm.xlu0 %2962, %v387_v11  }
  0x30   : > { %2968 = vset.pattern.permute.xlu1 %v3026_v2  ;;  %428 = vperm.xlu0 %2962, %v370_v12  }
  0x31   : > { %413 = vperm.xlu1 %2968, %v367_v13  }
  0x34   : > { %523 = vperm.xlu0 %2962, %v389_v14  }
  0x35   : > { %2969 = vset.pattern.permute.xlu1 %v3025_v1 }
  0x36   : > { %605 = vperm.xlu1 %2969, %v367_v13  }
  0x38   : > { %438 = vperm.xlu0 %2962, %v372_v15  }
  0x3a   : > { %2970 = vset.pattern.permute.xlu1 %v3026_v2 }
  0x3b   : > { %498 = vperm.xlu1 %2970, %v384_v16  }
  0x3c   : > { %533 = vperm.xlu0 %2962, %v391_v17  }
  0x3f   : > { %2971 = vset.pattern.permute.xlu1 %v3025_v1 }
  0x40   : > { %673 = vperm.xlu1 %2971, %v384_v16   ;;  %448 = vperm.xlu0 %2962, %v374_v18  }
  0x44   : > { %677 = vperm.xlu1 %2971, %v385_v9   ;;  %543 = vperm.xlu0 %2962, %v3146_v19  }
  0x48   : > { %2972 = vset.pattern.permute.xlu1 %v3026_v2  ;;  %458 = vperm.xlu0 %2962, %v376_v20  }
  0x49   : > { %423 = vperm.xlu1 %2972, %v369_v21  }
  0x4c   : > { %553 = vperm.xlu0 %2962, %v3159_v22  }
  0x4d   : > { %2973 = vset.pattern.permute.xlu1 %v3025_v1 }
  0x4e   : > { %613 = vperm.xlu1 %2973, %v369_v21  }
  0x50   : > { %468 = vperm.xlu0 %2962, %v378_v23  }
  0x52   : > { %2974 = vset.pattern.permute.xlu1 %v3026_v2 }
  0x53   : > { %508 = vperm.xlu1 %2974, %v386_v24  }
  0x54   : > { %2992 = vset.pattern.permute.xlu0 %v3025_v1 }
  0x55   : > { %593 = vperm.xlu0 %2992, %v364_v4  }
  0x57   : > { %2975 = vset.pattern.permute.xlu1 %v3025_v1 }
  0x58   : > { %681 = vperm.xlu1 %2975, %v386_v24  }
  0x59   : > { %601 = vperm.xlu0 %2992, %v366_v7  }
  0x5c   : > { %685 = vperm.xlu1 %2975, %v387_v11  }
  0x5d   : > { %609 = vperm.xlu0 %2992, %v368_v10  }
  0x60   : > { %2976 = vset.pattern.permute.xlu1 %v3026_v2 }
  0x61   : > { %433 = vperm.xlu1 %2976, %v371_v25   ;;  %617 = vperm.xlu0 %2992, %v370_v12  }
  0x65   : > { %2977 = vset.pattern.permute.xlu1 %v3025_v1  ;;  %625 = vperm.xlu0 %2992, %v372_v15  }
  0x66   : > { %621 = vperm.xlu1 %2977, %v371_v25  }
  0x69   : > { %633 = vperm.xlu0 %2992, %v374_v18  }
  0x6a   : > { %2978 = vset.pattern.permute.xlu1 %v3026_v2 }
  0x6b   : > { %518 = vperm.xlu1 %2978, %v388_v26  }
  0x6d   : > { %641 = vperm.xlu0 %2992, %v376_v20  }
  0x6f   : > { %2979 = vset.pattern.permute.xlu1 %v3025_v1 }
  0x70   : > { %689 = vperm.xlu1 %2979, %v388_v26  }
  0x71   : > { %649 = vperm.xlu0 %2992, %v378_v23  }
  0x74   : > { %693 = vperm.xlu1 %2979, %v389_v14   ;;  %v377_v14 = vld [vmem:[%s4873_s2 + $0x68] sm:$0xff] }
  0x78   : > { %2980 = vset.pattern.permute.xlu1 %v3026_v2 }
  0x79   : > { %443 = vperm.xlu1 %2980, %v373_v27  }
  0x7d   : > { %2981 = vset.pattern.permute.xlu1 %v3025_v1 }
  0x7e   : > { %629 = vperm.xlu1 %2981, %v373_v27  }
  0x82   : > { %2982 = vset.pattern.permute.xlu1 %v3026_v2 }
  0x83   : > { %528 = vperm.xlu1 %2982, %v390_v28  }
  0x87   : > { %2983 = vset.pattern.permute.xlu1 %v3025_v1 }
  0x88   : > { %697 = vperm.xlu1 %2983, %v390_v28  }
  0x8c   : > { %701 = vperm.xlu1 %2983, %v391_v17  }
  0x8f   : > { %v658_v32 = vpop.permute.xlu1 %657  ;;  %v479_v33 = vpop.permute.xlu0 %478 }
  0x90   : > { %v740_v34 = vmul.f32 %v3203_v29, %v658_v32  ;;  %v576_v35 = vmul.f32 %v3206_v30, %v479_v33  ;;  %2984 = vset.pattern.permute.xlu1 %v3026_v2 }
  0x91   : > { %453 = vperm.xlu1 %2984, %v375_v31  }
  0x92   : > { %v772_v36 = vadd.f32 %v740_v34, %v576_v35 }
  0x93   : > { %v662_v37 = vpop.permute.xlu1 %661  ;;  %v484_v38 = vpop.permute.xlu0 %483 }
  0x94   : > { %v804_v39 = vmul.f32 0.63661975, %v772_v36  ;;  %v741_v40 = vmul.f32 %v3203_v29, %v662_v37  ;;  %v577_v41 = vmul.f32 %v3206_v30, %v484_v38 }
  0x95   : > { %2985 = vset.pattern.permute.xlu1 %v3025_v1 }
  0x96   : > { %v836_v42 = vadd.f32 65536.5, %v804_v39  ;;  %v773_v43 = vadd.f32 %v741_v40, %v577_v41  ;;  %637 = vperm.xlu1 %2985, %v375_v31  }
  0x97   : > { %v399_v44 = vpop.permute.xlu0 %398 }
  0x98   : > { %v2904_v45 = vtrunc.f32 %v836_v42  ;;  %v805_v46 = vmul.f32 0.63661975, %v773_v43  ;;  %v404_v47 = vpop.permute.xlu1 %403  ;;  %v3246_v33 = vmul.f32 %v3206_v30, %v399_v44 }
  0x99   : > { %v561_v58 = vmul.f32 %v3206_v30, %v404_v47 }
  0x9a   : > { %v2905_v49 = vcvt.f32.s32 %v2904_v45  ;;  %v837_v50 = vadd.f32 65536.5, %v805_v46  ;;  %2986 = vset.pattern.permute.xlu1 %v3026_v2 }
  0x9b   : > { %538 = vperm.xlu1 %2986, %v392_v48   ;;  %v494_v51 = vpop.permute.xlu0 %493 }
  0x9c   : > { %v900_v52 = vcvt.s32.f32 %v2905_v49  ;;  %v2906_v53 = vtrunc.f32 %v837_v50  ;;  %v579_v24 = vmul.f32 %v3206_v30, %v494_v51  ;;  %v3243_v32 = vand.u32 3, %v2905_v49 }
  0x9d   : > { %v598_v54 = vpop.permute.xlu1 %597 }
  0x9e   : > { %v2583_v55 = vadd.f32 -65536.0, %v900_v52  ;;  %v2907_v56 = vcvt.f32.s32 %v2906_v53  ;;  %v725_v57 = vmul.f32 %v3203_v29, %v598_v54  ;;  %vm1732_vm0 = vcmp.eq.s32.totalorder %v3243_v32, 1 }
  0x9f   : > { %2987 = vset.pattern.permute.xlu1 %v3025_v1  ;;  %v409_v59 = vpop.permute.xlu0 %408  ;;  %vm1764_vm1 = vcmp.eq.s32.totalorder %v3243_v32, 3  ;;  %vm1892_vm4 = vcmp.eq.s32.totalorder %v3243_v32, 2 }
  0xa0   : > { %v996_v60 = vmul.f32 1.5703125, %v2583_v55  ;;  %v901_v61 = vcvt.s32.f32 %v2907_v56  ;;  %705 = vperm.xlu1 %2987, %v392_v48   ;;  %v3224_v62 = vadd.f32 %v725_v57, %v561_v58  ;;  %v1060_v0 = vmul.f32 0.0004837513, %v2583_v55  ;;  %v394_v58 = vld [vmem:[%s4873_s2 + $0xf0] sm:$0xff]  ;;  %vm1796_vm6 = vmor %vm1732_vm0, %vm1764_vm1 }
  0xa1   : > { %v1124_v8 = vmul.f32 7.54979e-08, %v2583_v55  ;;  %v3248_v37 = vand.u32 3, %v2907_v56  ;;  %v3257_v42 = vmul.f32 %v3206_v30, %v409_v59  ;;  %vm2020_vm8 = vmor %vm1732_vm0, %vm1892_vm4 }
  0xa2   : > { %v1028_v63 = vsub.f32 %v772_v36, %v996_v60  ;;  %v2584_v3 = vadd.f32 -65536.0, %v901_v61  ;;  %v489_v4 = vpop.permute.xlu1 %488  ;;  %v789_v5 = vmul.f32 0.63661975, %v3224_v62  ;;  %vm1924_vm10 = vmor %vm1892_vm4, %vm1764_vm1 }
  0xa3   : > { %v504_v6 = vpop.permute.xlu0 %503  ;;  %v578_v16 = vmul.f32 %v3206_v30, %v489_v4  ;;  %vm1733_vm2 = vcmp.eq.s32.totalorder %v3248_v37, 1  ;;  %vm1765_vm3 = vcmp.eq.s32.totalorder %v3248_v37, 3  ;;  %vm1893_vm5 = vcmp.eq.s32.totalorder %v3248_v37, 2 }
  0xa4   : > { %v1092_v7 = vsub.f32 %v1028_v63, %v1060_v0  ;;  %v997_v9 = vmul.f32 1.5703125, %v2584_v3  ;;  %709 = vperm.xlu1 %2987, %v3146_v19   ;;  %v821_v10 = vadd.f32 65536.5, %v789_v5  ;;  %v1061_v13 = vmul.f32 0.0004837513, %v2584_v3  ;;  %vm1797_vm7 = vmor %vm1733_vm2, %vm1765_vm3 }
  0xa5   : > { %v1125_v23 = vmul.f32 7.54979e-08, %v2584_v3  ;;  %v3265_v50 = vmul.f32 %v3206_v30, %v504_v6  ;;  %vm2021_vm9 = vmor %vm1733_vm2, %vm1893_vm5 }
  0xa6   : > { %v3228_v11 = vsub.f32 %v1092_v7, %v1124_v8  ;;  %v1029_v12 = vsub.f32 %v773_v43, %v997_v9  ;;  %v2874_v15 = vtrunc.f32 %v821_v10  ;;  %vm1925_vm11 = vmor %vm1893_vm5, %vm1765_vm3 }
  0xa7   : > { %v666_v17 = vpop.permute.xlu1 %665  ;;  %v419_v18 = vpop.permute.xlu0 %418 }
  0xa8   : > { %v1188_v20 = vmul.f32 %v3228_v11, %v3228_v11  ;;  %v1093_v21 = vsub.f32 %v1029_v12, %v1061_v13  ;;  %v742_v19 = vmul.f32 %v3203_v29, %v666_v17  ;;  %2988 = vset.pattern.permute.xlu1 %v3026_v2  ;;  %v2875_v25 = vcvt.f32.s32 %v2874_v15 }
  0xa9   : > { %463 = vperm.xlu1 %2988, %v377_v14   ;;  %v3268_v51 = vmul.f32 %v3206_v30, %v419_v18 }
  0xaa   : > { %v3239_v26 = vsub.f32 %v1093_v21, %v1125_v23  ;;  %v3241_v27 = vadd.f32 %v742_v19, %v578_v16  ;;  %v1220_v28 = vmul.f32 -0.00019515296, %v1188_v20  ;;  %v1444_v31 = vmul.f32 2.4433157e-05, %v1188_v20 }
  0xab   : > { %v885_v34 = vcvt.s32.f32 %v2875_v25  ;;  %v670_v35 = vpop.permute.xlu1 %669  ;;  %v514_v36 = vpop.permute.xlu0 %513  ;;  %v3270_v54 = vand.u32 3, %v2875_v25  ;;  %v1572_v10 = vmul.f32 %v1188_v20, %v1188_v20  ;;  %v1636_v12 = vmul.f32 0.5, %v1188_v20 }
  0xac   : > { %v3252_v38 = vmul.f32 %v3239_v26, %v3239_v26  ;;  %v806_v39 = vmul.f32 0.63661975, %v3241_v27  ;;  %v743_v40 = vmul.f32 %v3203_v29, %v670_v35  ;;  %v1252_v43 = vadd.f32 0.008332161, %v1220_v28 }
  0xad   : > { %v2568_v41 = vadd.f32 -65536.0, %v885_v34  ;;  %2989 = vset.pattern.permute.xlu1 %v3025_v1  ;;  %v1476_v44 = vadd.f32 -0.0013887316, %v1444_v31  ;;  %v3283_v15 = vmul.f32 %v3206_v30, %v514_v36  ;;  %vm1717_vm12 = vcmp.eq.s32.totalorder %v3270_v54, 1 }
  0xae   : > { %v838_v45 = vadd.f32 65536.5, %v806_v39  ;;  %v3260_v46 = vadd.f32 %v743_v40, %v579_v24  ;;  %645 = vperm.xlu1 %2989, %v377_v14   ;;  %v1221_v47 = vmul.f32 -0.00019515296, %v3252_v38  ;;  %v1445_v48 = vmul.f32 2.4433157e-05, %v3252_v38 }
  0xaf   : > { %v981_v49 = vmul.f32 1.5703125, %v2568_v41  ;;  %v429_v52 = vpop.permute.xlu0 %428  ;;  %v1284_v53 = vmul.f32 %v1252_v43, %v1188_v20  ;;  %v1045_v61 = vmul.f32 0.0004837513, %v2568_v41  ;;  %v1508_v6 = vmul.f32 %v1476_v44, %v1188_v20 }
  0xb0   : > { %v2908_v55 = vtrunc.f32 %v838_v45  ;;  %v807_v56 = vmul.f32 0.63661975, %v3260_v46  ;;  %v414_v57 = vpop.permute.xlu1 %413  ;;  %v1253_v59 = vadd.f32 0.008332161, %v1221_v47  ;;  %v1477_v0 = vadd.f32 -0.0013887316, %v1445_v48 }
  0xb1   : > { %v1013_v60 = vsub.f32 %v3224_v62, %v981_v49  ;;  %v1316_v63 = vadd.f32 -0.16666655, %v1284_v53  ;;  %v1109_v16 = vmul.f32 7.54979e-08, %v2568_v41  ;;  %v3286_v17 = vmul.f32 %v3206_v30, %v429_v52 }
  0xb2   : > { %v2909_v3 = vcvt.f32.s32 %v2908_v55  ;;  %v839_v4 = vadd.f32 65536.5, %v807_v56  ;;  %2990 = vset.pattern.permute.xlu1 %v3026_v2  ;;  %v1285_v5 = vmul.f32 %v1253_v59, %v3252_v38  ;;  %v1509_v9 = vmul.f32 %v1477_v0, %v3252_v38 }
  0xb3   : > { %548 = vperm.xlu1 %2990, %v394_v58   ;;  %v524_v7 = vpop.permute.xlu0 %523  ;;  %v1348_v8 = vmul.f32 %v1316_v63, %v1188_v20  ;;  %v1077_v62 = vsub.f32 %v1013_v60, %v1045_v61  ;;  %v1540_v23 = vadd.f32 0.041666646, %v1508_v6  ;;  %v563_v28 = vmul.f32 %v3206_v30, %v414_v57 }
  0xb4   : > { %v902_v13 = vcvt.s32.f32 %v2909_v3  ;;  %v2910_v14 = vtrunc.f32 %v839_v4  ;;  %v1317_v21 = vadd.f32 -0.16666655, %v1285_v5  ;;  %v1541_v25 = vadd.f32 0.041666646, %v1509_v9 }
  0xb5   : > { %v606_v18 = vpop.permute.xlu1 %605  ;;  %v1380_v35 = vmul.f32 %v1348_v8, %v3228_v11  ;;  %v1604_v36 = vmul.f32 %v1572_v10, %v1540_v23  ;;  %v3300_v39 = vsub.f32 %v1077_v62, %v1109_v16  ;;  %v1573_v43 = vmul.f32 %v3252_v38, %v3252_v38  ;;  %v379_v10 = vld [vmem:[%s4873_s2 + $0x78] sm:$0xff] }
  0xb6   : > { %v2585_v20 = vadd.f32 -65536.0, %v902_v13  ;;  %v3290_v19 = vcvt.f32.s32 %v2910_v14  ;;  %v727_v24 = vmul.f32 %v3203_v29, %v606_v18  ;;  %v1349_v34 = vmul.f32 %v1317_v21, %v3252_v38 }
  0xb7   : > { %2991 = vset.pattern.permute.xlu1 %v3025_v1  ;;  %v3295_v31 = vpop.permute.xlu0 %438  ;;  %v3306_v44 = vand.u32 3, %v2909_v3  ;;  %v3309_v45 = vmul.f32 %v3206_v30, %v524_v7  ;;  %v1605_v56 = vmul.f32 %v1573_v43, %v1541_v25  ;;  %v1412_v59 = vadd.f32 %v1380_v35, %v3228_v11 }
  0xb8   : > { %v998_v40 = vmul.f32 1.5703125, %v2585_v20  ;;  %v903_v41 = vcvt.s32.f32 %v3290_v19  ;;  %713 = vperm.xlu1 %2991, %v394_v58   ;;  %v3311_v47 = vadd.f32 %v727_v24, %v563_v28  ;;  %v1381_v48 = vmul.f32 %v1349_v34, %v3239_v26 }
  0xb9   : > { %v1062_v52 = vmul.f32 0.0004837513, %v2585_v20  ;;  %v1637_v60 = vmul.f32 0.5, %v3252_v38  ;;  %v1668_v61 = vsub.f32 %v1604_v36, %v1636_v12  ;;  %v3322_v63 = vmul.f32 %v3300_v39, %v3300_v39 }
  0xba   : > { %v1030_v49 = vsub.f32 %v3241_v27, %v998_v40  ;;  %v2586_v53 = vadd.f32 -65536.0, %v903_v41  ;;  %v499_v55 = vpop.permute.xlu1 %498  ;;  %v791_v57 = vmul.f32 0.63661975, %v3311_v47  ;;  %v1126_v3 = vmul.f32 7.54979e-08, %v2585_v20 }
  0xbb   : > { %v3316_v58 = vpop.permute.xlu0 %533  ;;  %v1413_v5 = vadd.f32 %v1381_v48, %v3239_v26  ;;  %v1669_v6 = vsub.f32 %v1605_v56, %v1637_v60  ;;  %v1700_v7 = vadd.f32 1.0, %v1668_v61  ;;  %v580_v9 = vmul.f32 %v3206_v30, %v499_v55 }
  0xbc   : > { %v1094_v0 = vsub.f32 %v1030_v49, %v1062_v52  ;;  %v999_v27 = vmul.f32 1.5703125, %v2586_v53  ;;  %717 = vperm.xlu1 %2991, %v3159_v22   ;;  %v823_v4 = vadd.f32 65536.5, %v791_v57  ;;  %v1063_v38 = vmul.f32 0.0004837513, %v2586_v53 }
  0xbd   : > { %v1127_v22 = vmul.f32 7.54979e-08, %v2586_v53  ;;  %v1701_v13 = vadd.f32 1.0, %v1669_v6  ;;  %v1860_v14 = vsel %vm1796_vm6, %v1412_v59, %v1700_v7  ;;  %v1828_v21 = vsel %vm1796_vm6, %v1700_v7, %v1412_v59 }
  0xbe   : > { %v3326_v8 = vsub.f32 %v1094_v0, %v1126_v3  ;;  %v1031_v11 = vsub.f32 %v3260_v46, %v999_v27  ;;  %v2878_v26 = vtrunc.f32 %v823_v4  ;;  %v2052_v24 = vsub.f32 0.0, %v1860_v14 }
  0xbf   : > { %v674_v12 = vpop.permute.xlu1 %673  ;;  %v3337_v62 = vpop.permute.xlu0 %448  ;;  %v1861_v20 = vsel %vm1797_vm7, %v1413_v5, %v1701_v13  ;;  %v1829_v25 = vsel %vm1797_vm7, %v1701_v13, %v1413_v5  ;;  %v3359_v36 = vand.u32 3, %v3290_v19  ;;  %v1956_v43 = vsub.f32 0.0, %v1828_v21 }
  0xc0   : > { %v3341_v46 = vmul.f32 %v3326_v8, %v3326_v8  ;;  %v1095_v16 = vsub.f32 %v1031_v11, %v1063_v38  ;;  %v744_v18 = vmul.f32 %v3203_v29, %v674_v12  ;;  %2993 = vset.pattern.permute.xlu1 %v3026_v2  ;;  %v2879_v23 = vcvt.f32.s32 %v2878_v26 }
  0xc1   : > { %473 = vperm.xlu1 %2993, %v379_v10   ;;  %v2053_v2 = vsub.f32 0.0, %v1861_v20  ;;  %v2084_v41 = vsel %vm2020_vm8, %v2052_v24, %v1860_v14  ;;  %v1957_v59 = vsub.f32 0.0, %v1829_v25  ;;  %v1205_v60 = vmul.f32 -0.00019515296, %v3322_v63 }
  0xc2   : > { %v1222_v28 = vmul.f32 -0.00019515296, %v3341_v46  ;;  %v3350_v34 = vsub.f32 %v1095_v16, %v1127_v22  ;;  %v3352_v35 = vadd.f32 %v744_v18, %v580_v9  ;;  %v887_v40 = vcvt.s32.f32 %v2879_v23 }
  0xc3   : > { %v678_v48 = vpop.permute.xlu1 %677  ;;  %v544_v49 = vpop.permute.xlu0 %543  ;;  %v2085_v56 = vsel %vm2021_vm9, %v2053_v2, %v1861_v20  ;;  %v1988_v4 = vsel %vm1924_vm10, %v1956_v43, %v1828_v21  ;;  %v1429_v6 = vmul.f32 2.4433157e-05, %v3322_v63  ;;  %v3400_v16 = vmul.f32 %v3206_v30, %v3316_v58 }
  0xc4   : > { %v1254_v52 = vadd.f32 0.008332161, %v1222_v28  ;;  %v3367_v53 = vmul.f32 %v3350_v34, %v3350_v34  ;;  %v808_v55 = vmul.f32 0.63661975, %v3352_v35  ;;  %v2570_v19 = vadd.f32 -65536.0, %v887_v40 }
  0xc5   : > { %v3370_v57 = vpack.c.bf16 %v2085_v56, %v2084_v41  ;;  %2994 = vset.pattern.permute.xlu1 %v3025_v1  ;;  %v745_v27 = vmul.f32 %v3203_v29, %v678_v48  ;;  %v1989_v1 = vsel %vm1925_vm11, %v1957_v59, %v1829_v25  ;;  %4929 = vst [vmem:[#allocation4_spill] sm:$0xff] %v3400_v16  ;;  %v1237_v24 = vadd.f32 0.008332161, %v1205_v60 }
  0xc6   : > { %v1286_v61 = vmul.f32 %v1254_v52, %v3341_v46  ;;  %v1223_v0 = vmul.f32 -0.00019515296, %v3367_v53  ;;  %v840_v3 = vadd.f32 65536.5, %v808_v55  ;;  %653 = vperm.xlu1 %2994, %v379_v10   ;;  %v983_v32 = vmul.f32 1.5703125, %v2570_v19 }
  0xc7   : > { %4927 = vst [vmem:[#allocation2_spill] sm:$0xff] %v3370_v57  ;;  %2745 = vmatprep.subr.bf16.mxu0 %v3370_v57  ;;  %v459_v5 = vpop.permute.xlu0 %458  ;;  %v3387_v9 = vpack.c.bf16 %v1989_v1, %v1988_v4  ;;  %v1047_v26 = vmul.f32 0.0004837513, %v2570_v19  ;;  %v3392_v10 = vmul.f32 %v3206_v30, %v3295_v31  ;;  %v3395_v12 = vadd.f32 %v745_v27, %v3265_v50 }
  0xc8   : > { %v1318_v7 = vadd.f32 -0.16666655, %v1286_v61  ;;  %v1255_v11 = vadd.f32 0.008332161, %v1223_v0  ;;  %v2912_v38 = vtrunc.f32 %v840_v3  ;;  %v424_v22 = vpop.permute.xlu1 %423  ;;  %v1015_v37 = vsub.f32 %v3311_v47, %v983_v32 }
  0xc9   : > { %4928 = vst [vmem:[#allocation3_spill] sm:$0xff] %v3387_v9  ;;  %v1111_v14 = vmul.f32 7.54979e-08, %v2570_v19  ;;  %2777 = vmatprep.subr.bf16.mxu1 %v3387_v9  ;;  %v809_v47 = vmul.f32 0.63661975, %v3395_v12  ;;  %v3407_v2 = vmul.f32 %v3206_v30, %v3337_v62  ;;  %v3409_v40 = vand.u32 3, %v2879_v23 }
  0xca   : > { %v1287_v13 = vmul.f32 %v1255_v11, %v3367_v53  ;;  %v2913_v18 = vcvt.f32.s32 %v2912_v38  ;;  %v1079_v21 = vsub.f32 %v1015_v37, %v1047_v26  ;;  %v1461_v31 = vadd.f32 -0.0013887316, %v1429_v6 }
  0xcb   : > { %v554_v20 = vpop.permute.xlu0 %553  ;;  %v1350_v25 = vmul.f32 %v1318_v7, %v3341_v46  ;;  %4930 = vst [vmem:[#allocation5_spill] sm:$0xff] %v3409_v40  ;;  %v841_v41 = vadd.f32 65536.5, %v809_v47  ;;  %v1269_v48 = vmul.f32 %v1237_v24, %v3322_v63  ;;  %v3415_v55 = vmul.f32 %v3206_v30, %v544_v49 }
  0xcc   : > { %v1319_v50 = vadd.f32 -0.16666655, %v1287_v13  ;;  %v904_v28 = vcvt.s32.f32 %v2913_v18  ;;  %v3411_v58 = vsub.f32 %v1079_v21, %v1111_v14  ;;  %v565_v56 = vmul.f32 %v3206_v30, %v424_v22 }
  0xcd   : > { %v614_v43 = vpop.permute.xlu1 %613  ;;  %4931 = vst [vmem:[#allocation6_spill] sm:$0xff] %v3415_v55  ;;  %v2914_v23 = vtrunc.f32 %v841_v41  ;;  %v1301_v60 = vadd.f32 -0.16666655, %v1269_v48  ;;  %v1493_v61 = vmul.f32 %v1461_v31, %v3322_v63  ;;  %v3425_v0 = vmul.f32 %v1350_v25, %v3326_v8 }
  0xce   : > { %v2587_v52 = vadd.f32 -65536.0, %v904_v28  ;;  %v729_v19 = vmul.f32 %v3203_v29, %v614_v43  ;;  %v3421_v62 = vmul.f32 %v3411_v58, %v3411_v58  ;;  %v1351_v3 = vmul.f32 %v1319_v50, %v3367_v53 }
  0xcf   : > { %v469_v59 = vpop.permute.xlu0 %468  ;;  %v3429_v27 = vmul.f32 %v3206_v30, %v459_v5  ;;  %v3432_v4 = vand.u32 3, %v2913_v18  ;;  %v2915_v1 = vcvt.f32.s32 %v2914_v23  ;;  %v3438_v38 = vmul.f32 %v3206_v30, %v554_v20 }
  0xd0   : > { %v1000_v49 = vmul.f32 1.5703125, %v2587_v52  ;;  %v1207_v32 = vmul.f32 -0.00019515296, %v3421_v62  ;;  %v3434_v6 = vadd.f32 %v729_v19, %v565_v56  ;;  %v1064_v11 = vmul.f32 0.0004837513, %v2587_v52 }
  0xd1   : > { %4932 = vst [vmem:[#allocation7_spill] sm:$0xff] %v3432_v4  ;;  %4933 = vst [vmem:[#allocation8_spill] sm:$0xff] %v3438_v38  ;;  %v1333_v37 = vmul.f32 %v1301_v60, %v3322_v63  ;;  %v905_v13 = vcvt.s32.f32 %v2915_v1  ;;  %v1525_v14 = vadd.f32 0.041666646, %v1493_v61  ;;  %v3443_v18 = vmul.f32 %v1351_v3, %v3350_v34 }
  0xd2   : > { %v1032_v7 = vsub.f32 %v3352_v35, %v1000_v49  ;;  %v509_v22 = vpop.permute.xlu1 %508  ;;  %v1239_v26 = vadd.f32 0.008332161, %v1207_v32  ;;  %v793_v5 = vmul.f32 0.63661975, %v3434_v6  ;;  %v1128_v47 = vmul.f32 7.54979e-08, %v2587_v52 }
  0xd3   : > { %v1557_v35 = vmul.f32 %v3322_v63, %v3322_v63  ;;  %v2588_v31 = vadd.f32 -65536.0, %v905_v13  ;;  %v3451_v41 = vand.u32 3, %v2915_v1  ;;  %v3454_v43 = vmul.f32 %v3206_v30, %v469_v59 }
  0xd4   : > { %v1096_v21 = vsub.f32 %v1032_v7, %v1064_v11  ;;  %v594_v24 = vpop.permute.xlu0 %593  ;;  %v1271_v20 = vmul.f32 %v1239_v26, %v3421_v62  ;;  %v825_v25 = vadd.f32 65536.5, %v793_v5  ;;  %v1621_v48 = vmul.f32 0.5, %v3322_v63 }
  0xd5   : > { %v724_v50 = vmul.f32 %v3203_v29, %v594_v24  ;;  %4935 = vst [vmem:[#allocation10_spill] sm:$0xff] %v3451_v41  ;;  %v1001_v52 = vmul.f32 1.5703125, %v2588_v31  ;;  %v582_v56 = vmul.f32 %v3206_v30, %v509_v22  ;;  %v1365_v23 = vmul.f32 %v1333_v37, %v3300_v39 }
  0xd6   : > { %v3449_v28 = vsub.f32 %v1096_v21, %v1128_v47  ;;  %v1589_v60 = vmul.f32 %v1557_v35, %v1525_v14  ;;  %v2882_v3 = vtrunc.f32 %v825_v25  ;;  %v1303_v1 = vadd.f32 -0.16666655, %v1271_v20 }
  0xd7   : > { %v682_v19 = vpop.permute.xlu1 %681  ;;  %v3464_v49 = vadd.f32 %v724_v50, %v3246_v33  ;;  %v1033_v63 = vsub.f32 %v3395_v12, %v1001_v52  ;;  %v1065_v7 = vmul.f32 0.0004837513, %v2588_v31  ;;  %v1129_v5 = vmul.f32 7.54979e-08, %v2588_v31 }
  0xd8   : > { %4934 = vst [vmem:[#allocation9_spill] sm:$0xff] %v3449_v28  ;;  %v3461_v61 = vmul.f32 %v3449_v28, %v3449_v28  ;;  %v746_v59 = vmul.f32 %v3203_v29, %v682_v19  ;;  %v602_v32 = vpop.permute.xlu0 %601  ;;  %v2883_v37 = vcvt.f32.s32 %v2882_v3  ;;  %v3478_v12 = vadd.f32 %v1365_v23, %v3300_v39 }
  0xd9   : > { %v726_v11 = vmul.f32 %v3203_v29, %v602_v32  ;;  %v788_v26 = vmul.f32 0.63661975, %v3464_v49  ;;  %v1097_v33 = vsub.f32 %v1033_v63, %v1065_v7  ;;  %v1653_v20 = vsub.f32 %v1589_v60, %v1621_v48 }
  0xda   : > { %4936 = vst [vmem:[#allocation11_spill] sm:$0xff] %v3461_v61  ;;  %v1224_v22 = vmul.f32 -0.00019515296, %v3461_v61  ;;  %v3471_v13 = vadd.f32 %v746_v59, %v582_v56  ;;  %v889_v24 = vcvt.s32.f32 %v2883_v37  ;;  %vm1749_vm13 = vcmp.eq.s32.totalorder %v3270_v54, 3 }
  0xdb   : > { %v3475_v14 = vadd.f32 %v726_v11, %v3257_v42  ;;  %v686_v21 = vpop.permute.xlu1 %685  ;;  %v820_v35 = vadd.f32 65536.5, %v788_v26  ;;  %v3480_v25 = vsub.f32 %v1097_v33, %v1129_v5  ;;  %v1335_v42 = vmul.f32 %v1303_v1, %v3421_v62  ;;  %vm3512_vm14 = vmor %vm1717_vm12, %vm1749_vm13 }
  0xdc   : > { %v1256_v47 = vadd.f32 0.008332161, %v1224_v22  ;;  %v810_v50 = vmul.f32 0.63661975, %v3471_v13  ;;  %v747_v56 = vmul.f32 %v3203_v29, %v686_v21  ;;  %v610_v31 = vpop.permute.xlu0 %609  ;;  %v2572_v3 = vadd.f32 -65536.0, %v889_v24 }
  0xdd   : > { %4937 = vst [vmem:[#allocation12_spill] sm:$0xff] %v3480_v25  ;;  %v790_v52 = vmul.f32 0.63661975, %v3475_v14  ;;  %v2872_v39 = vtrunc.f32 %v820_v35  ;;  %v3489_v23 = vmul.f32 %v3480_v25, %v3480_v25  ;;  %v728_v7 = vmul.f32 %v3203_v29, %v610_v31 }
  0xde   : > { %v1288_v19 = vmul.f32 %v1256_v47, %v3461_v61  ;;  %v842_v48 = vadd.f32 65536.5, %v810_v50  ;;  %v3492_v59 = vadd.f32 %v747_v56, %v3283_v15  ;;  %v985_v63 = vmul.f32 1.5703125, %v2572_v3 }
  0xdf   : > { %4938 = vst [vmem:[#allocation13_spill] sm:$0xff] %v3489_v23  ;;  %v822_v60 = vadd.f32 65536.5, %v790_v52  ;;  %v1225_v1 = vmul.f32 -0.00019515296, %v3489_v23  ;;  %v2873_v11 = vcvt.f32.s32 %v2872_v39  ;;  %v1049_v5 = vmul.f32 0.0004837513, %v2572_v3 }
  0xe0   : > { %v1320_v32 = vadd.f32 -0.16666655, %v1288_v19  ;;  %v2916_v22 = vtrunc.f32 %v842_v48  ;;  %v1017_v33 = vsub.f32 %v3434_v6, %v985_v63  ;;  %v811_v21 = vmul.f32 0.63661975, %v3492_v59 }
  0xe1   : > { %v2876_v26 = vtrunc.f32 %v822_v60  ;;  %v3499_v47 = vadd.f32 1.0, %v1653_v20  ;;  %v3502_v15 = vmul.f32 %v1335_v42, %v3411_v58  ;;  %v1257_v24 = vadd.f32 0.008332161, %v1225_v1  ;;  %v618_v1 = vpop.permute.xlu0 %617 }
  0xe2   : > { %v884_v35 = vcvt.s32.f32 %v2873_v11  ;;  %v2917_v50 = vcvt.f32.s32 %v2916_v22  ;;  %v1081_v52 = vsub.f32 %v1017_v33, %v1049_v5  ;;  %v1113_v56 = vmul.f32 7.54979e-08, %v2572_v3 }
  0xe3   : > { %v2877_v31 = vcvt.f32.s32 %v2876_v26  ;;  %v843_v19 = vadd.f32 65536.5, %v811_v21  ;;  %v1352_v39 = vmul.f32 %v1320_v32, %v3461_v61  ;;  %v3506_v6 = vadd.f32 %v728_v7, %v3268_v51 }
  0xe4   : > { %v2567_v48 = vadd.f32 -65536.0, %v884_v35  ;;  %v906_v60 = vcvt.s32.f32 %v2917_v50  ;;  %v3516_v42 = vsub.f32 %v1081_v52, %v1113_v56  ;;  %v3522_v32 = vsel %vm3512_vm14, %v3478_v12, %v3499_v47 }
  0xe5   : > { %v886_v3 = vcvt.s32.f32 %v2877_v31  ;;  %v2918_v63 = vtrunc.f32 %v843_v19  ;;  %v1289_v51 = vmul.f32 %v1257_v24, %v3489_v23  ;;  %v3525_v7 = vand.u32 3, %v2883_v37  ;;  %v626_v16 = vpop.permute.xlu0 %625 }
  0xe6   : > { %4941 = vst [vmem:[#allocation14_spill] sm:$0xff] %v3516_v42  ;;  %v3527_v22 = vand.u32 3, %v2873_v11  ;;  %v980_v26 = vmul.f32 1.5703125, %v2567_v48  ;;  %v3531_v33 = vmul.f32 %v3516_v42, %v3516_v42  ;;  %v2589_v5 = vadd.f32 -65536.0, %v906_v60 }
  0xe7   : > { %4942 = vst [vmem:[#allocation15_spill] sm:$0xff] %v3525_v7  ;;  %v2569_v21 = vadd.f32 -65536.0, %v886_v3  ;;  %v3533_v35 = vcvt.f32.s32 %v2918_v63  ;;  %v3536_v52 = vmul.f32 %v1352_v39, %v3449_v28  ;;  %v1044_v19 = vmul.f32 0.0004837513, %v2567_v48 }
  0xe8   : > { %4943 = vst [vmem:[#allocation16_spill] sm:$0xff] %v3531_v33  ;;  %v1012_v56 = vsub.f32 %v3464_v49, %v980_v26  ;;  %v792_v37 = vmul.f32 0.63661975, %v3506_v6  ;;  %v1209_v11 = vmul.f32 -0.00019515296, %v3531_v33  ;;  %v3541_v24 = vand.u32 3, %v2917_v50  ;;  %v434_v26 = vpop.permute.xlu1 %433 }
  0xe9   : > { %4944 = vst [vmem:[#allocation17_spill] sm:$0xff] %v3536_v52  ;;  %v1002_v9 = vmul.f32 1.5703125, %v2589_v5  ;;  %v3543_v57 = vand.u32 3, %v2877_v31  ;;  %v1321_v38 = vadd.f32 -0.16666655, %v1289_v51  ;;  %v982_v3 = vmul.f32 1.5703125, %v2569_v21 }
  0xea   : > { %4945 = vst [vmem:[#allocation18_spill] sm:$0xff] %v3541_v24  ;;  %v1108_v60 = vmul.f32 7.54979e-08, %v2567_v48  ;;  %v1046_v63 = vmul.f32 0.0004837513, %v2569_v21  ;;  %v1241_v55 = vadd.f32 0.008332161, %v1209_v11  ;;  %v907_v49 = vcvt.s32.f32 %v3533_v35 }
  0xeb   : > { %4946 = vst [vmem:[#allocation19_spill] sm:$0xff] %v3543_v57  ;;  %v1034_v39 = vsub.f32 %v3471_v13, %v1002_v9  ;;  %v1066_v7 = vmul.f32 0.0004837513, %v2589_v5  ;;  %v1076_v41 = vsub.f32 %v1012_v56, %v1044_v19  ;;  %v1014_v4 = vsub.f32 %v3475_v14, %v982_v3 }
  0xec   : > { %v1110_v50 = vmul.f32 7.54979e-08, %v2569_v21  ;;  %v824_v24 = vadd.f32 65536.5, %v792_v37  ;;  %v1130_v31 = vmul.f32 7.54979e-08, %v2589_v5  ;;  %v730_v48 = vmul.f32 %v3203_v29, %v618_v1  ;;  %v634_v37 = vpop.permute.xlu0 %633 }
  0xed   : > { %v1098_v52 = vsub.f32 %v1034_v39, %v1066_v7  ;;  %v2590_v28 = vadd.f32 -65536.0, %v907_v49  ;;  %v1273_v51 = vmul.f32 %v1241_v55, %v3531_v33  ;;  %v1078_v11 = vsub.f32 %v1014_v4, %v1046_v63 }
  0xee   : > { %v2880_v61 = vtrunc.f32 %v824_v24  ;;  %v732_v9 = vmul.f32 %v3203_v29, %v626_v16  ;;  %v1353_v13 = vmul.f32 %v1321_v38, %v3489_v23  ;;  %v567_v14 = vmul.f32 %v3206_v30, %v434_v26 }
  0xef   : > { %v3552_v40 = vsub.f32 %v1098_v52, %v1130_v31  ;;  %v1003_v56 = vmul.f32 1.5703125, %v2590_v28  ;;  %v3555_v21 = vsub.f32 %v1076_v41, %v1108_v60  ;;  %v3557_v7 = vsub.f32 %v1078_v11, %v1110_v50  ;;  %v622_v52 = vpop.permute.xlu1 %621 }
  0xf0   : > { %v2881_v5 = vcvt.f32.s32 %v2880_v61  ;;  %v3560_v1 = vadd.f32 %v730_v48, %v3286_v17  ;;  %v1067_v4 = vmul.f32 0.0004837513, %v2590_v28  ;;  %v3568_v38 = vadd.f32 %v732_v9, %v3392_v10 }
  0xf1   : > { %4947 = vst [vmem:[#allocation20_spill] sm:$0xff] %v3552_v40  ;;  %v3564_v55 = vmul.f32 %v3552_v40, %v3552_v40  ;;  %v1035_v16 = vsub.f32 %v3492_v59, %v1003_v56  ;;  %v1305_v19 = vadd.f32 -0.16666655, %v1273_v51  ;;  %v3572_v41 = vmul.f32 %v3557_v7, %v3557_v7 }
  0xf2   : > { %v888_v61 = vcvt.s32.f32 %v2881_v5  ;;  %v794_v17 = vmul.f32 0.63661975, %v3560_v1  ;;  %v1131_v3 = vmul.f32 7.54979e-08, %v2590_v28  ;;  %v796_v59 = vmul.f32 0.63661975, %v3568_v38 }
  0xf3   : > { %4948 = vst [vmem:[#allocation21_spill] sm:$0xff] %v3564_v55  ;;  %v1226_v24 = vmul.f32 -0.00019515296, %v3564_v55  ;;  %v1099_v60 = vsub.f32 %v1035_v16, %v1067_v4  ;;  %v1206_v63 = vmul.f32 -0.00019515296, %v3572_v41  ;;  %v731_v49 = vmul.f32 %v3203_v29, %v622_v52 }
  0xf4   : > { %v2571_v10 = vadd.f32 -65536.0, %v888_v61  ;;  %v826_v39 = vadd.f32 65536.5, %v794_v17  ;;  %v828_v31 = vadd.f32 65536.5, %v796_v59  ;;  %v734_v48 = vmul.f32 %v3203_v29, %v634_v37 }
  0xf5   : > { %v1258_v26 = vadd.f32 0.008332161, %v1226_v24  ;;  %v3579_v50 = vsub.f32 %v1099_v60, %v1131_v3  ;;  %v1238_v51 = vadd.f32 0.008332161, %v1206_v63  ;;  %v3589_v24 = vadd.f32 %v731_v49, %v567_v14  ;;  %v519_v49 = vpop.permute.xlu1 %518 }
  0xf6   : > { %v984_v11 = vmul.f32 1.5703125, %v2571_v10  ;;  %v1048_v9 = vmul.f32 0.0004837513, %v2571_v10  ;;  %v1112_v56 = vmul.f32 7.54979e-08, %v2571_v10  ;;  %v2884_v4 = vtrunc.f32 %v826_v39 }
  0xf7   : > { %v1290_v28 = vmul.f32 %v1258_v26, %v3564_v55  ;;  %v3585_v16 = vmul.f32 %v3579_v50, %v3579_v50  ;;  %v2888_v61 = vtrunc.f32 %v828_v31  ;;  %v1270_v52 = vmul.f32 %v1238_v51, %v3572_v41 }
  0xf8   : > { %v1016_v17 = vsub.f32 %v3506_v6, %v984_v11  ;;  %v3592_v37 = vadd.f32 %v734_v48, %v3407_v2  ;;  %v1337_v60 = vmul.f32 %v1305_v19, %v3531_v33  ;;  %v2885_v59 = vcvt.f32.s32 %v2884_v4 }
  0xf9   : > { %4949 = vst [vmem:[#allocation22_spill] sm:$0xff] %v3585_v16  ;;  %v1227_v3 = vmul.f32 -0.00019515296, %v3585_v16  ;;  %v2889_v63 = vcvt.f32.s32 %v2888_v61  ;;  %v1322_v10 = vadd.f32 -0.16666655, %v1290_v28  ;;  %v3599_v51 = vmul.f32 %v1353_v13, %v3480_v25 }
  0xfa   : > { %v1080_v26 = vsub.f32 %v1016_v17, %v1048_v9  ;;  %v795_v39 = vmul.f32 0.63661975, %v3589_v24  ;;  %v798_v31 = vmul.f32 0.63661975, %v3592_v37  ;;  %v3602_v6 = vand.u32 3, %v3533_v35 }
  0xfb   : > { %4950 = vst [vmem:[#allocation23_spill] sm:$0xff] %v3599_v51  ;;  %v1259_v2 = vadd.f32 0.008332161, %v1227_v3  ;;  %v890_v14 = vcvt.s32.f32 %v2885_v59  ;;  %v3606_v19 = vmul.f32 %v3555_v21, %v3555_v21  ;;  %v1302_v48 = vadd.f32 -0.16666655, %v1270_v52 }
  0xfc   : > { %4951 = vst [vmem:[#allocation24_spill] sm:$0xff] %v3602_v6  ;;  %v3608_v11 = vsub.f32 %v1080_v26, %v1112_v56  ;;  %v892_v9 = vcvt.s32.f32 %v2889_v63  ;;  %v3611_v28 = vmul.f32 %v1337_v60, %v3516_v42  ;;  %v3613_v4 = vand.u32 3, %v2881_v5  ;;  %v642_v60 = vpop.permute.xlu0 %641 }
  0xfd   : > { %v2573_v13 = vadd.f32 -65536.0, %v890_v14  ;;  %v827_v61 = vadd.f32 65536.5, %v795_v39  ;;  %v1354_v35 = vmul.f32 %v1322_v10, %v3564_v55  ;;  %v830_v6 = vadd.f32 65536.5, %v798_v31 }
  0xfe   : > { %4952 = vst [vmem:[#allocation25_spill] sm:$0xff] %v3611_v28  ;;  %4953 = vst [vmem:[#allocation26_spill] sm:$0xff] %v3613_v4  ;;  %v3618_v17 = vmul.f32 %v3608_v11, %v3608_v11  ;;  %v2575_v3 = vadd.f32 -65536.0, %v892_v9  ;;  %v1291_v52 = vmul.f32 %v1259_v2, %v3585_v16  ;;  %v3621_v56 = vand.u32 3, %v2885_v59  ;;  %v690_v28 = vpop.permute.xlu1 %689 }
  0xff   : > { %v986_v26 = vmul.f32 1.5703125, %v2573_v13  ;;  %v1050_v33 = vmul.f32 0.0004837513, %v2573_v13  ;;  %v3624_v5 = vmul.f32 %v1302_v48, %v3572_v41  ;;  %v3627_v14 = vand.u32 3, %v2889_v63 }
 0x100   : > { %4954 = vst [vmem:[#allocation27_spill] sm:$0xff] %v3621_v56  ;;  %v1208_v39 = vmul.f32 -0.00019515296, %v3618_v17  ;;  %v988_v10 = vmul.f32 1.5703125, %v2575_v3  ;;  %v1114_v4 = vmul.f32 7.54979e-08, %v2573_v13  ;;  %v2886_v9 = vtrunc.f32 %v827_v61 }
 0x101   : > { %4955 = vst [vmem:[#allocation28_spill] sm:$0xff] %v3627_v14  ;;  %v1018_v55 = vsub.f32 %v3560_v1, %v986_v26  ;;  %v2892_v31 = vtrunc.f32 %v830_v6  ;;  %v1052_v56 = vmul.f32 0.0004837513, %v2575_v3  ;;  %v736_v42 = vmul.f32 %v3203_v29, %v642_v60 }
 0x102   : > { %v1240_v2 = vadd.f32 0.008332161, %v1208_v39  ;;  %v1020_v59 = vsub.f32 %v3568_v38, %v988_v10  ;;  %v1323_v51 = vadd.f32 -0.16666655, %v1291_v52  ;;  %v3632_v25 = vcvt.f32.s32 %v2886_v9  ;;  %v3664_v39 = vld [vmem:[%s3200_s18 + $0x1] ss:$0 sm:$0xff] }
 0x103   : > { %v1082_v48 = vsub.f32 %v1018_v55, %v1050_v33  ;;  %v3634_v23 = vcvt.f32.s32 %v2892_v31  ;;  %v1116_v14 = vmul.f32 7.54979e-08, %v2575_v3  ;;  %v3637_v1 = vadd.f32 %v736_v42, %v3429_v27  ;;  %v650_v55 = vpop.permute.xlu0 %649 }
 0x104   : > { %v1084_v63 = vsub.f32 %v1020_v59, %v1052_v56  ;;  %v748_v6 = vmul.f32 %v3203_v29, %v690_v28  ;;  %v1272_v13 = vmul.f32 %v1240_v2, %v3618_v17  ;;  %v891_v61 = vcvt.s32.f32 %v3632_v25 }
 0x105   : > { %v3641_v38 = vsub.f32 %v1082_v48, %v1114_v4  ;;  %v894_v33 = vcvt.s32.f32 %v3634_v23  ;;  %v3646_v52 = vmul.f32 %v1354_v35, %v3552_v40  ;;  %v584_v27 = vmul.f32 %v3206_v30, %v519_v49  ;;  %v694_v48 = vpop.permute.xlu1 %693 }
 0x106   : > { %v3648_v56 = vsub.f32 %v1084_v63, %v1116_v14  ;;  %v800_v42 = vmul.f32 0.63661975, %v3637_v1  ;;  %v1355_v29 = vmul.f32 %v1323_v51, %v3585_v16  ;;  %v2574_v4 = vadd.f32 -65536.0, %v891_v61 }
 0x107   : > { %4956 = vst [vmem:[#allocation29_spill] sm:$0xff] %v3641_v38  ;;  %4957 = vst [vmem:[#allocation30_spill] sm:$0xff] %v3646_v52  ;;  %v3655_v28 = vmul.f32 %v3641_v38, %v3641_v38  ;;  %v2577_v3 = vadd.f32 -65536.0, %v894_v33  ;;  %v3661_v60 = vadd.f32 %v748_v6, %v584_v27  ;;  %v738_v30 = vmul.f32 %v3664_v39, %v650_v55 }
 0x108   : > { %4958 = vst [vmem:[#allocation31_spill] sm:$0xff] %v3648_v56  ;;  %v3659_v26 = vmul.f32 %v3648_v56, %v3648_v56  ;;  %v832_v35 = vadd.f32 65536.5, %v800_v42  ;;  %v1304_v49 = vadd.f32 -0.16666655, %v1272_v13  ;;  %v987_v14 = vmul.f32 1.5703125, %v2574_v4 }
 0x109   : > { %v1210_v51 = vmul.f32 -0.00019515296, %v3655_v28  ;;  %v1051_v10 = vmul.f32 0.0004837513, %v2574_v4  ;;  %v1115_v31 = vmul.f32 7.54979e-08, %v2574_v4  ;;  %v990_v2 = vmul.f32 1.5703125, %v2577_v3 }
 0x10a   : > { %4959 = vst [vmem:[#allocation32_spill] sm:$0xff] %v3659_v26  ;;  %v1212_v9 = vmul.f32 -0.00019515296, %v3659_v26  ;;  %v1054_v59 = vmul.f32 0.0004837513, %v2577_v3  ;;  %v1019_v61 = vsub.f32 %v3589_v24, %v987_v14  ;;  %v1118_v6 = vmul.f32 7.54979e-08, %v2577_v3 }
 0x10b   : > { %v1242_v63 = vadd.f32 0.008332161, %v1210_v51  ;;  %v2896_v33 = vtrunc.f32 %v832_v35  ;;  %v1022_v42 = vsub.f32 %v3592_v37, %v990_v2  ;;  %v812_v13 = vmul.f32 0.63661975, %v3661_v60 }
 0x10c   : > { %v1244_v27 = vadd.f32 0.008332161, %v1212_v9  ;;  %v3673_v55 = vadd.f32 %v738_v30, %v3454_v43  ;;  %v1083_v40 = vsub.f32 %v1019_v61, %v1051_v10  ;;  %v749_v16 = vmul.f32 %v3664_v39, %v694_v48  ;;  %v444_v61 = vpop.permute.xlu1 %443 }
 0x10d   : > { %v1274_v52 = vmul.f32 %v1242_v63, %v3655_v28  ;;  %v2897_v4 = vcvt.f32.s32 %v2896_v33  ;;  %v1086_v57 = vsub.f32 %v1022_v42, %v1054_v59  ;;  %v844_v24 = vadd.f32 65536.5, %v812_v13 }
 0x10e   : > { %v1276_v51 = vmul.f32 %v1244_v27, %v3659_v26  ;;  %v802_v3 = vmul.f32 0.63661975, %v3673_v55  ;;  %v3681_v37 = vmul.f32 %v3624_v5, %v3557_v7  ;;  %v3683_v14 = vsub.f32 %v1083_v40, %v1115_v31 }
 0x10f   : > { %v1306_v35 = vadd.f32 -0.16666655, %v1274_v52  ;;  %v896_v43 = vcvt.s32.f32 %v2897_v4  ;;  %v3685_v9 = vsub.f32 %v1086_v57, %v1118_v6  ;;  %v2920_v10 = vtrunc.f32 %v844_v24 }
 0x110   : > { %4960 = vst [vmem:[#allocation33_spill] sm:$0xff] %v3683_v14  ;;  %v1308_v30 = vadd.f32 -0.16666655, %v1276_v51  ;;  %v834_v2 = vadd.f32 65536.5, %v802_v3  ;;  %v3688_v48 = vmul.f32 %v1355_v29, %v3579_v50  ;;  %v1336_v59 = vmul.f32 %v1304_v49, %v3618_v17 }
 0x111   : > { %v3693_v63 = vmul.f32 %v3683_v14, %v3683_v14  ;;  %v2579_v5 = vadd.f32 -65536.0, %v896_v43  ;;  %v3697_v40 = vmul.f32 %v3685_v9, %v3685_v9  ;;  %v2921_v52 = vcvt.f32.s32 %v2920_v10 }
 0x112   : > { %v2900_v57 = vtrunc.f32 %v834_v2  ;;  %v3700_v31 = vadd.f32 %v749_v16, %v3309_v45  ;;  %v3703_v29 = vand.u32 3, %v3632_v25  ;;  %v3707_v6 = vand.u32 3, %v3634_v23 }
 0x113   : > { %4961 = vst [vmem:[#allocation34_spill] sm:$0xff] %v3697_v40  ;;  %v1211_v49 = vmul.f32 -0.00019515296, %v3693_v63  ;;  %v992_v33 = vmul.f32 1.5703125, %v2579_v5  ;;  %v1338_v27 = vmul.f32 %v1306_v35, %v3655_v28  ;;  %v1340_v42 = vmul.f32 %v1308_v30, %v3659_v26  ;;  %v630_v26 = vpop.permute.xlu1 %629 }
 0x114   : > { %4962 = vst [vmem:[#allocation35_spill] sm:$0xff] %v3703_v29  ;;  %4963 = vst [vmem:[#allocation36_spill] sm:$0xff] %v3707_v6  ;;  %v1214_v13 = vmul.f32 -0.00019515296, %v3697_v40  ;;  %v908_v51 = vcvt.s32.f32 %v2921_v52  ;;  %v1056_v16 = vmul.f32 0.0004837513, %v2579_v5  ;;  %v2901_v3 = vcvt.f32.s32 %v2900_v57 }
 0x115   : > { %v1243_v24 = vadd.f32 0.008332161, %v1211_v49  ;;  %v1024_v45 = vsub.f32 %v3637_v1, %v992_v33  ;;  %v3714_v25 = vmul.f32 %v1336_v59, %v3608_v11  ;;  %v813_v23 = vmul.f32 0.63661975, %v3700_v31  ;;  %v3738_v29 = vld [vmem:[%s3200_s18] ss:$0 sm:$0xff] }
 0x116   : > { %v1246_v43 = vadd.f32 0.008332161, %v1214_v13  ;;  %v2591_v10 = vadd.f32 -65536.0, %v908_v51  ;;  %v3717_v2 = vand.u32 3, %v2897_v4  ;;  %v1120_v6 = vmul.f32 7.54979e-08, %v2579_v5 }
 0x117   : > { %v1088_v35 = vsub.f32 %v1024_v45, %v1056_v16  ;;  %v898_v30 = vcvt.s32.f32 %v2901_v3  ;;  %v3720_v49 = vmul.f32 %v1338_v27, %v3641_v38  ;;  %v1275_v1 = vmul.f32 %v1243_v24, %v3693_v63  ;;  %4968 = vst [vmem:[#allocation41_spill] sm:$0xff] %v3738_v29 }
 0x118   : > { %4964 = vst [vmem:[#allocation37_spill] sm:$0xff] %v3717_v2  ;;  %v1278_v57 = vmul.f32 %v1246_v43, %v3697_v40  ;;  %v1004_v59 = vmul.f32 1.5703125, %v2591_v10  ;;  %v3725_v33 = vmul.f32 %v1340_v42, %v3648_v56  ;;  %v845_v51 = vadd.f32 65536.5, %v813_v23 }
 0x119   : > { %4965 = vst [vmem:[#allocation38_spill] sm:$0xff] %v3720_v49  ;;  %v3727_v13 = vsub.f32 %v1088_v35, %v1120_v6  ;;  %v2581_v4 = vadd.f32 -65536.0, %v898_v30  ;;  %v3729_v45 = vand.u32 3, %v2921_v52  ;;  %v1068_v16 = vmul.f32 0.0004837513, %v2591_v10 }
 0x11a   : > { %4966 = vst [vmem:[#allocation39_spill] sm:$0xff] %v3725_v33  ;;  %v1036_v5 = vsub.f32 %v3661_v60, %v1004_v59  ;;  %v733_v27 = vmul.f32 %v3664_v39, %v630_v26  ;;  %v1132_v43 = vmul.f32 7.54979e-08, %v2591_v10  ;;  %v569_v6 = vmul.f32 %v3738_v29, %v444_v61 }
 0x11b   : > { %4967 = vst [vmem:[#allocation40_spill] sm:$0xff] %v3729_v45  ;;  %v3735_v24 = vmul.f32 %v3727_v13, %v3727_v13  ;;  %v994_v2 = vmul.f32 1.5703125, %v2581_v4  ;;  %v1307_v42 = vadd.f32 -0.16666655, %v1275_v1  ;;  %v1310_v35 = vadd.f32 -0.16666655, %v1278_v57 }
 0x11c   : > { %v1100_v23 = vsub.f32 %v1036_v5, %v1068_v16  ;;  %v2922_v52 = vtrunc.f32 %v845_v51  ;;  %v1058_v59 = vmul.f32 0.0004837513, %v2581_v4  ;;  %v3743_v26 = vadd.f32 %v733_v27, %v569_v6  ;;  %v529_v51 = vpop.permute.xlu1 %528 }
 0x11d   : > { %v1216_v30 = vmul.f32 -0.00019515296, %v3735_v24  ;;  %v1026_v60 = vsub.f32 %v3673_v55, %v994_v2  ;;  %v1122_v56 = vmul.f32 7.54979e-08, %v2581_v4  ;;  %v1204_v45 = vmul.f32 -0.00019515296, %v3606_v19 }
 0x11e   : > { %v3745_v33 = vsub.f32 %v1100_v23, %v1132_v43  ;;  %v2923_v10 = vcvt.f32.s32 %v2922_v52  ;;  %v797_v61 = vmul.f32 0.63661975, %v3743_v26  ;;  %v1428_v1 = vmul.f32 2.4433157e-05, %v3606_v19 }
 0x11f   : > { %v1248_v49 = vadd.f32 0.008332161, %v1216_v30  ;;  %v1090_v38 = vsub.f32 %v1026_v60, %v1058_v59  ;;  %v1339_v57 = vmul.f32 %v1307_v42, %v3693_v63  ;;  %v1236_v5 = vadd.f32 0.008332161, %v1204_v45 }
 0x120   : > { %v3753_v55 = vmul.f32 %v3745_v33, %v3745_v33  ;;  %v909_v2 = vcvt.s32.f32 %v2923_v10  ;;  %v3755_v16 = vand.u32 3, %v2901_v3  ;;  %v829_v27 = vadd.f32 65536.5, %v797_v61 }
 0x121   : > { %v3757_v4 = vsub.f32 %v1090_v38, %v1122_v56  ;;  %v1460_v43 = vadd.f32 -0.0013887316, %v1428_v1  ;;  %v1280_v6 = vmul.f32 %v1248_v49, %v3735_v24  ;;  %v1268_v42 = vmul.f32 %v1236_v5, %v3606_v19 }
 0x122   : > { %4969 = vst [vmem:[#allocation42_spill] sm:$0xff] %v3755_v16  ;;  %v1228_v23 = vmul.f32 -0.00019515296, %v3753_v55  ;;  %v2592_v52 = vadd.f32 -65536.0, %v909_v2  ;;  %v2890_v60 = vtrunc.f32 %v829_v27  ;;  %v3767_v45 = vmul.f32 %v3738_v29, %v529_v51 }
 0x123   : > { %v3764_v30 = vmul.f32 %v3757_v4, %v3757_v4  ;;  %v1492_v38 = vmul.f32 %v1460_v43, %v3606_v19  ;;  %v3771_v56 = vmul.f32 %v1339_v57, %v3683_v14  ;;  %v1342_v3 = vmul.f32 %v1310_v35, %v3697_v40 }
 0x124   : > { %v1260_v49 = vadd.f32 0.008332161, %v1228_v23  ;;  %v1005_v59 = vmul.f32 1.5703125, %v2592_v52  ;;  %v3775_v1 = vcvt.f32.s32 %v2890_v60  ;;  %v1300_v2 = vadd.f32 -0.16666655, %v1268_v42 }
 0x125   : > { %4970 = vst [vmem:[#allocation43_spill] sm:$0xff] %v3771_v56  ;;  %v1218_v61 = vmul.f32 -0.00019515296, %v3764_v30  ;;  %v1556_v5 = vmul.f32 %v3606_v19, %v3606_v19  ;;  %v1312_v27 = vadd.f32 -0.16666655, %v1280_v6  ;;  %v1069_v16 = vmul.f32 0.0004837513, %v2592_v52 }
 0x126   : > { %v1037_v51 = vsub.f32 %v3700_v31, %v1005_v59  ;;  %v1524_v43 = vadd.f32 0.041666646, %v1492_v38  ;;  %v1292_v57 = vmul.f32 %v1260_v49, %v3753_v55  ;;  %v1133_v14 = vmul.f32 7.54979e-08, %v2592_v52 }
 0x127   : > { %v1250_v56 = vadd.f32 0.008332161, %v1218_v61  ;;  %v893_v35 = vcvt.s32.f32 %v3775_v1  ;;  %v1332_v40 = vmul.f32 %v1300_v2, %v3606_v19  ;;  %v1620_v42 = vmul.f32 0.5, %v3606_v19 }
 0x128   : > { %v1101_v23 = vsub.f32 %v1037_v51, %v1069_v16  ;;  %v1588_v60 = vmul.f32 %v1556_v5, %v1524_v43  ;;  %v3785_v29 = vmul.f32 %v1342_v3, %v3685_v9  ;;  %vm1716_vm15 = vcmp.eq.s32.totalorder %v3527_v22, 1 }
 0x129   : > { %v1282_v6 = vmul.f32 %v1250_v56, %v3764_v30  ;;  %v2576_v31 = vadd.f32 -65536.0, %v893_v35  ;;  %v1364_v52 = vmul.f32 %v1332_v40, %v3555_v21  ;;  %vm1748_vm0 = vcmp.eq.s32.totalorder %v3527_v22, 3 }
 0x12a   : > { %v3789_v38 = vsub.f32 %v1101_v23, %v1133_v14  ;;  %v1652_v49 = vsub.f32 %v1588_v60, %v1620_v42  ;;  %v1344_v16 = vmul.f32 %v1312_v27, %v3735_v24  ;;  %v1324_v59 = vadd.f32 -0.16666655, %v1292_v57  ;;  %vm1780_vm1 = vmor %vm1716_vm15, %vm1748_vm0 }
 0x12b   : > { %v3794_v61 = vand.u32 3, %v2923_v10  ;;  %v989_v19 = vmul.f32 1.5703125, %v2576_v31  ;;  %v1314_v3 = vadd.f32 -0.16666655, %v1282_v6  ;;  %v1396_v2 = vadd.f32 %v1364_v52, %v3555_v21 }
 0x12c   : > { %v3798_v56 = vmul.f32 %v3789_v38, %v3789_v38  ;;  %v1684_v14 = vadd.f32 1.0, %v1652_v49  ;;  %v1053_v40 = vmul.f32 0.0004837513, %v2576_v31  ;;  %vm1876_vm2 = vcmp.eq.s32.totalorder %v3527_v22, 2 }
 0x12d   : > { %v1021_v5 = vsub.f32 %v3743_v26, %v989_v19  ;;  %vm1877_vm3 = vcmp.eq.s32.totalorder %v3270_v54, 2  ;;  %vm2004_vm4 = vmor %vm1716_vm15, %vm1876_vm2  ;;  %v2037_v21 = vsub.f32 0.0, %v3522_v32  ;;  %v1117_v43 = vmul.f32 7.54979e-08, %v2576_v31 }
 0x12e   : > { %v1229_v10 = vmul.f32 -0.00019515296, %v3798_v56  ;;  %v1844_v27 = vsel %vm1780_vm1, %v1396_v2, %v1684_v14  ;;  %v1812_v51 = vsel %vm1780_vm1, %v1684_v14, %v1396_v2  ;;  %vm2005_vm5 = vmor %vm1717_vm12, %vm1877_vm3  ;;  %v1813_v35 = vsel %vm3512_vm14, %v3499_v47, %v3478_v12 }
 0x12f   : > { %v1085_v26 = vsub.f32 %v1021_v5, %v1053_v40  ;;  %v2036_v57 = vsub.f32 0.0, %v1844_v27  ;;  %v1356_v23 = vmul.f32 %v1324_v59, %v3753_v55  ;;  %vm1908_vm6 = vmor %vm1876_vm2, %vm1748_vm0  ;;  %v1940_v42 = vsub.f32 0.0, %v1812_v51  ;;  %v698_v59 = vpop.permute.xlu1 %697 }
 0x130   : > { %v1261_v60 = vadd.f32 0.008332161, %v1229_v10  ;;  %v1941_v6 = vsub.f32 0.0, %v1813_v35  ;;  %v1346_v31 = vmul.f32 %v1314_v3, %v3764_v30  ;;  %v2069_v19 = vsel %vm2005_vm5, %v2037_v21, %v3522_v32  ;;  %vm1909_vm7 = vmor %vm1877_vm3, %vm1749_vm13 }
 0x131   : > { %v3824_v52 = vsub.f32 %v1085_v26, %v1117_v43  ;;  %v2068_v49 = vsel %vm2004_vm4, %v2036_v57, %v1844_v27  ;;  %v1972_v20 = vsel %vm1908_vm6, %v1940_v42, %v1812_v51  ;;  %v1446_v32 = vmul.f32 2.4433157e-05, %v3341_v46 }
 0x132   : > { %v1293_v12 = vmul.f32 %v1261_v60, %v3798_v56  ;;  %v3832_v47 = vpack.c.bf16 %v2069_v19, %v2068_v49  ;;  %v1973_v22 = vsel %vm1909_vm7, %v1941_v6, %v1813_v35  ;;  %v1447_v14 = vmul.f32 2.4433157e-05, %v3367_v53 }
 0x133   : > { %v3836_v3 = vmul.f32 %v3824_v52, %v3824_v52  ;;  %v3838_v2 = vpack.c.bf16 %v1973_v22, %v1972_v20  ;;  %v3843_v54 = vmul.f32 %v1344_v16, %v3727_v13  ;;  %v3846_v5 = vmul.f32 %v1356_v23, %v3745_v33 }
 0x134   : > { %v1325_v40 = vadd.f32 -0.16666655, %v1293_v12  ;;  %v3849_v10 = vand.u32 3, %v3775_v1  ;;  %2747 = vmatpush3.bf16.msra.mxu0 %v3832_v47  ;;  %v1478_v21 = vadd.f32 -0.0013887316, %v1446_v32  ;;  %v750_v26 = vmul.f32 %v3664_v39, %v698_v59 }
 0x135   : > { %v1213_v27 = vmul.f32 -0.00019515296, %v3836_v3  ;;  %2779 = vmatpush3.bf16.msra.mxu1 %v3838_v2  ;;  %v1479_v51 = vadd.f32 -0.0013887316, %v1447_v14  ;;  %v3856_v16 = vmul.f32 %v1346_v31, %v3757_v4  ;;  %v1414_v43 = vadd.f32 %v3425_v0, %v3326_v8 }
 0x136   : > { %v1415_v1 = vadd.f32 %v3443_v18, %v3350_v34  ;;  %v1574_v57 = vmul.f32 %v3341_v46, %v3341_v46  ;;  %v1510_v35 = vmul.f32 %v1478_v21, %v3341_v46  ;;  %v1575_v60 = vmul.f32 %v3367_v53, %v3367_v53 }
 0x137   : > { %v1511_v23 = vmul.f32 %v1479_v51, %v3367_v53  ;;  %v1638_v42 = vmul.f32 0.5, %v3341_v46  ;;  %v3870_v6 = vmul.f32 %v1325_v40, %v3798_v56  ;;  %v1245_v31 = vadd.f32 0.008332161, %v1213_v27 }
 0x138   : > { %v1639_v8 = vmul.f32 0.5, %v3367_v53  ;;  %vm1734_vm8 = vcmp.eq.s32.totalorder %v3306_v44, 1  ;;  %v1542_v34 = vadd.f32 0.041666646, %v1510_v35  ;;  %vm1735_vm9 = vcmp.eq.s32.totalorder %v3359_v36, 1 }
 0x139   : > { %v1543_v0 = vadd.f32 0.041666646, %v1511_v23  ;;  %v3876_v18 = vadd.f32 %v750_v26, %v3767_v45  ;;  %vm1766_vm10 = vcmp.eq.s32.totalorder %v3306_v44, 3  ;;  %vm1767_vm11 = vcmp.eq.s32.totalorder %v3359_v36, 3 }
 0x13a   : > { %v1430_v46 = vmul.f32 2.4433157e-05, %v3572_v41  ;;  %v1431_v49 = vmul.f32 2.4433157e-05, %v3421_v62  ;;  %v1606_v19 = vmul.f32 %v1574_v57, %v1542_v34  ;;  %vm1894_vm12 = vcmp.eq.s32.totalorder %v3306_v44, 2  ;;  %vm3894_vm14 = vmor %vm1734_vm8, %vm1766_vm10 }
 0x13b   : > { %v1607_v12 = vmul.f32 %v1575_v60, %v1543_v0  ;;  %v814_v53 = vmul.f32 0.63661975, %v3876_v18  ;;  %v1277_v20 = vmul.f32 %v1245_v31, %v3836_v3  ;;  %vm1895_vm13 = vcmp.eq.s32.totalorder %v3359_v36, 2  ;;  %vm1799_vm15 = vmor %vm1735_vm9, %vm1767_vm11 }
 0x13c   : > { %v1462_v45 = vadd.f32 -0.0013887316, %v1430_v46  ;;  %v1463_v22 = vadd.f32 -0.0013887316, %v1431_v49  ;;  %v1670_v59 = vsub.f32 %v1606_v19, %v1638_v42  ;;  %v3888_v40 = vadd.f32 %v3681_v37, %v3557_v7  ;;  %vm3914_vm0 = vmor %vm1734_vm8, %vm1894_vm12 }
 0x13d   : > { %v1671_v32 = vsub.f32 %v1607_v12, %v1639_v8  ;;  %v846_v14 = vadd.f32 65536.5, %v814_v53  ;;  %v1399_v21 = vadd.f32 %v3502_v15, %v3411_v58  ;;  %v1558_v57 = vmul.f32 %v3572_v41, %v3572_v41  ;;  %vm2023_vm1 = vmor %vm1735_vm9, %vm1895_vm13 }
 0x13e   : > { %v1494_v51 = vmul.f32 %v1462_v45, %v3572_v41  ;;  %v1495_v26 = vmul.f32 %v1463_v22, %v3421_v62  ;;  %v1702_v7 = vadd.f32 1.0, %v1670_v59  ;;  %v1559_v23 = vmul.f32 %v3421_v62, %v3421_v62  ;;  %vm1926_vm2 = vmor %vm1894_vm12, %vm1766_vm10 }
 0x13f   : > { %v1703_v37 = vadd.f32 1.0, %v1671_v32  ;;  %v2924_v35 = vtrunc.f32 %v846_v14  ;;  %v1622_v42 = vmul.f32 0.5, %v3572_v41  ;;  %v1623_v31 = vmul.f32 0.5, %v3421_v62  ;;  %vm1927_vm3 = vmor %vm1895_vm13, %vm1767_vm11 }
 0x140   : > { %v1526_v15 = vadd.f32 0.041666646, %v1494_v51  ;;  %v1527_v60 = vadd.f32 0.041666646, %v1495_v26  ;;  %v1862_v8 = vsel %vm3894_vm14, %v1414_v43, %v1702_v7  ;;  %v1830_v0 = vsel %vm3894_vm14, %v1702_v7, %v1414_v43  ;;  %v4975_v43 = vld [vmem:[#allocation19_spill] sm:$0xff]  ;;  %v4976_v26 = vld [vmem:[#allocation5_spill] sm:$0xff] }
 0x141   : > { %v1863_v34 = vsel %vm1799_vm15, %v1415_v1, %v1703_v37  ;;  %v1831_v46 = vsel %vm1799_vm15, %v1703_v37, %v1415_v1  ;;  %v2054_v49 = vsub.f32 0.0, %v1862_v8  ;;  %v1958_v62 = vsub.f32 0.0, %v1830_v0 }
 0x142   : > { %v2055_v19 = vsub.f32 0.0, %v1863_v34  ;;  %v1959_v41 = vsub.f32 0.0, %v1831_v46  ;;  %v3936_v12 = vcvt.f32.s32 %v2924_v35  ;;  %v1590_v53 = vmul.f32 %v1558_v57, %v1526_v15  ;;  %v4978_v15 = vld [vmem:[#allocation13_spill] sm:$0xff] }
 0x143   : > { %v1591_v45 = vmul.f32 %v1559_v23, %v1527_v60  ;;  %vm1718_vm4 = vcmp.eq.s32.totalorder %v4975_v43, 1  ;;  %v2086_v1 = vsel %vm3914_vm0, %v2054_v49, %v1862_v8  ;;  %v1990_v59 = vsel %vm1926_vm2, %v1958_v62, %v1830_v0  ;;  %v4977_v23 = vld [vmem:[#allocation11_spill] sm:$0xff] }
 0x144   : > { %v2087_v22 = vsel %vm2023_vm1, %v2055_v19, %v1863_v34  ;;  %v1991_v44 = vsel %vm1927_vm3, %v1959_v41, %v1831_v46  ;;  %v910_v27 = vcvt.s32.f32 %v3936_v12  ;;  %vm1750_vm5 = vcmp.eq.s32.totalorder %v4975_v43, 3 }
 0x145   : > { %v3941_v32 = vpack.c.bf16 %v2087_v22, %v2086_v1  ;;  %v3943_v14 = vpack.c.bf16 %v1991_v44, %v1990_v59  ;;  %v1654_v36 = vsub.f32 %v1590_v53, %v1622_v42  ;;  %v1655_v51 = vsub.f32 %v1591_v45, %v1623_v31  ;;  %vm1782_vm10 = vmor %vm1718_vm4, %vm1750_vm5 }
 0x146   : > { %vm1719_vm6 = vcmp.eq.s32.totalorder %v4976_v26, 1  ;;  %vm1751_vm7 = vcmp.eq.s32.totalorder %v4976_v26, 3  ;;  %v1309_v57 = vadd.f32 -0.16666655, %v1277_v20  ;;  %v2593_v7 = vadd.f32 -65536.0, %v910_v27 }
 0x147   : > { %2749 = vmatprep.subr.bf16.mxu0 %v3941_v32  ;;  %2781 = vmatprep.subr.bf16.mxu1 %v3943_v14  ;;  %vm1878_vm8 = vcmp.eq.s32.totalorder %v4975_v43, 2  ;;  %vm1879_vm9 = vcmp.eq.s32.totalorder %v4976_v26, 2  ;;  %v1686_v37 = vadd.f32 1.0, %v1654_v36  ;;  %v1687_v35 = vadd.f32 1.0, %v1655_v51  ;;  %vm1783_vm11 = vmor %vm1719_vm6, %vm1751_vm7  ;;  %v702_v26 = vpop.permute.xlu1 %701 }
 0x148   : > { %v1448_v58 = vmul.f32 2.4433157e-05, %v4977_v23  ;;  %v1449_v20 = vmul.f32 2.4433157e-05, %v4978_v15  ;;  %v3961_v60 = vmul.f32 %v3870_v6, %v3789_v38  ;;  %v1006_v42 = vmul.f32 1.5703125, %v2593_v7  ;;  %vm2006_vm12 = vmor %vm1718_vm4, %vm1878_vm8 }
 0x149   : > { %v1070_v31 = vmul.f32 0.0004837513, %v2593_v7  ;;  %v1134_v8 = vmul.f32 7.54979e-08, %v2593_v7  ;;  %v1846_v34 = vsel %vm1782_vm10, %v3888_v40, %v1686_v37  ;;  %v1847_v0 = vsel %vm1783_vm11, %v1399_v21, %v1687_v35  ;;  %vm2007_vm13 = vmor %vm1719_vm6, %vm1879_vm9  ;;  %v4981_v7 = vld [vmem:[#allocation9_spill] sm:$0xff] }
 0x14a   : > { %v1814_v46 = vsel %vm1782_vm10, %v1686_v37, %v3888_v40  ;;  %v1815_v6 = vsel %vm1783_vm11, %v1687_v35, %v1399_v21  ;;  %v1038_v49 = vsub.f32 %v3876_v18, %v1006_v42  ;;  %v2038_v19 = vsub.f32 0.0, %v1846_v34  ;;  %vm1910_vm14 = vmor %vm1878_vm8, %vm1750_vm5  ;;  %v4982_v37 = vld [vmem:[#allocation17_spill] sm:$0xff] }
 0x14b   : > { %v2039_v62 = vsub.f32 0.0, %v1847_v0  ;;  %v1942_v41 = vsub.f32 0.0, %v1814_v46  ;;  %v1341_v53 = vmul.f32 %v1309_v57, %v3836_v3  ;;  %v1943_v45 = vsub.f32 0.0, %v1815_v6  ;;  %vm1911_vm15 = vmor %vm1879_vm9, %vm1751_vm7 }
 0x14c   : > { %v1480_v40 = vadd.f32 -0.0013887316, %v1448_v58  ;;  %v1481_v21 = vadd.f32 -0.0013887316, %v1449_v20  ;;  %v1102_v1 = vsub.f32 %v1038_v49, %v1070_v31  ;;  %v2070_v18 = vsel %vm2006_vm12, %v2038_v19, %v1846_v34  ;;  %v4983_v58 = vld [vmem:[#allocation12_spill] sm:$0xff]  ;;  %v4984_v20 = vld [vmem:[#allocation23_spill] sm:$0xff] }
 0x14d   : > { %v2071_v22 = vsel %vm2007_vm13, %v2039_v62, %v1847_v0  ;;  %v1974_v59 = vsel %vm1910_vm14, %v1942_v41, %v1814_v46  ;;  %v1975_v27 = vsel %vm1911_vm15, %v1943_v45, %v1815_v6  ;;  %v1416_v35 = vadd.f32 %v4982_v37, %v4981_v7  ;;  %v4985_v19 = vld [vmem:[#allocation7_spill] sm:$0xff]  ;;  %v4986_v45 = vld [vmem:[#allocation10_spill] sm:$0xff] }
 0x14e   : > { %v3987_v44 = vpack.c.bf16 %v2071_v22, %v2070_v18  ;;  %v1512_v36 = vmul.f32 %v1480_v40, %v4977_v23  ;;  %v1513_v43 = vmul.f32 %v1481_v21, %v4978_v15  ;;  %v3991_v51 = vsub.f32 %v1102_v1, %v1134_v8  ;;  %v4987_v22 = vld [vmem:[#allocation4_spill] sm:$0xff] }
 0x14f   : > { %v3993_v57 = vpack.c.bf16 %v1975_v27, %v1974_v59  ;;  %v1417_v42 = vadd.f32 %v4984_v20, %v4983_v58  ;;  %v1576_v0 = vmul.f32 %v4977_v23, %v4977_v23  ;;  %v1577_v8 = vmul.f32 %v4978_v15, %v4978_v15  ;;  %v4988_v59 = vld [vmem:[#allocation16_spill] sm:$0xff] }
 0x150   : > { %4979 = vst [vmem:[#allocation19_spill] sm:$0xff] %v3987_v44  ;;  %2751 = vmatpush3.bf16.msra.mxu0 %v3987_v44  ;;  %v1544_v31 = vadd.f32 0.041666646, %v1512_v36  ;;  %v1545_v34 = vadd.f32 0.041666646, %v1513_v43  ;;  %v4006_v46 = vmul.f32 %v3991_v51, %v3991_v51  ;;  %v1640_v6 = vmul.f32 0.5, %v4977_v23 }
 0x151   : > { %4980 = vst [vmem:[#allocation5_spill] sm:$0xff] %v3993_v57  ;;  %2783 = vmatpush3.bf16.msra.mxu1 %v3993_v57  ;;  %v1641_v49 = vmul.f32 0.5, %v4978_v15  ;;  %vm1736_vm0 = vcmp.eq.s32.totalorder %v4985_v19, 1  ;;  %vm1737_vm1 = vcmp.eq.s32.totalorder %v4986_v45, 1  ;;  %v751_v40 = vmul.f32 %v3664_v39, %v702_v26  ;;  %v4999_v57 = vld [vmem:[#allocation20_spill] sm:$0xff] }
 0x152   : > { %v1608_v62 = vmul.f32 %v1576_v0, %v1544_v31  ;;  %v1609_v41 = vmul.f32 %v1577_v8, %v1545_v34  ;;  %v1230_v21 = vmul.f32 -0.00019515296, %v4006_v46  ;;  %vm1768_vm2 = vcmp.eq.s32.totalorder %v4985_v19, 3 }
 0x153   : > { %vm1769_vm3 = vcmp.eq.s32.totalorder %v4986_v45, 3  ;;  %v1432_v1 = vmul.f32 2.4433157e-05, %v3618_v17  ;;  %v4019_v15 = vadd.f32 %v751_v40, %v4987_v22  ;;  %v1433_v27 = vmul.f32 2.4433157e-05, %v4988_v59  ;;  %vm1800_vm6 = vmor %vm1736_vm0, %vm1768_vm2 }
 0x154   : > { %v1672_v18 = vsub.f32 %v1608_v62, %v1640_v6  ;;  %v1673_v23 = vsub.f32 %v1609_v41, %v1641_v49  ;;  %v1262_v36 = vadd.f32 0.008332161, %v1230_v21  ;;  %vm1896_vm4 = vcmp.eq.s32.totalorder %v4985_v19, 2  ;;  %vm1801_vm7 = vmor %vm1737_vm1, %vm1769_vm3 }
 0x155   : > { %vm1897_vm5 = vcmp.eq.s32.totalorder %v4986_v45, 2  ;;  %v1464_v43 = vadd.f32 -0.0013887316, %v1432_v1  ;;  %v815_v58 = vmul.f32 0.63661975, %v4019_v15  ;;  %v4030_v26 = vmul.f32 %v1341_v53, %v3824_v52  ;;  %vm2024_vm8 = vmor %vm1736_vm0, %vm1896_vm4 }
 0x156   : > { %v1704_v7 = vadd.f32 1.0, %v1672_v18  ;;  %v1705_v37 = vadd.f32 1.0, %v1673_v23  ;;  %v1465_v20 = vadd.f32 -0.0013887316, %v1433_v27  ;;  %v4033_v31 = vand.u32 3, %v3936_v12  ;;  %vm2025_vm9 = vmor %vm1737_vm1, %vm1897_vm5 }
 0x157   : > { %v1496_v34 = vmul.f32 %v1464_v43, %v3618_v17  ;;  %v1560_v0 = vmul.f32 %v3618_v17, %v3618_v17  ;;  %v1294_v49 = vmul.f32 %v1262_v36, %v4006_v46  ;;  %vm1928_vm10 = vmor %vm1896_vm4, %vm1768_vm2  ;;  %v847_v1 = vadd.f32 65536.5, %v815_v58 }
 0x158   : > { %v1864_v8 = vsel %vm1800_vm6, %v1416_v35, %v1704_v7  ;;  %v1865_v6 = vsel %vm1801_vm7, %v1417_v42, %v1705_v37  ;;  %v1832_v53 = vsel %vm1800_vm6, %v1704_v7, %v1416_v35  ;;  %v1833_v12 = vsel %vm1801_vm7, %v1705_v37, %v1417_v42  ;;  %vm1929_vm11 = vmor %vm1897_vm5, %vm1769_vm3 }
 0x159   : > { %v2056_v62 = vsub.f32 0.0, %v1864_v8  ;;  %v2057_v41 = vsub.f32 0.0, %v1865_v6  ;;  %v1960_v40 = vsub.f32 0.0, %v1832_v53  ;;  %v1961_v21 = vsub.f32 0.0, %v1833_v12 }
 0x15a   : > { %v1497_v35 = vmul.f32 %v1465_v20, %v4988_v59  ;;  %v1528_v42 = vadd.f32 0.041666646, %v1496_v34  ;;  %v1561_v27 = vmul.f32 %v4988_v59, %v4988_v59  ;;  %v2926_v43 = vtrunc.f32 %v847_v1  ;;  %v4996_v1 = vld [vmem:[#allocation22_spill] sm:$0xff] }
 0x15b   : > { %v2088_v18 = vsel %vm2024_vm8, %v2056_v62, %v1864_v8  ;;  %v2089_v23 = vsel %vm2025_vm9, %v2057_v41, %v1865_v6  ;;  %v1992_v22 = vsel %vm1928_vm10, %v1960_v40, %v1832_v53  ;;  %v1993_v19 = vsel %vm1929_vm11, %v1961_v21, %v1833_v12  ;;  %v4991_v12 = vld [vmem:[#allocation14_spill] sm:$0xff]  ;;  %v4992_v62 = vld [vmem:[#allocation25_spill] sm:$0xff] }
 0x15c   : > { %v4062_v36 = vpack.c.bf16 %v2089_v23, %v2088_v18  ;;  %v1529_v7 = vadd.f32 0.041666646, %v1497_v35  ;;  %v4064_v37 = vpack.c.bf16 %v1993_v19, %v1992_v22  ;;  %v1400_v58 = vadd.f32 %v3714_v25, %v3608_v11  ;;  %v4993_v21 = vld [vmem:[#allocation26_spill] sm:$0xff]  ;;  %v4994_v25 = vld [vmem:[#allocation15_spill] sm:$0xff] }
 0x15d   : > { %v1592_v20 = vmul.f32 %v1560_v0, %v1528_v42  ;;  %v1624_v34 = vmul.f32 0.5, %v3618_v17  ;;  %v1326_v8 = vadd.f32 -0.16666655, %v1294_v49  ;;  %v4070_v45 = vcvt.f32.s32 %v2926_v43 }
 0x15e   : > { %4989 = vst [vmem:[#allocation11_spill] sm:$0xff] %v4062_v36  ;;  %4990 = vst [vmem:[#allocation13_spill] sm:$0xff] %v4064_v37  ;;  %2753 = vmatprep.subr.bf16.mxu0 %v4062_v36  ;;  %v1593_v6 = vmul.f32 %v1561_v27, %v1529_v7  ;;  %v1625_v53 = vmul.f32 0.5, %v4988_v59  ;;  %2785 = vmatprep.subr.bf16.mxu1 %v4064_v37  ;;  %v1401_v41 = vadd.f32 %v4992_v62, %v4991_v12  ;;  %v4995_v59 = vld [vmem:[#allocation21_spill] sm:$0xff]  ;;  %v454_v7 = vpop.permute.xlu1 %453 }
 0x15f   : > { %v1656_v40 = vsub.f32 %v1592_v20, %v1624_v34  ;;  %vm1720_vm12 = vcmp.eq.s32.totalorder %v4993_v21, 1  ;;  %vm1752_vm13 = vcmp.eq.s32.totalorder %v4993_v21, 3  ;;  %v911_v11 = vcvt.s32.f32 %v4070_v45 }
 0x160   : > { %v1657_v17 = vsub.f32 %v1593_v6, %v1625_v53  ;;  %vm1721_vm14 = vcmp.eq.s32.totalorder %v4994_v25, 1  ;;  %vm1753_vm15 = vcmp.eq.s32.totalorder %v4994_v25, 3  ;;  %vm1880_vm0 = vcmp.eq.s32.totalorder %v4993_v21, 2  ;;  %vm1784_vm1 = vmor %vm1720_vm12, %vm1752_vm13 }
 0x161   : > { %v1688_v0 = vadd.f32 1.0, %v1656_v40  ;;  %v1450_v49 = vmul.f32 2.4433157e-05, %v4995_v59  ;;  %v1451_v35 = vmul.f32 2.4433157e-05, %v4996_v1  ;;  %v1358_v42 = vmul.f32 %v1326_v8, %v4006_v46  ;;  %vm1785_vm3 = vmor %vm1721_vm14, %vm1753_vm15 }
 0x162   : > { %v2594_v18 = vadd.f32 -65536.0, %v911_v11  ;;  %v1689_v23 = vadd.f32 1.0, %v1657_v17  ;;  %vm1881_vm2 = vcmp.eq.s32.totalorder %v4994_v25, 2  ;;  %vm2008_vm4 = vmor %vm1720_vm12, %vm1880_vm0  ;;  %v1578_v6 = vmul.f32 %v4995_v59, %v4995_v59 }
 0x163   : > { %v1848_v22 = vsel %vm1784_vm1, %v1400_v58, %v1688_v0  ;;  %v1816_v27 = vsel %vm1784_vm1, %v1688_v0, %v1400_v58  ;;  %v1482_v19 = vadd.f32 -0.0013887316, %v1450_v49  ;;  %v1483_v43 = vadd.f32 -0.0013887316, %v1451_v35  ;;  %vm2009_vm5 = vmor %vm1721_vm14, %vm1881_vm2 }
 0x164   : > { %v1007_v20 = vmul.f32 1.5703125, %v2594_v18  ;;  %v1071_v34 = vmul.f32 0.0004837513, %v2594_v18  ;;  %v1849_v8 = vsel %vm1785_vm3, %v1401_v41, %v1689_v23  ;;  %v2040_v58 = vsub.f32 0.0, %v1848_v22  ;;  %vm1912_vm6 = vmor %vm1880_vm0, %vm1752_vm13 }
 0x165   : > { %v2041_v53 = vsub.f32 0.0, %v1849_v8  ;;  %v1817_v12 = vsel %vm1785_vm3, %v1689_v23, %v1401_v41  ;;  %v1944_v62 = vsub.f32 0.0, %v1816_v27  ;;  %v1514_v17 = vmul.f32 %v1482_v19, %v4995_v59  ;;  %vm1913_vm7 = vmor %vm1881_vm2, %vm1753_vm15  ;;  %v5000_v19 = vld [vmem:[#allocation30_spill] sm:$0xff] }
 0x166   : > { %v1039_v40 = vsub.f32 %v4019_v15, %v1007_v20  ;;  %v1945_v11 = vsub.f32 0.0, %v1817_v12  ;;  %v1515_v0 = vmul.f32 %v1483_v43, %v4996_v1  ;;  %v1135_v49 = vmul.f32 7.54979e-08, %v2594_v18 }
 0x167   : > { %v2072_v35 = vsel %vm2008_vm4, %v2040_v58, %v1848_v22  ;;  %v2073_v37 = vsel %vm2009_vm5, %v2041_v53, %v1849_v8  ;;  %v1976_v41 = vsel %vm1912_vm6, %v1944_v62, %v1816_v27  ;;  %v1546_v21 = vadd.f32 0.041666646, %v1514_v17  ;;  %v4123_v22 = vpop.permute.xlu1 %637  ;;  %v5001_v58 = vld [vmem:[#allocation18_spill] sm:$0xff]  ;;  %v5002_v62 = vld [vmem:[#allocation24_spill] sm:$0xff]  ;;  %v5003_v17 = vld [vmem:[#allocation41_spill] sm:$0xff] }
 0x168   : > { %v1103_v15 = vsub.f32 %v1039_v40, %v1071_v34  ;;  %v4115_v23 = vpack.c.bf16 %v2073_v37, %v2072_v35  ;;  %v1977_v20 = vsel %vm1913_vm7, %v1945_v11, %v1817_v12  ;;  %v1418_v44 = vadd.f32 %v5000_v19, %v4999_v57 }
 0x169   : > { %v4117_v36 = vpack.c.bf16 %v1977_v20, %v1976_v41  ;;  %v1547_v43 = vadd.f32 0.041666646, %v1515_v0  ;;  %v1579_v18 = vmul.f32 %v4996_v1, %v4996_v1  ;;  %v1419_v37 = vadd.f32 %v3688_v48, %v3579_v50  ;;  %v5004_v20 = vld [vmem:[#allocation29_spill] sm:$0xff] }
 0x16a   : > { %4997 = vst [vmem:[#allocation9_spill] sm:$0xff] %v4115_v23  ;;  %v4125_v8 = vsub.f32 %v1103_v15, %v1135_v49  ;;  %2755 = vmatpush3.bf16.msra.mxu0 %v4115_v23  ;;  %v1610_v25 = vmul.f32 %v1578_v6, %v1546_v21  ;;  %v1642_v27 = vmul.f32 0.5, %v4995_v59  ;;  %v1643_v57 = vmul.f32 0.5, %v4996_v1  ;;  %v5005_v21 = vld [vmem:[#allocation38_spill] sm:$0xff]  ;;  %v5008_v23 = vld [vmem:[#allocation27_spill] sm:$0xff] }
 0x16b   : > { %4998 = vst [vmem:[#allocation17_spill] sm:$0xff] %v4117_v36  ;;  %2787 = vmatpush3.bf16.msra.mxu1 %v4117_v36  ;;  %v1611_v34 = vmul.f32 %v1579_v18, %v1547_v43  ;;  %vm1738_vm8 = vcmp.eq.s32.totalorder %v5001_v58, 1  ;;  %vm1770_vm9 = vcmp.eq.s32.totalorder %v5001_v58, 3  ;;  %vm1739_vm10 = vcmp.eq.s32.totalorder %v5002_v62, 1 }
 0x16c   : > { %v4137_v53 = vmul.f32 %v4125_v8, %v4125_v8  ;;  %v1674_v12 = vsub.f32 %v1610_v25, %v1642_v27  ;;  %vm1771_vm11 = vcmp.eq.s32.totalorder %v5002_v62, 3  ;;  %vm1898_vm12 = vcmp.eq.s32.totalorder %v5001_v58, 2  ;;  %vm1802_vm13 = vmor %vm1738_vm8, %vm1770_vm9 }
 0x16d   : > { %v1675_v50 = vsub.f32 %v1611_v34, %v1643_v57  ;;  %v1434_v48 = vmul.f32 2.4433157e-05, %v3655_v28  ;;  %v1435_v59 = vmul.f32 2.4433157e-05, %v3693_v63  ;;  %v4145_v1 = vmul.f32 %v1358_v42, %v3991_v51  ;;  %vm1803_vm15 = vmor %vm1739_vm10, %vm1771_vm11  ;;  %v5007_v57 = vld [vmem:[#allocation43_spill] sm:$0xff] }
 0x16e   : > { %v4148_v6 = vand.u32 3, %v4070_v45  ;;  %v1706_v40 = vadd.f32 1.0, %v1674_v12  ;;  %vm1899_vm14 = vcmp.eq.s32.totalorder %v5002_v62, 2  ;;  %v571_v42 = vmul.f32 %v5003_v17, %v454_v7  ;;  %v539_v45 = vpop.permute.xlu1 %538  ;;  %vm2026_vm0 = vmor %vm1738_vm8, %vm1898_vm12 }
 0x16f   : > { %v1707_v11 = vadd.f32 1.0, %v1675_v50  ;;  %v1466_v0 = vadd.f32 -0.0013887316, %v1434_v48  ;;  %v1467_v49 = vadd.f32 -0.0013887316, %v1435_v59  ;;  %v1402_v19 = vadd.f32 %v5005_v21, %v5004_v20  ;;  %vm2027_vm1 = vmor %vm1739_vm10, %vm1899_vm14 }
 0x170   : > { %v1231_v35 = vmul.f32 -0.00019515296, %v4137_v53  ;;  %v1866_v41 = vsel %vm1802_vm13, %v1418_v44, %v1706_v40  ;;  %v1834_v15 = vsel %vm1802_vm13, %v1706_v40, %v1418_v44  ;;  %vm1930_vm2 = vmor %vm1898_vm12, %vm1770_vm9  ;;  %v5006_v44 = vld [vmem:[#allocation33_spill] sm:$0xff]  ;;  %v1562_v59 = vmul.f32 %v3655_v28, %v3655_v28 }
 0x171   : > { %v1867_v43 = vsel %vm1803_vm15, %v1419_v37, %v1707_v11  ;;  %v2058_v7 = vsub.f32 0.0, %v1866_v41  ;;  %v1835_v18 = vsel %vm1803_vm15, %v1707_v11, %v1419_v37  ;;  %v1962_v25 = vsub.f32 0.0, %v1834_v15  ;;  %vm1931_vm3 = vmor %vm1899_vm14, %vm1771_vm11 }
 0x172   : > { %v2059_v27 = vsub.f32 0.0, %v1867_v43  ;;  %v1963_v34 = vsub.f32 0.0, %v1835_v18  ;;  %v1403_v12 = vadd.f32 %v5007_v57, %v5006_v44  ;;  %v1498_v50 = vmul.f32 %v1466_v0, %v3655_v28  ;;  %v706_v62 = vpop.permute.xlu1 %705 }
 0x173   : > { %v2090_v48 = vsel %vm2026_vm0, %v2058_v7, %v1866_v41  ;;  %v1499_v37 = vmul.f32 %v1467_v49, %v3693_v63  ;;  %v1563_v58 = vmul.f32 %v3693_v63, %v3693_v63  ;;  %v1994_v11 = vsel %vm1930_vm2, %v1962_v25, %v1834_v15 }
 0x174   : > { %v2091_v40 = vsel %vm2027_vm1, %v2059_v27, %v1867_v43  ;;  %v1995_v20 = vsel %vm1931_vm3, %v1963_v34, %v1835_v18  ;;  %v1530_v21 = vadd.f32 0.041666646, %v1498_v50  ;;  %v1263_v44 = vadd.f32 0.008332161, %v1231_v35  ;;  %v5009_v43 = vld [vmem:[#allocation35_spill] sm:$0xff] }
 0x175   : > { %v4187_v0 = vpack.c.bf16 %v2091_v40, %v2090_v48  ;;  %v4189_v41 = vpack.c.bf16 %v1995_v20, %v1994_v11  ;;  %v1531_v7 = vadd.f32 0.041666646, %v1499_v37  ;;  %v1626_v49 = vmul.f32 0.5, %v3655_v28 }
 0x176   : > { %v1594_v57 = vmul.f32 %v1562_v59, %v1530_v21  ;;  %v1627_v36 = vmul.f32 0.5, %v3693_v63  ;;  %vm1722_vm4 = vcmp.eq.s32.totalorder %v5008_v23, 1  ;;  %vm1723_vm5 = vcmp.eq.s32.totalorder %v5009_v43, 1 }
 0x177   : > { %2757 = vmatprep.subr.bf16.mxu0 %v4187_v0  ;;  %2789 = vmatprep.subr.bf16.mxu1 %v4189_v41  ;;  %v1595_v15 = vmul.f32 %v1563_v58, %v1531_v7  ;;  %vm1754_vm6 = vcmp.eq.s32.totalorder %v5008_v23, 3  ;;  %v735_v35 = vmul.f32 %v3664_v39, %v4123_v22  ;;  %vm1755_vm7 = vcmp.eq.s32.totalorder %v5009_v43, 3 }
 0x178   : > { %v1658_v18 = vsub.f32 %v1594_v57, %v1626_v49  ;;  %v588_v28 = vmul.f32 %v5003_v17, %v539_v45  ;;  %v752_v63 = vmul.f32 %v3664_v39, %v706_v62  ;;  %v1295_v25 = vmul.f32 %v1263_v44, %v4137_v53  ;;  %vm1786_vm9 = vmor %vm1722_vm4, %vm1754_vm6 }
 0x179   : > { %v1659_v27 = vsub.f32 %v1595_v15, %v1627_v36  ;;  %vm1882_vm8 = vcmp.eq.s32.totalorder %v5008_v23, 2  ;;  %v4205_v34 = vadd.f32 %v735_v35, %v571_v42  ;;  %vm1883_vm10 = vcmp.eq.s32.totalorder %v5009_v43, 2  ;;  %vm1787_vm11 = vmor %vm1723_vm5, %vm1755_vm7 }
 0x17a   : > { %v1690_v50 = vadd.f32 1.0, %v1658_v18  ;;  %v4212_v22 = vadd.f32 %v752_v63, %v588_v28  ;;  %v1452_v17 = vmul.f32 2.4433157e-05, %v3753_v55  ;;  %v1453_v42 = vmul.f32 2.4433157e-05, %v3798_v56  ;;  %vm2010_vm12 = vmor %vm1722_vm4, %vm1882_vm8 }
 0x17b   : > { %v1691_v39 = vadd.f32 1.0, %v1659_v27  ;;  %v799_v36 = vmul.f32 0.63661975, %v4205_v34  ;;  %v1580_v45 = vmul.f32 %v3753_v55, %v3753_v55  ;;  %vm2011_vm13 = vmor %vm1723_vm5, %vm1883_vm10  ;;  %v710_v27 = vpop.permute.xlu1 %709  ;;  %vm1741_vm2 = vcmp.eq.s32.totalorder %v3794_v61, 1 }
 0x17c   : > { %v1850_v48 = vsel %vm1786_vm9, %v1402_v19, %v1690_v50  ;;  %v1818_v37 = vsel %vm1786_vm9, %v1690_v50, %v1402_v19  ;;  %v816_v59 = vmul.f32 0.63661975, %v4212_v22  ;;  %v1484_v58 = vadd.f32 -0.0013887316, %v1452_v17  ;;  %vm1914_vm14 = vmor %vm1882_vm8, %vm1754_vm6 }
 0x17d   : > { %v1851_v40 = vsel %vm1787_vm11, %v1403_v12, %v1691_v39  ;;  %v2042_v11 = vsub.f32 0.0, %v1850_v48  ;;  %v1819_v20 = vsel %vm1787_vm11, %v1691_v39, %v1403_v12  ;;  %v1946_v21 = vsub.f32 0.0, %v1818_v37  ;;  %vm1915_vm15 = vmor %vm1883_vm10, %vm1755_vm7 }
 0x17e   : > { %v2043_v44 = vsub.f32 0.0, %v1851_v40  ;;  %v1947_v7 = vsub.f32 0.0, %v1819_v20  ;;  %v831_v19 = vadd.f32 65536.5, %v799_v36  ;;  %v848_v62 = vadd.f32 65536.5, %v816_v59 }
 0x17f   : > { %v2074_v57 = vsel %vm2010_vm12, %v2042_v11, %v1850_v48  ;;  %v1978_v49 = vsel %vm1914_vm14, %v1946_v21, %v1818_v37  ;;  %v1485_v15 = vadd.f32 -0.0013887316, %v1453_v42  ;;  %v1516_v12 = vmul.f32 %v1484_v58, %v3753_v55 }
 0x180   : > { %v2075_v35 = vsel %vm2011_vm13, %v2043_v44, %v1851_v40  ;;  %v1979_v18 = vsel %vm1915_vm15, %v1947_v7, %v1819_v20  ;;  %v2894_v28 = vtrunc.f32 %v831_v19  ;;  %v2928_v63 = vtrunc.f32 %v848_v62  ;;  %v5010_v44 = vld [vmem:[#allocation40_spill] sm:$0xff] }
 0x181   : > { %v4241_v23 = vpack.c.bf16 %v2075_v35, %v2074_v57  ;;  %v4243_v50 = vpack.c.bf16 %v1979_v18, %v1978_v49  ;;  %v1517_v17 = vmul.f32 %v1485_v15, %v3798_v56  ;;  %v1548_v39 = vadd.f32 0.041666646, %v1516_v12 }
 0x182   : > { %v1327_v36 = vadd.f32 -0.16666655, %v1295_v25  ;;  %v4246_v48 = vcvt.f32.s32 %v2894_v28  ;;  %v4248_v43 = vcvt.f32.s32 %v2928_v63  ;;  %v1420_v42 = vadd.f32 %v3846_v5, %v3745_v33 }
 0x183   : > { %2759 = vmatpush3.bf16.msra.mxu0 %v4241_v23  ;;  %2791 = vmatpush3.bf16.msra.mxu1 %v4243_v50  ;;  %v1549_v37 = vadd.f32 0.041666646, %v1517_v17  ;;  %v1581_v59 = vmul.f32 %v3798_v56, %v3798_v56  ;;  %v1612_v58 = vmul.f32 %v1580_v45, %v1548_v39  ;;  %v1644_v40 = vmul.f32 0.5, %v3753_v55  ;;  %v464_v55 = vpop.permute.xlu1 %463 }
 0x184   : > { %v895_v25 = vcvt.s32.f32 %v4246_v48  ;;  %v912_v11 = vcvt.s32.f32 %v4248_v43  ;;  %v1421_v20 = vadd.f32 %v3961_v60, %v3789_v38  ;;  %v1645_v33 = vmul.f32 0.5, %v3798_v56  ;;  %v4268_v38 = vld [vmem:[%s3200_s18 + $0x1] ss:$0 sm:$0xff] }
 0x185   : > { %v1613_v5 = vmul.f32 %v1581_v59, %v1549_v37  ;;  %v1676_v21 = vsub.f32 %v1612_v58, %v1644_v40  ;;  %vm1740_vm0 = vcmp.eq.s32.totalorder %v5010_v44, 1  ;;  %vm1772_vm1 = vcmp.eq.s32.totalorder %v5010_v44, 3  ;;  %v5011_v58 = vld [vmem:[#allocation6_spill] sm:$0xff] }
 0x186   : > { %v2578_v7 = vadd.f32 -65536.0, %v895_v25  ;;  %v2595_v45 = vadd.f32 -65536.0, %v912_v11  ;;  %vm1773_vm3 = vcmp.eq.s32.totalorder %v3794_v61, 3  ;;  %vm1900_vm4 = vcmp.eq.s32.totalorder %v5010_v44, 2  ;;  %vm1804_vm5 = vmor %vm1740_vm0, %vm1772_vm1 }
 0x187   : > { %v1677_v19 = vsub.f32 %v1613_v5, %v1645_v33  ;;  %v1708_v62 = vadd.f32 1.0, %v1676_v21  ;;  %v753_v56 = vmul.f32 %v4268_v38, %v710_v27  ;;  %vm1901_vm6 = vcmp.eq.s32.totalorder %v3794_v61, 2  ;;  %vm1805_vm7 = vmor %vm1741_vm2, %vm1773_vm3  ;;  %v646_v11 = vpop.permute.xlu1 %645 }
 0x188   : > { %v991_v60 = vmul.f32 1.5703125, %v2578_v7  ;;  %v1055_v57 = vmul.f32 0.0004837513, %v2578_v7  ;;  %v1008_v49 = vmul.f32 1.5703125, %v2595_v45  ;;  %v1119_v15 = vmul.f32 7.54979e-08, %v2578_v7  ;;  %vm2028_vm8 = vmor %vm1740_vm0, %vm1900_vm4 }
 0x189   : > { %v1072_v12 = vmul.f32 0.0004837513, %v2595_v45  ;;  %v1709_v35 = vadd.f32 1.0, %v1677_v19  ;;  %v1868_v18 = vsel %vm1804_vm5, %v1420_v42, %v1708_v62  ;;  %v1836_v17 = vsel %vm1804_vm5, %v1708_v62, %v1420_v42  ;;  %vm2029_vm9 = vmor %vm1741_vm2, %vm1901_vm6 }
 0x18a   : > { %v1023_v28 = vsub.f32 %v4205_v34, %v991_v60  ;;  %v1040_v63 = vsub.f32 %v4212_v22, %v1008_v49  ;;  %v2060_v27 = vsub.f32 0.0, %v1868_v18  ;;  %v1964_v59 = vsub.f32 0.0, %v1836_v17  ;;  %vm1932_vm10 = vmor %vm1900_vm4, %vm1772_vm1  ;;  %v5012_v60 = vld [vmem:[#allocation32_spill] sm:$0xff] }
 0x18b   : > { %v1869_v39 = vsel %vm1805_vm7, %v1421_v20, %v1709_v35  ;;  %v1837_v37 = vsel %vm1805_vm7, %v1709_v35, %v1421_v20  ;;  %v4287_v40 = vadd.f32 %v753_v56, %v5011_v58  ;;  %v1136_v25 = vmul.f32 7.54979e-08, %v2595_v45  ;;  %vm1933_vm11 = vmor %vm1901_vm6, %vm1773_vm3 }
 0x18c   : > { %v1087_v34 = vsub.f32 %v1023_v28, %v1055_v57  ;;  %v1104_v22 = vsub.f32 %v1040_v63, %v1072_v12  ;;  %v2061_v42 = vsub.f32 0.0, %v1869_v39  ;;  %v1359_v33 = vmul.f32 %v1327_v36, %v4137_v53  ;;  %v4326_v28 = vld [vmem:[%s3200_s18] ss:$0 sm:$0xff]  ;;  %s347_s18 = scalar_lea.vmem %s4875_s4, %s5044_s21  ;;  %s361_s21 = scalar_lea.vmem %s4877_s6, %s2563_s19 }
 0x18d   : > { %v2092_v5 = vsel %vm2028_vm8, %v2060_v27, %v1868_v18  ;;  %v1965_v20 = vsub.f32 0.0, %v1837_v37  ;;  %v817_v21 = vmul.f32 0.63661975, %v4287_v40  ;;  %v1996_v36 = vsel %vm1932_vm10, %v1964_v59, %v1836_v17  ;;  %v5015_v59 = vld [vmem:[#allocation39_spill] sm:$0xff] }
 0x18e   : > { %v4299_v7 = vsub.f32 %v1087_v34, %v1119_v15  ;;  %v4301_v45 = vsub.f32 %v1104_v22, %v1136_v25  ;;  %v2093_v19 = vsel %vm2029_vm9, %v2061_v42, %v1869_v39  ;;  %v1436_v57 = vmul.f32 2.4433157e-05, %v5012_v60  ;;  %v549_v22 = vpop.permute.xlu1 %548 }
 0x18f   : > { %v4307_v62 = vpack.c.bf16 %v2093_v19, %v2092_v5  ;;  %v1997_v56 = vsel %vm1933_vm11, %v1965_v20, %v1837_v37  ;;  %v849_v44 = vadd.f32 65536.5, %v817_v21  ;;  %v1437_v61 = vmul.f32 2.4433157e-05, %v3836_v3  ;;  %v5014_v37 = vld [vmem:[#allocation31_spill] sm:$0xff] }
 0x190   : > { %v4312_v49 = vmul.f32 %v4299_v7, %v4299_v7  ;;  %v4316_v15 = vmul.f32 %v4301_v45, %v4301_v45  ;;  %v4318_v12 = vpack.c.bf16 %v1997_v56, %v1996_v36  ;;  %v4322_v35 = vmul.f32 %v1359_v33, %v4125_v8 }
 0x191   : > { %2761 = vmatprep.subr.bf16.mxu0 %v4307_v62  ;;  %v2930_v18 = vtrunc.f32 %v849_v44  ;;  %v573_v63 = vmul.f32 %v4326_v28, %v464_v55  ;;  %v1468_v27 = vadd.f32 -0.0013887316, %v1436_v57  ;;  %v1404_v58 = vadd.f32 %v5015_v59, %v5014_v37 }
 0x192   : > { %5013 = vst [vmem:[#allocation12_spill] sm:$0xff] %v4318_v12  ;;  %v1215_v17 = vmul.f32 -0.00019515296, %v4312_v49  ;;  %v1232_v39 = vmul.f32 -0.00019515296, %v4316_v15  ;;  %2793 = vmatprep.subr.bf16.mxu1 %v4318_v12  ;;  %v1405_v42 = vadd.f32 %v4030_v26, %v3824_v52  ;;  %v1564_v55 = vmul.f32 %v5012_v60, %v5012_v60 }
 0x193   : > { %v1469_v34 = vadd.f32 -0.0013887316, %v1437_v61  ;;  %v4334_v25 = vcvt.f32.s32 %v2930_v18  ;;  %v1500_v33 = vmul.f32 %v1468_v27, %v5012_v60  ;;  %v1565_v19 = vmul.f32 %v3836_v3, %v3836_v3 }
 0x194   : > { %v1247_v5 = vadd.f32 0.008332161, %v1215_v17  ;;  %v1264_v20 = vadd.f32 0.008332161, %v1232_v39  ;;  %v1628_v44 = vmul.f32 0.5, %v5012_v60  ;;  %v737_v57 = vmul.f32 %v4268_v38, %v646_v11  ;;  %v5016_v39 = vld [vmem:[#allocation28_spill] sm:$0xff]  ;;  %v714_v11 = vpop.permute.xlu1 %713 }
 0x195   : > { %v1501_v21 = vmul.f32 %v1469_v34, %v3836_v3  ;;  %v913_v36 = vcvt.s32.f32 %v4334_v25  ;;  %v1532_v56 = vadd.f32 0.041666646, %v1500_v33  ;;  %v1629_v18 = vmul.f32 0.5, %v3836_v3 }
 0x196   : > { %v1279_v52 = vmul.f32 %v1247_v5, %v4312_v49  ;;  %v1296_v26 = vmul.f32 %v1264_v20, %v4316_v15  ;;  %vm1724_vm12 = vcmp.eq.s32.totalorder %v5016_v39, 1  ;;  %vm1725_vm13 = vcmp.eq.s32.totalorder %v3849_v10, 1 }
 0x197   : > { %v1533_v61 = vadd.f32 0.041666646, %v1501_v21  ;;  %v2596_v27 = vadd.f32 -65536.0, %v913_v36  ;;  %v1596_v17 = vmul.f32 %v1564_v55, %v1532_v56  ;;  %vm1756_vm14 = vcmp.eq.s32.totalorder %v5016_v39, 3 }
 0x198   : > { %v1311_v37 = vadd.f32 -0.16666655, %v1279_v52  ;;  %vm1757_vm15 = vcmp.eq.s32.totalorder %v3849_v10, 3  ;;  %v1328_v60 = vadd.f32 -0.16666655, %v1296_v26  ;;  %vm1884_vm0 = vcmp.eq.s32.totalorder %v5016_v39, 2  ;;  %vm1788_vm2 = vmor %vm1724_vm12, %vm1756_vm14 }
 0x199   : > { %v1597_v59 = vmul.f32 %v1565_v19, %v1533_v61  ;;  %v1009_v34 = vmul.f32 1.5703125, %v2596_v27  ;;  %v1660_v33 = vsub.f32 %v1596_v17, %v1628_v44  ;;  %v1073_v5 = vmul.f32 0.0004837513, %v2596_v27  ;;  %vm1789_vm3 = vmor %vm1725_vm13, %vm1757_vm15 }
 0x19a   : > { %vm1885_vm1 = vcmp.eq.s32.totalorder %v3849_v10, 2  ;;  %v4356_v55 = vadd.f32 %v737_v57, %v573_v63  ;;  %v590_v19 = vmul.f32 %v4326_v28, %v549_v22  ;;  %v754_v36 = vmul.f32 %v4268_v38, %v714_v11  ;;  %vm2012_vm4 = vmor %vm1724_vm12, %vm1884_vm0 }
 0x19b   : > { %v1661_v3 = vsub.f32 %v1597_v59, %v1629_v18  ;;  %v1041_v20 = vsub.f32 %v4287_v40, %v1009_v34  ;;  %v1692_v21 = vadd.f32 1.0, %v1660_v33  ;;  %v1343_v56 = vmul.f32 %v1311_v37, %v4312_v49  ;;  %vm2013_vm5 = vmor %vm1725_vm13, %vm1885_vm1 }
 0x19c   : > { %v1137_v44 = vmul.f32 7.54979e-08, %v2596_v27  ;;  %v801_v40 = vmul.f32 0.63661975, %v4356_v55  ;;  %v4375_v26 = vadd.f32 %v754_v36, %v590_v19  ;;  %vm1916_vm6 = vmor %vm1884_vm0, %vm1756_vm14  ;;  %v1360_v34 = vmul.f32 %v1328_v60, %v4316_v15 }
 0x19d   : > { %v1693_v52 = vadd.f32 1.0, %v1661_v3  ;;  %v1105_v63 = vsub.f32 %v1041_v20, %v1073_v5  ;;  %v1852_v57 = vsel %vm1788_vm2, %v1404_v58, %v1692_v21  ;;  %v1820_v22 = vsel %vm1788_vm2, %v1692_v21, %v1404_v58  ;;  %vm1917_vm7 = vmor %vm1885_vm1, %vm1757_vm15 }
 0x19e   : > { %v2044_v18 = vsub.f32 0.0, %v1852_v57  ;;  %v1948_v17 = vsub.f32 0.0, %v1820_v22  ;;  %v833_v11 = vadd.f32 65536.5, %v801_v40  ;;  %v818_v5 = vmul.f32 0.63661975, %v4375_v26 }
 0x19f   : > { %v1853_v61 = vsel %vm1789_vm3, %v1405_v42, %v1693_v52  ;;  %v1821_v27 = vsel %vm1789_vm3, %v1693_v52, %v1405_v42  ;;  %v4381_v37 = vsub.f32 %v1105_v63, %v1137_v44  ;;  %v4398_v19 = vand.u32 3, %v4246_v48 }
 0x1a0   : > { %v2045_v59 = vsub.f32 0.0, %v1853_v61  ;;  %v1949_v58 = vsub.f32 0.0, %v1821_v27  ;;  %v2076_v33 = vsel %vm2012_vm4, %v2044_v18, %v1852_v57  ;;  %v1980_v42 = vsel %vm1916_vm6, %v1948_v17, %v1820_v22 }
 0x1a1   : > { %v4395_v3 = vmul.f32 %v4381_v37, %v4381_v37  ;;  %v2898_v21 = vtrunc.f32 %v833_v11  ;;  %v850_v44 = vadd.f32 65536.5, %v818_v5  ;;  %v1454_v40 = vmul.f32 2.4433157e-05, %v4006_v46 }
 0x1a2   : > { %v2077_v20 = vsel %vm2013_vm5, %v2045_v59, %v1853_v61  ;;  %v1981_v39 = vsel %vm1917_vm7, %v1949_v58, %v1821_v27  ;;  %v1455_v63 = vmul.f32 2.4433157e-05, %v4137_v53  ;;  %v4408_v57 = vmul.f32 %v1343_v56, %v4299_v7 }
 0x1a3   : > { %v4400_v60 = vpack.c.bf16 %v2077_v20, %v2076_v33  ;;  %v4402_v36 = vpack.c.bf16 %v1981_v39, %v1980_v42  ;;  %v1233_v10 = vmul.f32 -0.00019515296, %v4395_v3  ;;  %v2899_v52 = vcvt.f32.s32 %v2898_v21 }
 0x1a4   : > { %v4411_v22 = vand.u32 3, %v4248_v43  ;;  %v4414_v48 = vand.u32 3, %v4334_v25  ;;  %v2932_v61 = vtrunc.f32 %v850_v44  ;;  %v4419_v18 = vmul.f32 %v1360_v34, %v4301_v45 }
 0x1a5   : > { %5017 = vst [vmem:[#allocation23_spill] sm:$0xff] %v4400_v60  ;;  %5018 = vst [vmem:[#allocation7_spill] sm:$0xff] %v4402_v36  ;;  %2763 = vmatpush3.bf16.msra.mxu0 %v4400_v60  ;;  %2795 = vmatpush3.bf16.msra.mxu1 %v4402_v36  ;;  %v1265_v27 = vadd.f32 0.008332161, %v1233_v10  ;;  %v897_v17 = vcvt.s32.f32 %v2899_v52  ;;  %v1486_v59 = vadd.f32 -0.0013887316, %v1454_v40  ;;  %v1422_v43 = vadd.f32 %v4145_v1, %v3991_v51 }
 0x1a6   : > { %v4421_v58 = vcvt.f32.s32 %v2932_v61  ;;  %v1423_v25 = vadd.f32 %v4322_v35, %v4125_v8  ;;  %v1487_v56 = vadd.f32 -0.0013887316, %v1455_v63  ;;  %v1582_v34 = vmul.f32 %v4006_v46, %v4006_v46  ;;  %v718_v63 = vpop.permute.xlu1 %717 }
 0x1a7   : > { %v1297_v11 = vmul.f32 %v1265_v27, %v4395_v3  ;;  %v2580_v33 = vadd.f32 -65536.0, %v897_v17  ;;  %v1518_v42 = vmul.f32 %v1486_v59, %v4006_v46  ;;  %v1583_v39 = vmul.f32 %v4137_v53, %v4137_v53 }
 0x1a8   : > { %v914_v5 = vcvt.s32.f32 %v4421_v58  ;;  %v1519_v20 = vmul.f32 %v1487_v56, %v4137_v53  ;;  %v1646_v51 = vmul.f32 0.5, %v4006_v46  ;;  %v4436_v8 = vand.u32 3, %v2899_v52 }
 0x1a9   : > { %v1329_v1 = vadd.f32 -0.16666655, %v1297_v11  ;;  %v993_v35 = vmul.f32 1.5703125, %v2580_v33  ;;  %v1647_v21 = vmul.f32 0.5, %v4137_v53  ;;  %v1550_v10 = vadd.f32 0.041666646, %v1518_v42 }
 0x1aa   : > { %v2597_v44 = vadd.f32 -65536.0, %v914_v5  ;;  %v1551_v40 = vadd.f32 0.041666646, %v1519_v20  ;;  %vm1742_vm8 = vcmp.eq.s32.totalorder %v4033_v31, 1  ;;  %v1057_v27 = vmul.f32 0.0004837513, %v2580_v33  ;;  %v474_v36 = vpop.permute.xlu1 %473 }
 0x1ab   : > { %v1025_v61 = vsub.f32 %v4356_v55, %v993_v35  ;;  %vm1743_vm9 = vcmp.eq.s32.totalorder %v4148_v6, 1  ;;  %vm1774_vm10 = vcmp.eq.s32.totalorder %v4033_v31, 3  ;;  %v1121_v46 = vmul.f32 7.54979e-08, %v2580_v33  ;;  %v5019_v33 = vld [vmem:[#allocation8_spill] sm:$0xff] }
 0x1ac   : > { %v1010_v17 = vmul.f32 1.5703125, %v2597_v44  ;;  %v1614_v52 = vmul.f32 %v1582_v34, %v1550_v10  ;;  %vm1775_vm11 = vcmp.eq.s32.totalorder %v4148_v6, 3  ;;  %v1361_v53 = vmul.f32 %v1329_v1, %v4395_v3  ;;  %vm1806_vm14 = vmor %vm1742_vm8, %vm1774_vm10 }
 0x1ad   : > { %v1089_v59 = vsub.f32 %v1025_v61, %v1057_v27  ;;  %v1615_v56 = vmul.f32 %v1583_v39, %v1551_v40  ;;  %v755_v11 = vmul.f32 %v4268_v38, %v718_v63  ;;  %v1074_v5 = vmul.f32 0.0004837513, %v2597_v44  ;;  %vm1807_vm15 = vmor %vm1743_vm9, %vm1775_vm11 }
 0x1ae   : > { %v1042_v42 = vsub.f32 %v4375_v26, %v1010_v17  ;;  %v1678_v55 = vsub.f32 %v1614_v52, %v1646_v51  ;;  %vm1902_vm12 = vcmp.eq.s32.totalorder %v4033_v31, 2  ;;  %vm1903_vm13 = vcmp.eq.s32.totalorder %v4148_v6, 2  ;;  %v5020_v26 = vld [vmem:[#allocation34_spill] sm:$0xff] }
 0x1af   : > { %v4448_v20 = vsub.f32 %v1089_v59, %v1121_v46  ;;  %v1679_v35 = vsub.f32 %v1615_v56, %v1647_v21  ;;  %v4452_v34 = vadd.f32 %v755_v11, %v5019_v33  ;;  %v1138_v1 = vmul.f32 7.54979e-08, %v2597_v44  ;;  %vm2030_vm0 = vmor %vm1742_vm8, %vm1902_vm12 }
 0x1b0   : > { %v1106_v10 = vsub.f32 %v1042_v42, %v1074_v5  ;;  %v1710_v61 = vadd.f32 1.0, %v1678_v55  ;;  %v1438_v39 = vmul.f32 2.4433157e-05, %v5020_v26  ;;  %v1439_v40 = vmul.f32 2.4433157e-05, %v4312_v49  ;;  %vm2031_vm1 = vmor %vm1743_vm9, %vm1903_vm13 }
 0x1b1   : > { %v4461_v51 = vmul.f32 %v4448_v20, %v4448_v20  ;;  %v1711_v21 = vadd.f32 1.0, %v1679_v35  ;;  %v819_v44 = vmul.f32 0.63661975, %v4452_v34  ;;  %vm1934_vm2 = vmor %vm1902_vm12, %vm1774_vm10  ;;  %vm1727_vm6 = vcmp.eq.s32.totalorder %v4398_v19, 1 }
 0x1b2   : > { %v4469_v63 = vsub.f32 %v1106_v10, %v1138_v1  ;;  %v1870_v27 = vsel %vm1806_vm14, %v1422_v43, %v1710_v61  ;;  %v1838_v46 = vsel %vm1806_vm14, %v1710_v61, %v1422_v43  ;;  %v1470_v17 = vadd.f32 -0.0013887316, %v1438_v39  ;;  %vm1935_vm3 = vmor %vm1903_vm13, %vm1775_vm11 }
 0x1b3   : > { %v1217_v52 = vmul.f32 -0.00019515296, %v4461_v51  ;;  %v1871_v59 = vsel %vm1807_vm15, %v1423_v25, %v1711_v21  ;;  %v2062_v56 = vsub.f32 0.0, %v1870_v27  ;;  %v1839_v11 = vsel %vm1807_vm15, %v1711_v21, %v1423_v25 }
 0x1b4   : > { %v4482_v42 = vmul.f32 %v4469_v63, %v4469_v63  ;;  %v2063_v5 = vsub.f32 0.0, %v1871_v59  ;;  %v1966_v43 = vsub.f32 0.0, %v1838_v46  ;;  %v1967_v55 = vsub.f32 0.0, %v1839_v11 }
 0x1b5   : > { %v1249_v35 = vadd.f32 0.008332161, %v1217_v52  ;;  %v2094_v33 = vsel %vm2030_vm0, %v2062_v56, %v1870_v27  ;;  %v851_v25 = vadd.f32 65536.5, %v819_v44  ;;  %v1471_v10 = vadd.f32 -0.0013887316, %v1439_v40 }
 0x1b6   : > { %v1234_v1 = vmul.f32 -0.00019515296, %v4482_v42  ;;  %v2095_v61 = vsel %vm2031_vm1, %v2063_v5, %v1871_v59  ;;  %v1998_v39 = vsel %vm1934_vm2, %v1966_v43, %v1838_v46  ;;  %v1999_v21 = vsel %vm1935_vm3, %v1967_v55, %v1839_v11 }
 0x1b7   : > { %v1281_v31 = vmul.f32 %v1249_v35, %v4461_v51  ;;  %v4494_v60 = vpack.c.bf16 %v2095_v61, %v2094_v33  ;;  %v4496_v12 = vpack.c.bf16 %v1999_v21, %v1998_v39  ;;  %v2934_v27 = vtrunc.f32 %v851_v25  ;;  %v5021_v21 = vld [vmem:[#allocation36_spill] sm:$0xff] }
 0x1b8   : > { %v4499_v52 = vand.u32 3, %v4421_v58  ;;  %v1266_v6 = vadd.f32 0.008332161, %v1234_v1  ;;  %v1502_v44 = vmul.f32 %v1470_v17, %v5020_v26  ;;  %v1503_v40 = vmul.f32 %v1471_v10, %v4312_v49  ;;  %v654_v1 = vpop.permute.xlu1 %653 }
 0x1b9   : > { %v4504_v59 = vmul.f32 %v1361_v53, %v4381_v37  ;;  %v1313_v46 = vadd.f32 -0.16666655, %v1281_v31  ;;  %2765 = vmatprep.subr.bf16.mxu0 %v4494_v60  ;;  %2797 = vmatprep.subr.bf16.mxu1 %v4496_v12  ;;  %v2935_v56 = vcvt.f32.s32 %v2934_v27  ;;  %v575_v11 = vmul.f32 %v4326_v28, %v474_v36 }
 0x1ba   : > { %v1534_v5 = vadd.f32 0.041666646, %v1502_v44  ;;  %v1535_v43 = vadd.f32 0.041666646, %v1503_v40  ;;  %v1566_v58 = vmul.f32 %v5020_v26, %v5020_v26  ;;  %v1567_v17 = vmul.f32 %v4312_v49, %v4312_v49 }
 0x1bb   : > { %v1298_v55 = vmul.f32 %v1266_v6, %v4482_v42  ;;  %v915_v53 = vcvt.s32.f32 %v2935_v56  ;;  %v1406_v35 = vadd.f32 %v3785_v29, %v3685_v9  ;;  %v1407_v33 = vadd.f32 %v4408_v57, %v4299_v7 }
 0x1bc   : > { %v1598_v25 = vmul.f32 %v1566_v58, %v1534_v5  ;;  %v1599_v10 = vmul.f32 %v1567_v17, %v1535_v43  ;;  %v1630_v28 = vmul.f32 0.5, %v5020_v26  ;;  %v1631_v36 = vmul.f32 0.5, %v4312_v49 }
 0x1bd   : > { %v1345_v61 = vmul.f32 %v1313_v46, %v4461_v51  ;;  %v2598_v39 = vadd.f32 -65536.0, %v915_v53  ;;  %vm1726_vm4 = vcmp.eq.s32.totalorder %v5021_v21, 1  ;;  %vm1758_vm5 = vcmp.eq.s32.totalorder %v5021_v21, 3 }
 0x1be   : > { %v1662_v31 = vsub.f32 %v1598_v25, %v1630_v28  ;;  %v1663_v27 = vsub.f32 %v1599_v10, %v1631_v36  ;;  %vm1759_vm7 = vcmp.eq.s32.totalorder %v4398_v19, 3  ;;  %v1330_v9 = vadd.f32 -0.16666655, %v1298_v55  ;;  %vm1790_vm9 = vmor %vm1726_vm4, %vm1758_vm5 }
 0x1bf   : > { %v1011_v29 = vmul.f32 1.5703125, %v2598_v39  ;;  %vm1886_vm8 = vcmp.eq.s32.totalorder %v5021_v21, 2  ;;  %v739_v7 = vmul.f32 %v4268_v38, %v654_v1  ;;  %v1075_v49 = vmul.f32 0.0004837513, %v2598_v39  ;;  %vm1791_vm11 = vmor %vm1727_vm6, %vm1759_vm7 }
 0x1c0   : > { %v1694_v57 = vadd.f32 1.0, %v1662_v31  ;;  %v1695_v26 = vadd.f32 1.0, %v1663_v27  ;;  %vm1887_vm10 = vcmp.eq.s32.totalorder %v4398_v19, 2  ;;  %v1139_v44 = vmul.f32 7.54979e-08, %v2598_v39  ;;  %vm2014_vm12 = vmor %vm1726_vm4, %vm1886_vm8 }
 0x1c1   : > { %v1043_v6 = vsub.f32 %v4452_v34, %v1011_v29  ;;  %v4537_v40 = vadd.f32 %v739_v7, %v575_v11  ;;  %v1456_v38 = vmul.f32 2.4433157e-05, %v4316_v15  ;;  %vm2015_vm13 = vmor %vm1727_vm6, %vm1887_vm10  ;;  %v4548_v53 = vand.u32 3, %v2935_v56 }
 0x1c2   : > { %v1854_v46 = vsel %vm1790_vm9, %v1406_v35, %v1694_v57  ;;  %v1855_v5 = vsel %vm1791_vm11, %v1407_v33, %v1695_v26  ;;  %v1822_v43 = vsel %vm1790_vm9, %v1694_v57, %v1406_v35  ;;  %v1823_v58 = vsel %vm1791_vm11, %v1695_v26, %v1407_v33  ;;  %vm1918_vm14 = vmor %vm1886_vm8, %vm1758_vm5 }
 0x1c3   : > { %v1107_v34 = vsub.f32 %v1043_v6, %v1075_v49  ;;  %v2046_v17 = vsub.f32 0.0, %v1854_v46  ;;  %v2047_v11 = vsub.f32 0.0, %v1855_v5  ;;  %v1950_v55 = vsub.f32 0.0, %v1822_v43  ;;  %vm1919_vm15 = vmor %vm1887_vm10, %vm1759_vm7 }
 0x1c4   : > { %v1951_v25 = vsub.f32 0.0, %v1823_v58  ;;  %v803_v35 = vmul.f32 0.63661975, %v4537_v40  ;;  %v1457_v33 = vmul.f32 2.4433157e-05, %v4395_v3  ;;  %v4565_v27 = vmul.f32 %v1345_v61, %v4448_v20 }
 0x1c5   : > { %v4556_v10 = vsub.f32 %v1107_v34, %v1139_v44  ;;  %v2078_v28 = vsel %vm2014_vm12, %v2046_v17, %v1854_v46  ;;  %v2079_v36 = vsel %vm2015_vm13, %v2047_v11, %v1855_v5  ;;  %v1982_v56 = vsel %vm1918_vm14, %v1950_v55, %v1822_v43 }
 0x1c6   : > { %v4562_v1 = vpack.c.bf16 %v2079_v36, %v2078_v28  ;;  %v1983_v39 = vsel %vm1919_vm15, %v1951_v25, %v1823_v58  ;;  %v835_v21 = vadd.f32 65536.5, %v803_v35  ;;  %v1488_v31 = vadd.f32 -0.0013887316, %v1456_v38 }
 0x1c7   : > { %v4569_v29 = vmul.f32 %v4556_v10, %v4556_v10  ;;  %v4571_v7 = vpack.c.bf16 %v1983_v39, %v1982_v56  ;;  %v1489_v49 = vadd.f32 -0.0013887316, %v1457_v33  ;;  %v4574_v57 = vmul.f32 %v1330_v9, %v4482_v42 }
 0x1c8   : > { %2767 = vmatpush3.bf16.msra.mxu0 %v4562_v1  ;;  %v2902_v19 = vtrunc.f32 %v835_v21  ;;  %v1424_v26 = vadd.f32 %v4419_v18, %v4301_v45  ;;  %v1520_v6 = vmul.f32 %v1488_v31, %v4316_v15  ;;  %v1425_v44 = vadd.f32 %v4504_v59, %v4381_v37 }
 0x1c9   : > { %v1235_v61 = vmul.f32 -0.00019515296, %v4569_v29  ;;  %2799 = vmatpush3.bf16.msra.mxu1 %v4571_v7  ;;  %v1521_v38 = vmul.f32 %v1489_v49, %v4395_v3  ;;  %v1584_v9 = vmul.f32 %v4316_v15, %v4316_v15  ;;  %v1585_v45 = vmul.f32 %v4395_v3, %v4395_v3 }
 0x1ca   : > { %v4587_v46 = vcvt.f32.s32 %v2902_v19  ;;  %v1552_v5 = vadd.f32 0.041666646, %v1520_v6  ;;  %v1648_v18 = vmul.f32 0.5, %v4316_v15  ;;  %v1649_v34 = vmul.f32 0.5, %v4395_v3 }
 0x1cb   : > { %v1267_v43 = vadd.f32 0.008332161, %v1235_v61  ;;  %v1553_v58 = vadd.f32 0.041666646, %v1521_v38  ;;  %vm1744_vm0 = vcmp.eq.s32.totalorder %v4411_v22, 1  ;;  %vm1745_vm1 = vcmp.eq.s32.totalorder %v4414_v48, 1 }
 0x1cc   : > { %v899_v37 = vcvt.s32.f32 %v4587_v46  ;;  %v1616_v59 = vmul.f32 %v1584_v9, %v1552_v5  ;;  %vm1776_vm2 = vcmp.eq.s32.totalorder %v4411_v22, 3  ;;  %vm1777_vm3 = vcmp.eq.s32.totalorder %v4414_v48, 3 }
 0x1cd   : > { %v1299_v17 = vmul.f32 %v1267_v43, %v4569_v29  ;;  %v1617_v11 = vmul.f32 %v1585_v45, %v1553_v58  ;;  %v1440_v15 = vmul.f32 2.4433157e-05, %v3735_v24  ;;  %vm1904_vm4 = vcmp.eq.s32.totalorder %v4411_v22, 2  ;;  %vm1808_vm6 = vmor %vm1744_vm0, %vm1776_vm2 }
 0x1ce   : > { %v2582_v55 = vadd.f32 -65536.0, %v899_v37  ;;  %v1680_v25 = vsub.f32 %v1616_v59, %v1648_v18  ;;  %v1441_v3 = vmul.f32 2.4433157e-05, %v4461_v51  ;;  %vm1905_vm5 = vcmp.eq.s32.totalorder %v4414_v48, 2  ;;  %vm1809_vm7 = vmor %vm1745_vm1, %vm1777_vm3 }
 0x1cf   : > { %v1681_v35 = vsub.f32 %v1617_v11, %v1649_v34  ;;  %v4605_v33 = vadd.f32 %v3843_v54, %v3727_v13  ;;  %v1472_v28 = vadd.f32 -0.0013887316, %v1440_v15  ;;  %v1331_v36 = vadd.f32 -0.16666655, %v1299_v17  ;;  %vm2032_vm8 = vmor %vm1744_vm0, %vm1904_vm4 }
 0x1d0   : > { %v995_v56 = vmul.f32 1.5703125, %v2582_v55  ;;  %v1712_v39 = vadd.f32 1.0, %v1680_v25  ;;  %v1568_v21 = vmul.f32 %v3735_v24, %v3735_v24  ;;  %v1473_v13 = vadd.f32 -0.0013887316, %v1441_v3  ;;  %vm2033_vm9 = vmor %vm1745_vm1, %vm1905_vm5 }
 0x1d1   : > { %v1713_v31 = vadd.f32 1.0, %v1681_v35  ;;  %v1504_v54 = vmul.f32 %v1472_v28, %v3735_v24  ;;  %v1569_v49 = vmul.f32 %v4461_v51, %v4461_v51  ;;  %v1059_v6 = vmul.f32 0.0004837513, %v2582_v55  ;;  %vm1936_vm10 = vmor %vm1904_vm4, %vm1776_vm2 }
 0x1d2   : > { %v1027_v19 = vsub.f32 %v4537_v40, %v995_v56  ;;  %v1872_v61 = vsel %vm1808_vm6, %v1424_v26, %v1712_v39  ;;  %v1840_v38 = vsel %vm1808_vm6, %v1712_v39, %v1424_v26  ;;  %v1123_v9 = vmul.f32 7.54979e-08, %v2582_v55  ;;  %vm1937_vm11 = vmor %vm1905_vm5, %vm1777_vm3 }
 0x1d3   : > { %v1873_v5 = vsel %vm1809_vm7, %v1425_v44, %v1713_v31  ;;  %v2064_v45 = vsub.f32 0.0, %v1872_v61  ;;  %v1841_v18 = vsel %vm1809_vm7, %v1713_v31, %v1425_v44  ;;  %v1968_v40 = vsub.f32 0.0, %v1840_v38 }
 0x1d4   : > { %v1091_v43 = vsub.f32 %v1027_v19, %v1059_v6  ;;  %v2065_v58 = vsub.f32 0.0, %v1873_v5  ;;  %v1969_v34 = vsub.f32 0.0, %v1841_v18  ;;  %v1505_v26 = vmul.f32 %v1473_v13, %v4461_v51  ;;  %v5022_v13 = vld [vmem:[#allocation37_spill] sm:$0xff] }
 0x1d5   : > { %v2096_v37 = vsel %vm2032_vm8, %v2064_v45, %v1872_v61  ;;  %v1536_v59 = vadd.f32 0.041666646, %v1504_v54  ;;  %v1632_v44 = vmul.f32 0.5, %v3735_v24  ;;  %v2000_v15 = vsel %vm1936_vm10, %v1968_v40, %v1840_v38 }
 0x1d6   : > { %v4639_v17 = vsub.f32 %v1091_v43, %v1123_v9  ;;  %v2097_v11 = vsel %vm2033_vm9, %v2065_v58, %v1873_v5  ;;  %v2001_v55 = vsel %vm1937_vm11, %v1969_v34, %v1841_v18  ;;  %v1537_v3 = vadd.f32 0.041666646, %v1505_v26 }
 0x1d7   : > { %v4641_v22 = vpack.c.bf16 %v2097_v11, %v2096_v37  ;;  %v4643_v25 = vpack.c.bf16 %v2001_v55, %v2000_v15  ;;  %v1600_v35 = vmul.f32 %v1568_v21, %v1536_v59  ;;  %v1363_v28 = vmul.f32 %v1331_v36, %v4569_v29 }
 0x1d8   : > { %v4648_v48 = vmul.f32 %v4639_v17, %v4639_v17  ;;  %v1409_v24 = vadd.f32 %v4565_v27, %v4448_v20  ;;  %v1633_v56 = vmul.f32 0.5, %v4461_v51  ;;  %v1601_v39 = vmul.f32 %v1569_v49, %v1537_v3 }
 0x1d9   : > { %2769 = vmatprep.subr.bf16.mxu0 %v4641_v22  ;;  %2801 = vmatprep.subr.bf16.mxu1 %v4643_v25  ;;  %v1664_v31 = vsub.f32 %v1600_v35, %v1632_v44  ;;  %vm1728_vm12 = vcmp.eq.s32.totalorder %v5022_v13, 1  ;;  %vm1760_vm13 = vcmp.eq.s32.totalorder %v5022_v13, 3  ;;  %vm1729_vm14 = vcmp.eq.s32.totalorder %v4436_v8, 1 }
 0x1da   : > { %v1219_v36 = vmul.f32 -0.00019515296, %v4648_v48  ;;  %vm1761_vm15 = vcmp.eq.s32.totalorder %v4436_v8, 3  ;;  %vm1888_vm0 = vcmp.eq.s32.totalorder %v5022_v13, 2  ;;  %v1665_v20 = vsub.f32 %v1601_v39, %v1633_v56  ;;  %vm1792_vm1 = vmor %vm1728_vm12, %vm1760_vm13 }
 0x1db   : > { %v1696_v51 = vadd.f32 1.0, %v1664_v31  ;;  %v1458_v27 = vmul.f32 2.4433157e-05, %v4482_v42  ;;  %v1459_v21 = vmul.f32 2.4433157e-05, %v4569_v29  ;;  %v1394_v54 = vmul.f32 %v4574_v57, %v4469_v63  ;;  %vm1793_vm3 = vmor %vm1729_vm14, %vm1761_vm15 }
 0x1dc   : > { %v1395_v49 = vmul.f32 %v1363_v28, %v4556_v10  ;;  %v1251_v19 = vadd.f32 0.008332161, %v1219_v36  ;;  %vm1889_vm2 = vcmp.eq.s32.totalorder %v4436_v8, 2  ;;  %v1697_v6 = vadd.f32 1.0, %v1665_v20  ;;  %vm2016_vm4 = vmor %vm1728_vm12, %vm1888_vm0 }
 0x1dd   : > { %v1856_v61 = vsel %vm1792_vm1, %v4605_v33, %v1696_v51  ;;  %v1824_v57 = vsel %vm1792_vm1, %v1696_v51, %v4605_v33  ;;  %v1490_v38 = vadd.f32 -0.0013887316, %v1458_v27  ;;  %v1491_v18 = vadd.f32 -0.0013887316, %v1459_v21  ;;  %vm2017_vm5 = vmor %vm1729_vm14, %vm1889_vm2 }
 0x1de   : > { %v1283_v9 = vmul.f32 %v1251_v19, %v4648_v48  ;;  %v2048_v5 = vsub.f32 0.0, %v1856_v61  ;;  %v1952_v45 = vsub.f32 0.0, %v1824_v57  ;;  %v1857_v43 = vsel %vm1793_vm3, %v1409_v24, %v1697_v6  ;;  %vm1920_vm6 = vmor %vm1888_vm0, %vm1760_vm13 }
 0x1df   : > { %v1825_v58 = vsel %vm1793_vm3, %v1697_v6, %v1409_v24  ;;  %v1522_v33 = vmul.f32 %v1490_v38, %v4482_v42  ;;  %v1586_v40 = vmul.f32 %v4482_v42, %v4482_v42  ;;  %v2049_v37 = vsub.f32 0.0, %v1857_v43  ;;  %vm1921_vm7 = vmor %vm1889_vm2, %vm1761_vm15 }
 0x1e0   : > { %v1315_v34 = vadd.f32 -0.16666655, %v1283_v9  ;;  %v1953_v26 = vsub.f32 0.0, %v1825_v58  ;;  %v1587_v59 = vmul.f32 %v4569_v29, %v4569_v29  ;;  %v2080_v44 = vsel %vm2016_vm4, %v2048_v5, %v1856_v61 }
 0x1e1   : > { %v1523_v11 = vmul.f32 %v1491_v18, %v4569_v29  ;;  %v1554_v15 = vadd.f32 0.041666646, %v1522_v33  ;;  %v1650_v55 = vmul.f32 0.5, %v4482_v42  ;;  %v2081_v35 = vsel %vm2017_vm5, %v2049_v37, %v1857_v43  ;;  %v5034_v33 = vld [vmem:[#allocation9_spill] sm:$0xff] }
 0x1e2   : > { %v1347_v3 = vmul.f32 %v1315_v34, %v4648_v48  ;;  %v1984_v28 = vsel %vm1920_vm6, %v1952_v45, %v1824_v57  ;;  %v1985_v24 = vsel %vm1921_vm7, %v1953_v26, %v1825_v58  ;;  %v4702_v56 = vpack.c.bf16 %v2081_v35, %v2080_v44  ;;  %v4762_v26 = vld [vmem:[%s329_s12] sm:$0xff] }
 0x1e3   : > { %v4704_v39 = vpack.c.bf16 %v1985_v24, %v1984_v28  ;;  %v1555_v31 = vadd.f32 0.041666646, %v1523_v11  ;;  %v1618_v13 = vmul.f32 %v1586_v40, %v1554_v15  ;;  %v4707_v8 = vand.u32 3, %v4587_v46  ;;  %v5027_v15 = vld [vmem:[#allocation42_spill] sm:$0xff] }
 0x1e4   : > { %v1426_v36 = vadd.f32 %v1394_v54, %v4469_v63  ;;  %v1427_v20 = vadd.f32 %v1395_v49, %v4556_v10  ;;  %v1651_v42 = vmul.f32 0.5, %v4569_v29  ;;  %2771 = vmatpush3.bf16.msra.mxu0 %v4702_v56  ;;  %vm1746_vm8 = vcmp.eq.s32.totalorder %v4499_v52, 1 }
 0x1e5   : > { %2803 = vmatpush3.bf16.msra.mxu1 %v4704_v39  ;;  %v1619_v51 = vmul.f32 %v1587_v59, %v1555_v31  ;;  %v1682_v27 = vsub.f32 %v1618_v13, %v1650_v55  ;;  %vm1778_vm9 = vcmp.eq.s32.totalorder %v4499_v52, 3  ;;  %vm1747_vm10 = vcmp.eq.s32.totalorder %v4548_v53, 1  ;;  %v4764_v59 = vld [vmem:[%s334_s15] sm:$0xff] }
 0x1e6   : > { %vm1779_vm11 = vcmp.eq.s32.totalorder %v4548_v53, 3  ;;  %v1442_v63 = vmul.f32 2.4433157e-05, %v3764_v30  ;;  %v1443_v10 = vmul.f32 2.4433157e-05, %v4648_v48  ;;  %v1379_v29 = vmul.f32 %v1347_v3, %v4639_v17  ;;  %vm1810_vm13 = vmor %vm1746_vm8, %vm1778_vm9 }
 0x1e7   : > { %v1683_v46 = vsub.f32 %v1619_v51, %v1651_v42  ;;  %v1714_v21 = vadd.f32 1.0, %v1682_v27  ;;  %vm1906_vm12 = vcmp.eq.s32.totalorder %v4499_v52, 2  ;;  %vm1907_vm14 = vcmp.eq.s32.totalorder %v4548_v53, 2  ;;  %vm1811_vm15 = vmor %vm1747_vm10, %vm1779_vm11 }
 0x1e8   : > { %v1474_v54 = vadd.f32 -0.0013887316, %v1442_v63  ;;  %v1475_v49 = vadd.f32 -0.0013887316, %v1443_v10  ;;  %v1570_v19 = vmul.f32 %v3764_v30, %v3764_v30  ;;  %v1571_v38 = vmul.f32 %v4648_v48, %v4648_v48  ;;  %vm4746_vm0 = vmor %vm1746_vm8, %vm1906_vm12 }
 0x1e9   : > { %v1715_v6 = vadd.f32 1.0, %v1683_v46  ;;  %v1874_v61 = vsel %vm1810_vm13, %v1426_v36, %v1714_v21  ;;  %v1842_v57 = vsel %vm1810_vm13, %v1714_v21, %v1426_v36  ;;  %vm4756_vm1 = vmor %vm1747_vm10, %vm1907_vm14  ;;  %v1634_v34 = vmul.f32 0.5, %v3764_v30 }
 0x1ea   : > { %v2066_v5 = vsub.f32 0.0, %v1874_v61  ;;  %v1970_v45 = vsub.f32 0.0, %v1842_v57  ;;  %v1506_v18 = vmul.f32 %v1474_v54, %v3764_v30  ;;  %v1507_v43 = vmul.f32 %v1475_v49, %v4648_v48  ;;  %vm1938_vm2 = vmor %vm1906_vm12, %vm1778_vm9 }
 0x1eb   : > { %v1875_v58 = vsel %vm1811_vm15, %v1427_v20, %v1715_v6  ;;  %v1843_v40 = vsel %vm1811_vm15, %v1715_v6, %v1427_v20  ;;  %v1635_v37 = vmul.f32 0.5, %v4648_v48  ;;  %vm1730_vm3 = vcmp.eq.s32.totalorder %v5027_v15, 1  ;;  %vm1939_vm5 = vmor %vm1907_vm14, %vm1779_vm11 }
 0x1ec   : > { %v2067_v44 = vsub.f32 0.0, %v1875_v58  ;;  %v1971_v11 = vsub.f32 0.0, %v1843_v40  ;;  %vm1762_vm4 = vcmp.eq.s32.totalorder %v5027_v15, 3  ;;  %v2098_v30 = vsel %vm4746_vm0, %v2066_v5, %v1874_v61  ;;  %v5028_v5 = vld [vmem:[#allocation2_spill] sm:$0xff] }
 0x1ed   : > { %v2002_v48 = vsel %vm1938_vm2, %v1970_v45, %v1842_v57  ;;  %v1538_v55 = vadd.f32 0.041666646, %v1506_v18  ;;  %v1539_v3 = vadd.f32 0.041666646, %v1507_v43  ;;  %v2103_v28 = vcombine.high %v4762_v26, %v4762_v26  ;;  %vm1794_vm9 = vmor %vm1730_vm3, %vm1762_vm4  ;;  %v5029_v45 = vld [vmem:[#allocation3_spill] sm:$0xff]  ;;  %v5031_v18 = vld [vmem:[#allocation5_spill] sm:$0xff] }
 0x1ee   : > { %v2099_v52 = vsel %vm4756_vm1, %v2067_v44, %v1875_v58  ;;  %v2003_v35 = vsel %vm1939_vm5, %v1971_v11, %v1843_v40  ;;  %v2176_v24 = vcombine.high %v4764_v59, %v4764_v59  ;;  %v1410_v20 = vadd.f32 %v3856_v16, %v3757_v4  ;;  %v5032_v43 = vld [vmem:[#allocation11_spill] sm:$0xff]  ;;  %v5033_v58 = vld [vmem:[#allocation13_spill] sm:$0xff] }
 0x1ef   : > { %v4784_v31 = vpack.c.bf16 %v2099_v52, %v2098_v30  ;;  %v4786_v13 = vpack.c.bf16 %v2003_v35, %v2002_v48  ;;  %v1602_v36 = vmul.f32 %v1570_v19, %v1538_v55  ;;  %v1603_v53 = vmul.f32 %v1571_v38, %v1539_v3  ;;  %2169 = vmatprep.mubr.f32.mxu0 %v2103_v28  ;;  %v5035_v40 = vld [vmem:[#allocation17_spill] sm:$0xff] }
 0x1f0   : > { %vm1731_vm6 = vcmp.eq.s32.totalorder %v4707_v8, 1  ;;  %vm1763_vm7 = vcmp.eq.s32.totalorder %v4707_v8, 3  ;;  %2242 = vmatprep.mubr.f32.mxu1 %v2176_v24  ;;  %v1411_v42 = vadd.f32 %v1379_v29, %v4639_v17  ;;  %vm1890_vm8 = vcmp.eq.s32.totalorder %v5027_v15, 2 }
 0x1f1   : > { %2773 = vmatprep.subr.bf16.mxu0 %v4784_v31  ;;  %2805 = vmatprep.subr.bf16.mxu1 %v4786_v13  ;;  %v1666_v51 = vsub.f32 %v1602_v36, %v1634_v34  ;;  %v1667_v27 = vsub.f32 %v1603_v53, %v1635_v37  ;;  %vm1891_vm10 = vcmp.eq.s32.totalorder %v4707_v8, 2  ;;  %vm1795_vm11 = vmor %vm1731_vm6, %vm1763_vm7  ;;  %v5030_v8 = vld [vmem:[#allocation19_spill] sm:$0xff] }
 0x1f2   : > { %vm2018_vm12 = vmor %vm1730_vm3, %vm1890_vm8 }
 0x1f3   : > { %v1698_v4 = vadd.f32 1.0, %v1666_v51  ;;  %v1699_v16 = vadd.f32 1.0, %v1667_v27  ;;  %vm2019_vm13 = vmor %vm1731_vm6, %vm1891_vm10 }
 0x1f4   : > { %vm1922_vm14 = vmor %vm1890_vm8, %vm1762_vm4 }
 0x1f5   : > { %v1858_v17 = vsel %vm1794_vm9, %v1410_v20, %v1698_v4  ;;  %v1859_v63 = vsel %vm1795_vm11, %v1411_v42, %v1699_v16  ;;  %v1826_v10 = vsel %vm1794_vm9, %v1698_v4, %v1410_v20  ;;  %v1827_v29 = vsel %vm1795_vm11, %v1699_v16, %v1411_v42  ;;  %vm1923_vm15 = vmor %vm1891_vm10, %vm1763_vm7 }
 0x1f6   : > { %v2050_v46 = vsub.f32 0.0, %v1858_v17  ;;  %v2051_v21 = vsub.f32 0.0, %v1859_v63  ;;  %v1954_v54 = vsub.f32 0.0, %v1826_v10  ;;  %v1955_v49 = vsub.f32 0.0, %v1827_v29 }
 0x1f8   : > { %v2082_v19 = vsel %vm2018_vm12, %v2050_v46, %v1858_v17  ;;  %v2083_v6 = vsel %vm2019_vm13, %v2051_v21, %v1859_v63  ;;  %v1986_v61 = vsel %vm1922_vm14, %v1954_v54, %v1826_v10  ;;  %v1987_v57 = vsel %vm1923_vm15, %v1955_v49, %v1827_v29 }
 0x1f9   : > { %v2774_v38 = vpack.c.bf16 %v2083_v6, %v2082_v19  ;;  %v2806_v9 = vpack.c.bf16 %v1987_v57, %v1986_v61 }
 0x1fb   : > { %2775 = vmatpush3.bf16.msra.mxu0 %v2774_v38  ;;  %2807 = vmatpush3.bf16.msra.mxu1 %v2806_v9 }
 0x1fc   : > { %2809 = vmatprep.subr.bf16.mxu0 %v5028_v5  ;;  %2841 = vmatprep.subr.bf16.mxu1 %v5029_v45 }
 0x1fe   : > { %2170 = vmatmul.mubr.f32.vlgmr.msra.gmra.mrb[0].mxu0 %v4762_v26  ;;  %2243 = vmatmul.mubr.f32.vlgmr.msra.gmra.mrb[0].mxu1 %v4764_v59 }
 0x1ff   : > { %2811 = vmatpush3.bf16.msra.mxu0 %v3832_v47  ;;  %2843 = vmatpush3.bf16.msra.mxu1 %v3838_v2  ;;  %v5036_v47 = vld [vmem:[#allocation12_spill] sm:$0xff]  ;;  %v5037_v2 = vld [vmem:[#allocation23_spill] sm:$0xff] }
 0x200   : > { %2813 = vmatprep.subr.bf16.mxu0 %v3941_v32  ;;  %2845 = vmatprep.subr.bf16.mxu1 %v3943_v14  ;;  %v5038_v32 = vld [vmem:[#allocation7_spill] sm:$0xff] }
 0x201   : > { %2314 = vmatprep.mubr.f32.mxu0 %v2176_v24  ;;  %2384 = vmatprep.mubr.f32.mxu1 %v2103_v28 }
 0x203   : > { %2815 = vmatpush3.bf16.msra.mxu0 %v5030_v8  ;;  %2847 = vmatpush3.bf16.msra.mxu1 %v5031_v18 }
 0x204   : > { %2817 = vmatprep.subr.bf16.mxu0 %v5032_v43  ;;  %2849 = vmatprep.subr.bf16.mxu1 %v5033_v58 }
 0x207   : > { %2819 = vmatpush3.bf16.msra.mxu0 %v5034_v33  ;;  %2851 = vmatpush3.bf16.msra.mxu1 %v5035_v40 }
 0x208   : > { %2821 = vmatprep.subr.bf16.mxu0 %v4187_v0  ;;  %2853 = vmatprep.subr.bf16.mxu1 %v4189_v41 }
 0x20b   : > { %2823 = vmatpush3.bf16.msra.mxu0 %v4241_v23  ;;  %2855 = vmatpush3.bf16.msra.mxu1 %v4243_v50 }
 0x20c   : > { %2825 = vmatprep.subr.bf16.mxu0 %v4307_v62  ;;  %2857 = vmatprep.subr.bf16.mxu1 %v5036_v47 }
 0x20f   : > { %2827 = vmatpush3.bf16.msra.mxu0 %v5037_v2  ;;  %2859 = vmatpush3.bf16.msra.mxu1 %v5038_v32 }
 0x210   : > { %2829 = vmatprep.subr.bf16.mxu0 %v4494_v60  ;;  %2861 = vmatprep.subr.bf16.mxu1 %v4496_v12  ;;  %v2599_v12 = vld [vmem:[%s347_s18] ss:$0 sm:$0xff] }
 0x213   : > { %2831 = vmatpush3.bf16.msra.mxu0 %v4562_v1  ;;  %2863 = vmatpush3.bf16.msra.mxu1 %v4571_v7 }
 0x214   : > { %2833 = vmatprep.subr.bf16.mxu0 %v4641_v22  ;;  %2865 = vmatprep.subr.bf16.mxu1 %v4643_v25 }
 0x217   : > { %2835 = vmatpush3.bf16.msra.mxu0 %v4702_v56  ;;  %2867 = vmatpush3.bf16.msra.mxu1 %v4704_v39 }
 0x218   : > { %2837 = vmatprep.subr.bf16.mxu0 %v4784_v31  ;;  %2869 = vmatprep.subr.bf16.mxu1 %v4786_v13 }
 0x21b   : > { %2839 = vmatpush3.bf16.msra.mxu0 %v2774_v38  ;;  %2871 = vmatpush3.bf16.msra.mxu1 %v2806_v9 }
 0x21e   : > { %2315 = vmatmul.mubr.f32.vlgmr.msra.gmra.mrb[2].mxu0 %v4764_v59  ;;  %2385 = vmatmul.mubr.f32.vlgmr.msra.gmra.mrb[2].mxu1 %v4762_v26 }
 0x2d1   : > { %v2636_v14 = vpop.f32.mrb[0].mxu0  ;;  %v2671_v0 = vpop.f32.mrb[0].mxu1 }
 0x2d2   : > { %v2637_v41 = vpop.f32.mrb[1].mxu0  ;;  %v2672_v23 = vpop.f32.mrb[1].mxu1 }
 0x2d3   : > { %v2638_v50 = vadd.f32 %v2637_v41, %v2636_v14  ;;  %v2673_v62 = vadd.f32 %v2672_v23, %v2671_v0 }
 0x2d5   : > { %v2248_v60 = vsub.f32 %v2638_v50, %v2673_v62 }
 0x2d7   : > { %v2398_v1 = vmul.f32 %v2599_v12, %v2248_v60 }
 0x2d9   : > { %2399 = vst [vmem:[%s354_s26] sm:$0xf] %v2398_v1 }
 0x2f1   : > { %v2706_v7 = vpop.f32.mrb[2].mxu0  ;;  %v2741_v22 = vpop.f32.mrb[2].mxu1 }
 0x2f2   : > { %v2707_v25 = vpop.f32.mrb[3].mxu0  ;;  %v2742_v56 = vpop.f32.mrb[3].mxu1 }
 0x2f3   : > { %v2708_v39 = vadd.f32 %v2707_v25, %v2706_v7  ;;  %v2743_v34 = vadd.f32 %v2742_v56, %v2741_v22 }
 0x2f5   : > { %v2387_v37 = vadd.f32 %v2743_v34, %v2708_v39 }
 0x2f7   : > { %v2400_v26 = vmul.f32 %v2599_v12, %v2387_v37 }
 0x2f9   : > { %2401 = vst [vmem:[%s361_s21] sm:$0xf] %v2400_v26 }
 0x2fa PF: > { %s17_s23 = sadd.s32 1, %s3023_s23   ;;  %s5039_s21 = smov %s3019_s22 }
 0x2fb   : > { %p14_p5 = scmp.ge.s32.totalorder %s17_s23, 4   ;;  %s5040_s22 = smov %s5042_s24 }
 0x2fd   :  { %16 = sbr.rel (!%p14_p5) target bundleno = 2 (0x2), region = 91 }

</bundles_post_ra>
